<compile_context>
chip_gen: v6e
topology: v6e:2x2x1
jax: 0.10.0
libtpu: 0.0.40
codegen_flags: <defaults>
</compile_context>

<pallas_src>
import numpy as np
import jax
import jax.numpy as jnp
from jax.experimental import pallas as pl
from jax.experimental.pallas import tpu as pltpu

DOWN = 64      # total temporal downsampling of the conv stack (3 stages of x4)
LANE = 128     # TPU lane width
SUB = 8        # f32 sublane height


def _round_up(n, m):
    return -(-n // m) * m


# -----------------------------------------------------------------------------
# Fold Conv1d(stride=2, pad=P) + ReLU + MaxPool1d(2,2) into ONE matmul operand.
#
# Activation layout (space-to-depth, time-major):
#   row  = t * BP + b          (BP = sublane-padded batch)
#   lane = local_position * Cin + channel, F local positions per row,
#          padded with zero lanes up to `in_pad`.
# The kernel LHS for one stage is  [act | prev_window | next_window]  where the
# prev/next windows are the last/first HW(=128) lanes of the +-BP row-shifted
# activation (zero rows at the sequence ends emulate the conv zero padding).
# Output: relu(max(z_phase0, z_phase1) + bias)  ==  maxpool(relu(conv + bias)).
# -----------------------------------------------------------------------------
def _build_conv_operand(w, b, P, F, in_pad, half_pad):
    w = np.asarray(w, np.float32)
    b = np.asarray(b, np.float32)
    Cout, Cin, K = w.shape
    Fp = F // 4                          # pooled output positions per row
    half = Fp * Cout
    FC = F * Cin
    assert half_pad >= half and in_pad >= FC
    HW = min(in_pad, LANE)               # halo window width (lane-aligned)
    assert (F - P) * Cin >= in_pad - HW  # prev window covers the needed tail
    has_next = (K - 2 - P) > 0
    rows = in_pad + HW + (HW if has_next else 0)

    A = np.zeros((rows, 2 * half_pad), np.float32)
    for phase in range(2):               # conv outputs 2q, 2q+1 feeding the pool
        for j in range(Fp):
            col = phase * half_pad + j * Cout
            for k in range(K):
                p = 4 * j + 2 * phase + k - P          # local input position
                blk = w[:, :, k].T                     # (Cin, Cout)
                if 0 <= p < F:                         # same row
                    r0 = p * Cin
                elif p < 0:                            # prev-row tail window
                    r0 = in_pad + ((F + p) * Cin - (in_pad - HW))
                else:                                  # next-row head window
                    r0 = in_pad + HW + (p - F) * Cin
                A[r0:r0 + Cin, col:col + Cout] = blk
    bias = np.zeros((1, half_pad), np.float32)
    bias[0, :half] = np.tile(b, Fp)
    return A, bias, has_next


# -----------------------------------------------------------------------------
# Fused kernel: conv stack + multi-layer LSTM + Linear.
# -----------------------------------------------------------------------------
def make_fused_kernel(R, BP, H, num_layers, conv_meta):
    RBP = R * BP

    def kernel(*refs):
        x_ref = refs[0]
        conv_refs = refs[1:7]                         # (A, bias) x 3 stages
        lstm_refs = refs[7:7 + 3 * num_layers]
        fcw_ref, fcb_ref, o_ref = refs[7 + 3 * num_layers:]

        def conv_block(act, A_ref, bias_ref, has_next):
            FCp = act.shape[1]
            half_pad = bias_ref.shape[1]
            HW = min(FCp, LANE)
            zrows = jnp.zeros((BP, HW), jnp.float32)
            # prev[row] = act[row - BP] (same batch, previous time block), zeros
            # at t == 0; next[row] = act[row + BP], zeros at t == R-1.  All row
            # offsets are multiples of BP=8 and all lane slices / concat pieces
            # are 128-lane aligned, so no masked stores / relayouts are needed.
            prev = jnp.concatenate(
                [zrows, act[:RBP - BP, FCp - HW:]], axis=0)
            pieces = [act, prev]
            if has_next:
                pieces.append(
                    jnp.concatenate([act[BP:, :HW], zrows], axis=0))
            lhs = jnp.concatenate(pieces, axis=1).astype(jnp.bfloat16)
            z = jnp.dot(lhs, A_ref[...], preferred_element_type=jnp.float32)
            # maxpool(relu(conv + bias)) == relu(max(phase0, phase1) + bias)
            y = jnp.maximum(z[:, :half_pad], z[:, half_pad:]) + bias_ref[...]
            return jnp.maximum(y, 0.0)

        a = x_ref[...]                                # (RBP, 128) raw signal
        for s in range(3):
            a = conv_block(a, conv_refs[2 * s], conv_refs[2 * s + 1],
                           conv_meta[s])
        # a: (RBP, 128), real features in lanes [0, D); row = t*BP + b.

        # ---- multi-layer LSTM (PyTorch gate order i,f,g,o), eval-mode forward --
        x_seq = a
        h = jnp.zeros((BP, H), jnp.float32)
        for l in range(num_layers):
            wih = lstm_refs[3 * l][...]               # bf16 (in_dim_pad, 4H)
            whh = lstm_refs[3 * l + 1][...]           # bf16 (H, 4H)
            lb = lstm_refs[3 * l + 2][...]            # f32  (1, 4H) = b_ih+b_hh
            # Input projection hoisted off the serial recurrence.
            gx = jnp.dot(x_seq.astype(jnp.bfloat16), wih,
                         preferred_element_type=jnp.float32) + lb
            h = jnp.zeros((BP, H), jnp.float32)
            c = jnp.zeros((BP, H), jnp.float32)
            last = l == num_layers - 1
            hs = []
            # Static unroll (R=8 is small).  TODO(synk): if R grows beyond ~16,
            # switch to lax.fori_loop(..., unroll=<small>) to bound live ranges.
            for t in range(R):
                g = gx[t * BP:(t + 1) * BP, :] + jnp.dot(
                    h.astype(jnp.bfloat16), whh,
                    preferred_element_type=jnp.float32)
                sg = jax.nn.sigmoid(g)       # one EUP pass over all four gates
                tg = jnp.tanh(g)             # one EUP pass over all four gates
                c = sg[:, H:2 * H] * c + sg[:, 0:H] * tg[:, 2 * H:3 * H]
                h = sg[:, 3 * H:4 * H] * jnp.tanh(c)
                if not last:
                    hs.append(h)
            if not last:
                x_seq = jnp.concatenate(hs, axis=0)   # (RBP, H) register value
            # TODO(synk): nn.LSTM inter-layer dropout (p=0.5) is train-time
            # only; this kernel reproduces the eval-mode forward (no dropout).

        o_ref[...] = (jnp.dot(h.astype(jnp.bfloat16), fcw_ref[...],
                              preferred_element_type=jnp.float32)
                      + fcb_ref[...])

    return kernel


# -----------------------------------------------------------------------------
# Parameters: raw (PyTorch-layout) init + precomputed kernel operands.
# -----------------------------------------------------------------------------
def init_raw_params(key, input_size, hidden_size, num_layers, num_classes):
    def uniform(k, shape, bound):
        return jax.random.uniform(k, shape, jnp.float32, -bound, bound)

    keys = iter(jax.random.split(key, 32))
    conv_cfg = [(16, 1, 7), (32, 16, 5), (input_size, 32, 3)]
    conv = []
    for cout, cin, k in conv_cfg:
        bound = 1.0 / (cin * k) ** 0.5
        conv.append((uniform(next(keys), (cout, cin, k), bound),
                     uniform(next(keys), (cout,), bound)))
    bound = 1.0 / hidden_size ** 0.5
    lstm = []
    for l in range(num_layers):
        in_dim = input_size if l == 0 else hidden_size
        lstm.append((uniform(next(keys), (4 * hidden_size, in_dim), bound),
                     uniform(next(keys), (4 * hidden_size, hidden_size), bound),
                     uniform(next(keys), (4 * hidden_size,), bound),
                     uniform(next(keys), (4 * hidden_size,), bound)))
    return dict(conv=conv, lstm=lstm,
                fc_w=uniform(next(keys), (num_classes, hidden_size), bound),
                fc_b=uniform(next(keys), (num_classes,), bound),
                input_size=input_size, hidden_size=hidden_size,
                num_layers=num_layers, num_classes=num_classes)


def prepare_params(raw):
    conv_pad = [3, 2, 1]
    s2d = [64, 16, 4]            # input positions per row at each conv stage
    conv_ops, conv_meta = [], []
    in_pad = _round_up(s2d[0], LANE)          # stage-1 input lanes (Cin=1)
    for (w, b), P, F in zip(raw["conv"], conv_pad, s2d):
        half = (F // 4) * w.shape[0]
        half_pad = _round_up(half, LANE)      # lane-align the pool-max slice
        A, bias, has_next = _build_conv_operand(
            np.asarray(w), np.asarray(b), P, F, in_pad, half_pad)
        conv_ops += [jnp.asarray(A, jnp.bfloat16), jnp.asarray(bias)]
        conv_meta.append(has_next)
        in_pad = half_pad                     # next stage's padded input width
    feat_pad = in_pad                         # padded stage-3 feature width

    lstm_ops = []
    for l, (w_ih, w_hh, b_ih, b_hh) in enumerate(raw["lstm"]):
        wih_t = np.asarray(w_ih, np.float32).T              # (in_dim, 4H)
        if l == 0 and wih_t.shape[0] < feat_pad:            # match padded feats
            wih_t = np.pad(wih_t, ((0, feat_pad - wih_t.shape[0]), (0, 0)))
        lstm_ops += [jnp.asarray(wih_t, jnp.bfloat16),
                     jnp.asarray(np.asarray(w_hh, np.float32).T, jnp.bfloat16),
                     jnp.asarray((np.asarray(b_ih) + np.asarray(b_hh)
                                  ).reshape(1, -1), jnp.float32)]

    C, H = raw["num_classes"], raw["hidden_size"]
    out_pad = _round_up(C, LANE)              # lane-align the final store
    fc_w = np.zeros((H, out_pad), np.float32)
    fc_w[:, :C] = np.asarray(raw["fc_w"], np.float32).T
    fc_b = np.zeros((1, out_pad), np.float32)
    fc_b[0, :C] = np.asarray(raw["fc_b"], np.float32)

    return dict(conv_ops=conv_ops, conv_meta=tuple(conv_meta),
                lstm_ops=lstm_ops,
                fc_w=jnp.asarray(fc_w, jnp.bfloat16),
                fc_b=jnp.asarray(fc_b, jnp.float32),
                hidden_size=H, num_layers=raw["num_layers"],
                num_classes=C, out_pad=out_pad)


def ecg_classifier_lstm_forward(x, prepared):
    # x: (B, 1, L)  -- PyTorch NCW input
    B, cin, L = x.shape
    assert cin == 1 and L % DOWN == 0, "kernel assumes Cin=1 and L % 64 == 0"
    R = L // DOWN                             # = T after the conv/pool stack
    BP = _round_up(max(B, SUB), SUB)          # sublane-padded batch
    XW = _round_up(DOWN, LANE)                # lane-padded raw window width

    # Space-to-depth + time-major rows: row = t*BP + b holds 64 raw samples.
    xr = x.reshape(B, R, DOWN).astype(jnp.float32)
    xr = jnp.pad(xr, ((0, BP - B), (0, 0), (0, XW - DOWN)))
    x2d = xr.transpose(1, 0, 2).reshape(R * BP, XW)

    out_pad = prepared["out_pad"]
    args = ([x2d] + list(prepared["conv_ops"]) + list(prepared["lstm_ops"])
            + [prepared["fc_w"], prepared["fc_b"]])

    kernel = make_fused_kernel(R, BP, prepared["hidden_size"],
                               prepared["num_layers"], prepared["conv_meta"])
    out = pl.pallas_call(
        kernel,
        out_shape=jax.ShapeDtypeStruct((BP, out_pad), jnp.float32),
        grid=(1,),
        in_specs=[pl.BlockSpec(a.shape, lambda i: (0, 0)) for a in args],
        out_specs=pl.BlockSpec((BP, out_pad), lambda i: (0, 0)),
        # Single grid step: all activations stay resident in VMEM/vregs.
        # TODO(synk): for large batches on v7x, add a "parallel" batch-tile grid
        # axis so the second TensorCore is used.
        compiler_params=pltpu.CompilerParams(
            dimension_semantics=("arbitrary",)),
    )(*args)
    return out[:B, :prepared["num_classes"]]


# -----------------------------------------------------------------------------
# Pure-JAX float32 reference (matches the PyTorch module's eval forward).
# -----------------------------------------------------------------------------
def reference_forward(x, raw):
    def conv1d(a, w, b, stride, pad):
        Bb, Cin, L = a.shape
        Cout, _, K = w.shape
        ap = jnp.pad(a, ((0, 0), (0, 0), (pad, pad)))
        Lout = (L + 2 * pad - K) // stride + 1
        out = jnp.zeros((Bb, Cout, Lout), jnp.float32)
        for k in range(K):
            sl = ap[:, :, k:k + stride * (Lout - 1) + 1:stride]
            out = out + jnp.einsum("bcl,oc->bol", sl, w[:, :, k])
        return out + b[None, :, None]

    def pool2(a):
        Bb, Cc, L = a.shape
        return a.reshape(Bb, Cc, L // 2, 2).max(axis=-1)

    a = x.astype(jnp.float32)
    for (w, b), pad in zip(raw["conv"], (3, 2, 1)):
        a = pool2(jax.nn.relu(conv1d(a, w, b, 2, pad)))
    a = a.transpose(0, 2, 1)                          # (B, T, D)
    Bb, T, _ = a.shape
    H = raw["hidden_size"]
    xs = a
    for l in range(raw["num_layers"]):
        w_ih, w_hh, b_ih, b_hh = raw["lstm"][l]
        bb = b_ih + b_hh
        h = jnp.zeros((Bb, H), jnp.float32)
        c = jnp.zeros((Bb, H), jnp.float32)
        outs = []
        for t in range(T):
            g = xs[:, t, :] @ w_ih.T + h @ w_hh.T + bb
            i = jax.nn.sigmoid(g[:, :H])
            f = jax.nn.sigmoid(g[:, H:2 * H])
            gg = jnp.tanh(g[:, 2 * H:3 * H])
            o = jax.nn.sigmoid(g[:, 3 * H:4 * H])
            c = f * c + i * gg
            h = o * jnp.tanh(c)
            outs.append(h)
        xs = jnp.stack(outs, axis=1)
    return xs[:, -1, :] @ raw["fc_w"].T + raw["fc_b"]


if __name__ == "__main__":
    input_size, hidden_size, num_layers, num_classes = 16, 32, 2, 4
    B, L = 2, 512   # L=512 -> conv/pool stack gives T=8 steps of D=16 features

    key = jax.random.PRNGKey(0)
    k_params, k_x = jax.random.split(key)
    raw = init_raw_params(k_params, input_size, hidden_size, num_layers,
                          num_classes)
    prepared = prepare_params(raw)
    x = jax.random.normal(k_x, (B, 1, L), jnp.float32)

    fwd = jax.jit(lambda xx: ecg_classifier_lstm_forward(xx, prepared))
    logits = jax.block_until_ready(fwd(x))
    assert logits.shape == (B, num_classes) and logits.dtype == jnp.float32

    # Validate the (bf16 matmul operand) kernel against the f32 reference.
    ref = jax.block_until_ready(reference_forward(x, raw))
    np.testing.assert_allclose(np.asarray(logits), np.asarray(ref),
                               rtol=1e-1, atol=1e-1)
    print("KERNEL_OK")
</pallas_src>

<mosaic_0001>
module attributes {stable_mosaic.version = 11 : i64} {
  func.func @kernel(%arg0: i32, %arg1: memref<64x128xf32, #tpu.memory_space<vmem>>, %arg2: memref<384x512xbf16, #tpu.memory_space<vmem>>, %arg3: memref<1x256xf32, #tpu.memory_space<vmem>>, %arg4: memref<512x256xbf16, #tpu.memory_space<vmem>>, %arg5: memref<1x128xf32, #tpu.memory_space<vmem>>, %arg6: memref<256x256xbf16, #tpu.memory_space<vmem>>, %arg7: memref<1x128xf32, #tpu.memory_space<vmem>>, %arg8: memref<128x128xbf16, #tpu.memory_space<vmem>>, %arg9: memref<32x128xbf16, #tpu.memory_space<vmem>>, %arg10: memref<1x128xf32, #tpu.memory_space<vmem>>, %arg11: memref<32x128xbf16, #tpu.memory_space<vmem>>, %arg12: memref<32x128xbf16, #tpu.memory_space<vmem>>, %arg13: memref<1x128xf32, #tpu.memory_space<vmem>>, %arg14: memref<32x128xbf16, #tpu.memory_space<vmem>>, %arg15: memref<1x128xf32, #tpu.memory_space<vmem>>, %arg16: memref<8x128xf32, #tpu.memory_space<vmem>>) attributes {dimension_semantics = [#tpu.dimension_semantics<arbitrary>], iteration_bounds = array<i64: 1>, scalar_prefetch = 0 : i64, scratch_operands = 0 : i64, tpu.core_type = #tpu.core_type<tc>, window_params = [{pipeline_mode = #tpu.pipeline_mode<synchronous>, transform_indices = @transform_0, window_bounds = array<i64: 64, 128>}, {pipeline_mode = #tpu.pipeline_mode<synchronous>, transform_indices = @transform_1, window_bounds = array<i64: 384, 512>}, {pipeline_mode = #tpu.pipeline_mode<synchronous>, transform_indices = @transform_2, window_bounds = array<i64: 1, 256>}, {pipeline_mode = #tpu.pipeline_mode<synchronous>, transform_indices = @transform_3, window_bounds = array<i64: 512, 256>}, {pipeline_mode = #tpu.pipeline_mode<synchronous>, transform_indices = @transform_4, window_bounds = array<i64: 1, 128>}, {pipeline_mode = #tpu.pipeline_mode<synchronous>, transform_indices = @transform_5, window_bounds = array<i64: 256, 256>}, {pipeline_mode = #tpu.pipeline_mode<synchronous>, transform_indices = @transform_6, window_bounds = array<i64: 1, 128>}, {pipeline_mode = #tpu.pipeline_mode<synchronous>, transform_indices = @transform_7, window_bounds = array<i64: 128, 128>}, {pipeline_mode = #tpu.pipeline_mode<synchronous>, transform_indices = @transform_8, window_bounds = array<i64: 32, 128>}, {pipeline_mode = #tpu.pipeline_mode<synchronous>, transform_indices = @transform_9, window_bounds = array<i64: 1, 128>}, {pipeline_mode = #tpu.pipeline_mode<synchronous>, transform_indices = @transform_10, window_bounds = array<i64: 32, 128>}, {pipeline_mode = #tpu.pipeline_mode<synchronous>, transform_indices = @transform_11, window_bounds = array<i64: 32, 128>}, {pipeline_mode = #tpu.pipeline_mode<synchronous>, transform_indices = @transform_12, window_bounds = array<i64: 1, 128>}, {pipeline_mode = #tpu.pipeline_mode<synchronous>, transform_indices = @transform_13, window_bounds = array<i64: 32, 128>}, {pipeline_mode = #tpu.pipeline_mode<synchronous>, transform_indices = @transform_14, window_bounds = array<i64: 1, 128>}, {pipeline_mode = #tpu.pipeline_mode<synchronous>, transform_indices = @transform_15, window_bounds = array<i64: 8, 128>}]} {
    %c0 = arith.constant 0 : index
    %c0_0 = arith.constant 0 : index
    %0 = vector.load %arg1[%c0, %c0_0] : memref<64x128xf32, #tpu.memory_space<vmem>>, vector<64x128xf32>
    %cst = arith.constant 0.000000e+00 : f32
    %1 = vector.broadcast %cst : f32 to vector<8x128xf32>
    %2 = vector.extract_strided_slice %0 {offsets = [0, 0], sizes = [56, 128], strides = [1, 1]} : vector<64x128xf32> to vector<56x128xf32>
    %3 = tpu.concatenate %1, %2 in 0 : vector<8x128xf32>, vector<56x128xf32> -> vector<64x128xf32>
    %4 = vector.extract_strided_slice %0 {offsets = [8, 0], sizes = [56, 128], strides = [1, 1]} : vector<64x128xf32> to vector<56x128xf32>
    %5 = tpu.concatenate %4, %1 in 0 : vector<56x128xf32>, vector<8x128xf32> -> vector<64x128xf32>
    %6 = tpu.concatenate %0, %3, %5 in 1 : vector<64x128xf32>, vector<64x128xf32>, vector<64x128xf32> -> vector<64x384xf32>
    %7 = arith.truncf %6 : vector<64x384xf32> to vector<64x384xbf16>
    %c0_1 = arith.constant 0 : index
    %c0_2 = arith.constant 0 : index
    %8 = vector.load %arg2[%c0_1, %c0_2] : memref<384x512xbf16, #tpu.memory_space<vmem>>, vector<384x512xbf16>
    %cst_3 = arith.constant dense<0.000000e+00> : vector<64x512xf32>
    %9 = tpu.matmul %7, %8, %cst_3 {dimension_numbers = #tpu.dot_dimension_numbers<[1], [0], [0], [1], [0, 0, 1, 1], [], []>} : vector<64x384xbf16>, vector<384x512xbf16>, vector<64x512xf32> -> vector<64x512xf32>
    %10 = vector.extract_strided_slice %9 {offsets = [0, 0], sizes = [64, 256], strides = [1, 1]} : vector<64x512xf32> to vector<64x256xf32>
    %11 = vector.extract_strided_slice %9 {offsets = [0, 256], sizes = [64, 256], strides = [1, 1]} : vector<64x512xf32> to vector<64x256xf32>
    %12 = arith.maximumf %10, %11 : vector<64x256xf32>
    %c0_4 = arith.constant 0 : index
    %c0_5 = arith.constant 0 : index
    %13 = vector.load %arg3[%c0_4, %c0_5] : memref<1x256xf32, #tpu.memory_space<vmem>>, vector<1x256xf32>
    %14 = vector.broadcast %13 : vector<1x256xf32> to vector<64x256xf32>
    %15 = arith.addf %12, %14 : vector<64x256xf32>
    %cst_6 = arith.constant 0.000000e+00 : f32
    %16 = vector.broadcast %cst_6 : f32 to vector<64x256xf32>
    %17 = arith.maximumf %15, %16 : vector<64x256xf32>
    %cst_7 = arith.constant 0.000000e+00 : f32
    %18 = vector.broadcast %cst_7 : f32 to vector<8x128xf32>
    %19 = vector.extract_strided_slice %17 {offsets = [0, 128], sizes = [56, 128], strides = [1, 1]} : vector<64x256xf32> to vector<56x128xf32>
    %20 = tpu.concatenate %18, %19 in 0 : vector<8x128xf32>, vector<56x128xf32> -> vector<64x128xf32>
    %21 = vector.extract_strided_slice %17 {offsets = [8, 0], sizes = [56, 128], strides = [1, 1]} : vector<64x256xf32> to vector<56x128xf32>
    %22 = tpu.concatenate %21, %18 in 0 : vector<56x128xf32>, vector<8x128xf32> -> vector<64x128xf32>
    %23 = tpu.concatenate %17, %20, %22 in 1 : vector<64x256xf32>, vector<64x128xf32>, vector<64x128xf32> -> vector<64x512xf32>
    %24 = arith.truncf %23 : vector<64x512xf32> to vector<64x512xbf16>
    %c0_8 = arith.constant 0 : index
    %c0_9 = arith.constant 0 : index
    %25 = vector.load %arg4[%c0_8, %c0_9] : memref<512x256xbf16, #tpu.memory_space<vmem>>, vector<512x256xbf16>
    %cst_10 = arith.constant dense<0.000000e+00> : vector<64x256xf32>
    %26 = tpu.matmul %24, %25, %cst_10 {dimension_numbers = #tpu.dot_dimension_numbers<[1], [0], [0], [1], [0, 0, 1, 1], [], []>} : vector<64x512xbf16>, vector<512x256xbf16>, vector<64x256xf32> -> vector<64x256xf32>
    %27 = vector.extract_strided_slice %26 {offsets = [0, 0], sizes = [64, 128], strides = [1, 1]} : vector<64x256xf32> to vector<64x128xf32>
    %28 = vector.extract_strided_slice %26 {offsets = [0, 128], sizes = [64, 128], strides = [1, 1]} : vector<64x256xf32> to vector<64x128xf32>
    %29 = arith.maximumf %27, %28 : vector<64x128xf32>
    %c0_11 = arith.constant 0 : index
    %c0_12 = arith.constant 0 : index
    %30 = vector.load %arg5[%c0_11, %c0_12] : memref<1x128xf32, #tpu.memory_space<vmem>>, vector<1x128xf32>
    %31 = vector.broadcast %30 : vector<1x128xf32> to vector<64x128xf32>
    %32 = arith.addf %29, %31 : vector<64x128xf32>
    %cst_13 = arith.constant 0.000000e+00 : f32
    %33 = vector.broadcast %cst_13 : f32 to vector<64x128xf32>
    %34 = arith.maximumf %32, %33 : vector<64x128xf32>
    %cst_14 = arith.constant 0.000000e+00 : f32
    %35 = vector.broadcast %cst_14 : f32 to vector<8x128xf32>
    %36 = vector.extract_strided_slice %34 {offsets = [0, 0], sizes = [56, 128], strides = [1, 1]} : vector<64x128xf32> to vector<56x128xf32>
    %37 = tpu.concatenate %35, %36 in 0 : vector<8x128xf32>, vector<56x128xf32> -> vector<64x128xf32>
    %38 = tpu.concatenate %34, %37 in 1 : vector<64x128xf32>, vector<64x128xf32> -> vector<64x256xf32>
    %39 = arith.truncf %38 : vector<64x256xf32> to vector<64x256xbf16>
    %c0_15 = arith.constant 0 : index
    %c0_16 = arith.constant 0 : index
    %40 = vector.load %arg6[%c0_15, %c0_16] : memref<256x256xbf16, #tpu.memory_space<vmem>>, vector<256x256xbf16>
    %cst_17 = arith.constant dense<0.000000e+00> : vector<64x256xf32>
    %41 = tpu.matmul %39, %40, %cst_17 {dimension_numbers = #tpu.dot_dimension_numbers<[1], [0], [0], [1], [0, 0, 1, 1], [], []>} : vector<64x256xbf16>, vector<256x256xbf16>, vector<64x256xf32> -> vector<64x256xf32>
    %42 = vector.extract_strided_slice %41 {offsets = [0, 0], sizes = [64, 128], strides = [1, 1]} : vector<64x256xf32> to vector<64x128xf32>
    %43 = vector.extract_strided_slice %41 {offsets = [0, 128], sizes = [64, 128], strides = [1, 1]} : vector<64x256xf32> to vector<64x128xf32>
    %44 = arith.maximumf %42, %43 : vector<64x128xf32>
    %c0_18 = arith.constant 0 : index
    %c0_19 = arith.constant 0 : index
    %45 = vector.load %arg7[%c0_18, %c0_19] : memref<1x128xf32, #tpu.memory_space<vmem>>, vector<1x128xf32>
    %46 = vector.broadcast %45 : vector<1x128xf32> to vector<64x128xf32>
    %47 = arith.addf %44, %46 : vector<64x128xf32>
    %cst_20 = arith.constant 0.000000e+00 : f32
    %48 = vector.broadcast %cst_20 : f32 to vector<64x128xf32>
    %49 = arith.maximumf %47, %48 : vector<64x128xf32>
    %c0_21 = arith.constant 0 : index
    %c0_22 = arith.constant 0 : index
    %50 = vector.load %arg8[%c0_21, %c0_22] : memref<128x128xbf16, #tpu.memory_space<vmem>>, vector<128x128xbf16>
    %c0_23 = arith.constant 0 : index
    %c0_24 = arith.constant 0 : index
    %51 = vector.load %arg9[%c0_23, %c0_24] : memref<32x128xbf16, #tpu.memory_space<vmem>>, vector<32x128xbf16>
    %c0_25 = arith.constant 0 : index
    %c0_26 = arith.constant 0 : index
    %52 = vector.load %arg10[%c0_25, %c0_26] : memref<1x128xf32, #tpu.memory_space<vmem>>, vector<1x128xf32>
    %53 = arith.truncf %49 : vector<64x128xf32> to vector<64x128xbf16>
    %cst_27 = arith.constant dense<0.000000e+00> : vector<64x128xf32>
    %54 = tpu.matmul %53, %50, %cst_27 {dimension_numbers = #tpu.dot_dimension_numbers<[1], [0], [0], [1], [0, 0, 1, 1], [], []>} : vector<64x128xbf16>, vector<128x128xbf16>, vector<64x128xf32> -> vector<64x128xf32>
    %55 = vector.broadcast %52 : vector<1x128xf32> to vector<64x128xf32>
    %56 = arith.addf %54, %55 : vector<64x128xf32>
    %cst_28 = arith.constant 0.000000e+00 : f32
    %57 = vector.broadcast %cst_28 : f32 to vector<8x32xf32>
    %cst_29 = arith.constant 0.000000e+00 : f32
    %58 = vector.broadcast %cst_29 : f32 to vector<8x32xf32>
    %59 = vector.extract_strided_slice %56 {offsets = [0, 0], sizes = [8, 128], strides = [1, 1]} : vector<64x128xf32> to vector<8x128xf32>
    %60 = arith.truncf %57 : vector<8x32xf32> to vector<8x32xbf16>
    %cst_30 = arith.constant dense<0.000000e+00> : vector<8x128xf32>
    %61 = tpu.matmul %60, %51, %cst_30 {dimension_numbers = #tpu.dot_dimension_numbers<[1], [0], [0], [1], [0, 0, 1, 1], [], []>} : vector<8x32xbf16>, vector<32x128xbf16>, vector<8x128xf32> -> vector<8x128xf32>
    %62 = arith.addf %59, %61 : vector<8x128xf32>
    %63 = arith.negf %62 : vector<8x128xf32>
    %64 = math.exp %63 : vector<8x128xf32>
    %cst_31 = arith.constant 1.000000e+00 : f32
    %65 = vector.broadcast %cst_31 : f32 to vector<8x128xf32>
    %66 = arith.addf %65, %64 : vector<8x128xf32>
    %67 = arith.divf %65, %66 : vector<8x128xf32>
    %68 = math.tanh %62 : vector<8x128xf32>
    %69 = vector.extract_strided_slice %67 {offsets = [0, 32], sizes = [8, 32], strides = [1, 1]} : vector<8x128xf32> to vector<8x32xf32>
    %70 = arith.mulf %69, %58 : vector<8x32xf32>
    %71 = vector.extract_strided_slice %67 {offsets = [0, 0], sizes = [8, 32], strides = [1, 1]} : vector<8x128xf32> to vector<8x32xf32>
    %72 = vector.extract_strided_slice %68 {offsets = [0, 64], sizes = [8, 32], strides = [1, 1]} : vector<8x128xf32> to vector<8x32xf32>
    %73 = arith.mulf %71, %72 : vector<8x32xf32>
    %74 = arith.addf %70, %73 : vector<8x32xf32>
    %75 = vector.extract_strided_slice %67 {offsets = [0, 96], sizes = [8, 32], strides = [1, 1]} : vector<8x128xf32> to vector<8x32xf32>
    %76 = math.tanh %74 : vector<8x32xf32>
    %77 = arith.mulf %75, %76 : vector<8x32xf32>
    %78 = vector.extract_strided_slice %56 {offsets = [8, 0], sizes = [8, 128], strides = [1, 1]} : vector<64x128xf32> to vector<8x128xf32>
    %79 = arith.truncf %77 : vector<8x32xf32> to vector<8x32xbf16>
    %cst_32 = arith.constant dense<0.000000e+00> : vector<8x128xf32>
    %80 = tpu.matmul %79, %51, %cst_32 {dimension_numbers = #tpu.dot_dimension_numbers<[1], [0], [0], [1], [0, 0, 1, 1], [], []>} : vector<8x32xbf16>, vector<32x128xbf16>, vector<8x128xf32> -> vector<8x128xf32>
    %81 = arith.addf %78, %80 : vector<8x128xf32>
    %82 = arith.negf %81 : vector<8x128xf32>
    %83 = math.exp %82 : vector<8x128xf32>
    %cst_33 = arith.constant 1.000000e+00 : f32
    %84 = vector.broadcast %cst_33 : f32 to vector<8x128xf32>
    %85 = arith.addf %84, %83 : vector<8x128xf32>
    %86 = arith.divf %84, %85 : vector<8x128xf32>
    %87 = math.tanh %81 : vector<8x128xf32>
    %88 = vector.extract_strided_slice %86 {offsets = [0, 32], sizes = [8, 32], strides = [1, 1]} : vector<8x128xf32> to vector<8x32xf32>
    %89 = arith.mulf %88, %74 : vector<8x32xf32>
    %90 = vector.extract_strided_slice %86 {offsets = [0, 0], sizes = [8, 32], strides = [1, 1]} : vector<8x128xf32> to vector<8x32xf32>
    %91 = vector.extract_strided_slice %87 {offsets = [0, 64], sizes = [8, 32], strides = [1, 1]} : vector<8x128xf32> to vector<8x32xf32>
    %92 = arith.mulf %90, %91 : vector<8x32xf32>
    %93 = arith.addf %89, %92 : vector<8x32xf32>
    %94 = vector.extract_strided_slice %86 {offsets = [0, 96], sizes = [8, 32], strides = [1, 1]} : vector<8x128xf32> to vector<8x32xf32>
    %95 = math.tanh %93 : vector<8x32xf32>
    %96 = arith.mulf %94, %95 : vector<8x32xf32>
    %97 = vector.extract_strided_slice %56 {offsets = [16, 0], sizes = [8, 128], strides = [1, 1]} : vector<64x128xf32> to vector<8x128xf32>
    %98 = arith.truncf %96 : vector<8x32xf32> to vector<8x32xbf16>
    %cst_34 = arith.constant dense<0.000000e+00> : vector<8x128xf32>
    %99 = tpu.matmul %98, %51, %cst_34 {dimension_numbers = #tpu.dot_dimension_numbers<[1], [0], [0], [1], [0, 0, 1, 1], [], []>} : vector<8x32xbf16>, vector<32x128xbf16>, vector<8x128xf32> -> vector<8x128xf32>
    %100 = arith.addf %97, %99 : vector<8x128xf32>
    %101 = arith.negf %100 : vector<8x128xf32>
    %102 = math.exp %101 : vector<8x128xf32>
    %cst_35 = arith.constant 1.000000e+00 : f32
    %103 = vector.broadcast %cst_35 : f32 to vector<8x128xf32>
    %104 = arith.addf %103, %102 : vector<8x128xf32>
    %105 = arith.divf %103, %104 : vector<8x128xf32>
    %106 = math.tanh %100 : vector<8x128xf32>
    %107 = vector.extract_strided_slice %105 {offsets = [0, 32], sizes = [8, 32], strides = [1, 1]} : vector<8x128xf32> to vector<8x32xf32>
    %108 = arith.mulf %107, %93 : vector<8x32xf32>
    %109 = vector.extract_strided_slice %105 {offsets = [0, 0], sizes = [8, 32], strides = [1, 1]} : vector<8x128xf32> to vector<8x32xf32>
    %110 = vector.extract_strided_slice %106 {offsets = [0, 64], sizes = [8, 32], strides = [1, 1]} : vector<8x128xf32> to vector<8x32xf32>
    %111 = arith.mulf %109, %110 : vector<8x32xf32>
    %112 = arith.addf %108, %111 : vector<8x32xf32>
    %113 = vector.extract_strided_slice %105 {offsets = [0, 96], sizes = [8, 32], strides = [1, 1]} : vector<8x128xf32> to vector<8x32xf32>
    %114 = math.tanh %112 : vector<8x32xf32>
    %115 = arith.mulf %113, %114 : vector<8x32xf32>
    %116 = vector.extract_strided_slice %56 {offsets = [24, 0], sizes = [8, 128], strides = [1, 1]} : vector<64x128xf32> to vector<8x128xf32>
    %117 = arith.truncf %115 : vector<8x32xf32> to vector<8x32xbf16>
    %cst_36 = arith.constant dense<0.000000e+00> : vector<8x128xf32>
    %118 = tpu.matmul %117, %51, %cst_36 {dimension_numbers = #tpu.dot_dimension_numbers<[1], [0], [0], [1], [0, 0, 1, 1], [], []>} : vector<8x32xbf16>, vector<32x128xbf16>, vector<8x128xf32> -> vector<8x128xf32>
    %119 = arith.addf %116, %118 : vector<8x128xf32>
    %120 = arith.negf %119 : vector<8x128xf32>
    %121 = math.exp %120 : vector<8x128xf32>
    %cst_37 = arith.constant 1.000000e+00 : f32
    %122 = vector.broadcast %cst_37 : f32 to vector<8x128xf32>
    %123 = arith.addf %122, %121 : vector<8x128xf32>
    %124 = arith.divf %122, %123 : vector<8x128xf32>
    %125 = math.tanh %119 : vector<8x128xf32>
    %126 = vector.extract_strided_slice %124 {offsets = [0, 32], sizes = [8, 32], strides = [1, 1]} : vector<8x128xf32> to vector<8x32xf32>
    %127 = arith.mulf %126, %112 : vector<8x32xf32>
    %128 = vector.extract_strided_slice %124 {offsets = [0, 0], sizes = [8, 32], strides = [1, 1]} : vector<8x128xf32> to vector<8x32xf32>
    %129 = vector.extract_strided_slice %125 {offsets = [0, 64], sizes = [8, 32], strides = [1, 1]} : vector<8x128xf32> to vector<8x32xf32>
    %130 = arith.mulf %128, %129 : vector<8x32xf32>
    %131 = arith.addf %127, %130 : vector<8x32xf32>
    %132 = vector.extract_strided_slice %124 {offsets = [0, 96], sizes = [8, 32], strides = [1, 1]} : vector<8x128xf32> to vector<8x32xf32>
    %133 = math.tanh %131 : vector<8x32xf32>
    %134 = arith.mulf %132, %133 : vector<8x32xf32>
    %135 = vector.extract_strided_slice %56 {offsets = [32, 0], sizes = [8, 128], strides = [1, 1]} : vector<64x128xf32> to vector<8x128xf32>
    %136 = arith.truncf %134 : vector<8x32xf32> to vector<8x32xbf16>
    %cst_38 = arith.constant dense<0.000000e+00> : vector<8x128xf32>
    %137 = tpu.matmul %136, %51, %cst_38 {dimension_numbers = #tpu.dot_dimension_numbers<[1], [0], [0], [1], [0, 0, 1, 1], [], []>} : vector<8x32xbf16>, vector<32x128xbf16>, vector<8x128xf32> -> vector<8x128xf32>
    %138 = arith.addf %135, %137 : vector<8x128xf32>
    %139 = arith.negf %138 : vector<8x128xf32>
    %140 = math.exp %139 : vector<8x128xf32>
    %cst_39 = arith.constant 1.000000e+00 : f32
    %141 = vector.broadcast %cst_39 : f32 to vector<8x128xf32>
    %142 = arith.addf %141, %140 : vector<8x128xf32>
    %143 = arith.divf %141, %142 : vector<8x128xf32>
    %144 = math.tanh %138 : vector<8x128xf32>
    %145 = vector.extract_strided_slice %143 {offsets = [0, 32], sizes = [8, 32], strides = [1, 1]} : vector<8x128xf32> to vector<8x32xf32>
    %146 = arith.mulf %145, %131 : vector<8x32xf32>
    %147 = vector.extract_strided_slice %143 {offsets = [0, 0], sizes = [8, 32], strides = [1, 1]} : vector<8x128xf32> to vector<8x32xf32>
    %148 = vector.extract_strided_slice %144 {offsets = [0, 64], sizes = [8, 32], strides = [1, 1]} : vector<8x128xf32> to vector<8x32xf32>
    %149 = arith.mulf %147, %148 : vector<8x32xf32>
    %150 = arith.addf %146, %149 : vector<8x32xf32>
    %151 = vector.extract_strided_slice %143 {offsets = [0, 96], sizes = [8, 32], strides = [1, 1]} : vector<8x128xf32> to vector<8x32xf32>
    %152 = math.tanh %150 : vector<8x32xf32>
    %153 = arith.mulf %151, %152 : vector<8x32xf32>
    %154 = vector.extract_strided_slice %56 {offsets = [40, 0], sizes = [8, 128], strides = [1, 1]} : vector<64x128xf32> to vector<8x128xf32>
    %155 = arith.truncf %153 : vector<8x32xf32> to vector<8x32xbf16>
    %cst_40 = arith.constant dense<0.000000e+00> : vector<8x128xf32>
    %156 = tpu.matmul %155, %51, %cst_40 {dimension_numbers = #tpu.dot_dimension_numbers<[1], [0], [0], [1], [0, 0, 1, 1], [], []>} : vector<8x32xbf16>, vector<32x128xbf16>, vector<8x128xf32> -> vector<8x128xf32>
    %157 = arith.addf %154, %156 : vector<8x128xf32>
    %158 = arith.negf %157 : vector<8x128xf32>
    %159 = math.exp %158 : vector<8x128xf32>
    %cst_41 = arith.constant 1.000000e+00 : f32
    %160 = vector.broadcast %cst_41 : f32 to vector<8x128xf32>
    %161 = arith.addf %160, %159 : vector<8x128xf32>
    %162 = arith.divf %160, %161 : vector<8x128xf32>
    %163 = math.tanh %157 : vector<8x128xf32>
    %164 = vector.extract_strided_slice %162 {offsets = [0, 32], sizes = [8, 32], strides = [1, 1]} : vector<8x128xf32> to vector<8x32xf32>
    %165 = arith.mulf %164, %150 : vector<8x32xf32>
    %166 = vector.extract_strided_slice %162 {offsets = [0, 0], sizes = [8, 32], strides = [1, 1]} : vector<8x128xf32> to vector<8x32xf32>
    %167 = vector.extract_strided_slice %163 {offsets = [0, 64], sizes = [8, 32], strides = [1, 1]} : vector<8x128xf32> to vector<8x32xf32>
    %168 = arith.mulf %166, %167 : vector<8x32xf32>
    %169 = arith.addf %165, %168 : vector<8x32xf32>
    %170 = vector.extract_strided_slice %162 {offsets = [0, 96], sizes = [8, 32], strides = [1, 1]} : vector<8x128xf32> to vector<8x32xf32>
    %171 = math.tanh %169 : vector<8x32xf32>
    %172 = arith.mulf %170, %171 : vector<8x32xf32>
    %173 = vector.extract_strided_slice %56 {offsets = [48, 0], sizes = [8, 128], strides = [1, 1]} : vector<64x128xf32> to vector<8x128xf32>
    %174 = arith.truncf %172 : vector<8x32xf32> to vector<8x32xbf16>
    %cst_42 = arith.constant dense<0.000000e+00> : vector<8x128xf32>
    %175 = tpu.matmul %174, %51, %cst_42 {dimension_numbers = #tpu.dot_dimension_numbers<[1], [0], [0], [1], [0, 0, 1, 1], [], []>} : vector<8x32xbf16>, vector<32x128xbf16>, vector<8x128xf32> -> vector<8x128xf32>
    %176 = arith.addf %173, %175 : vector<8x128xf32>
    %177 = arith.negf %176 : vector<8x128xf32>
    %178 = math.exp %177 : vector<8x128xf32>
    %cst_43 = arith.constant 1.000000e+00 : f32
    %179 = vector.broadcast %cst_43 : f32 to vector<8x128xf32>
    %180 = arith.addf %179, %178 : vector<8x128xf32>
    %181 = arith.divf %179, %180 : vector<8x128xf32>
    %182 = math.tanh %176 : vector<8x128xf32>
    %183 = vector.extract_strided_slice %181 {offsets = [0, 32], sizes = [8, 32], strides = [1, 1]} : vector<8x128xf32> to vector<8x32xf32>
    %184 = arith.mulf %183, %169 : vector<8x32xf32>
    %185 = vector.extract_strided_slice %181 {offsets = [0, 0], sizes = [8, 32], strides = [1, 1]} : vector<8x128xf32> to vector<8x32xf32>
    %186 = vector.extract_strided_slice %182 {offsets = [0, 64], sizes = [8, 32], strides = [1, 1]} : vector<8x128xf32> to vector<8x32xf32>
    %187 = arith.mulf %185, %186 : vector<8x32xf32>
    %188 = arith.addf %184, %187 : vector<8x32xf32>
    %189 = vector.extract_strided_slice %181 {offsets = [0, 96], sizes = [8, 32], strides = [1, 1]} : vector<8x128xf32> to vector<8x32xf32>
    %190 = math.tanh %188 : vector<8x32xf32>
    %191 = arith.mulf %189, %190 : vector<8x32xf32>
    %192 = vector.extract_strided_slice %56 {offsets = [56, 0], sizes = [8, 128], strides = [1, 1]} : vector<64x128xf32> to vector<8x128xf32>
    %193 = arith.truncf %191 : vector<8x32xf32> to vector<8x32xbf16>
    %cst_44 = arith.constant dense<0.000000e+00> : vector<8x128xf32>
    %194 = tpu.matmul %193, %51, %cst_44 {dimension_numbers = #tpu.dot_dimension_numbers<[1], [0], [0], [1], [0, 0, 1, 1], [], []>} : vector<8x32xbf16>, vector<32x128xbf16>, vector<8x128xf32> -> vector<8x128xf32>
    %195 = arith.addf %192, %194 : vector<8x128xf32>
    %196 = arith.negf %195 : vector<8x128xf32>
    %197 = math.exp %196 : vector<8x128xf32>
    %cst_45 = arith.constant 1.000000e+00 : f32
    %198 = vector.broadcast %cst_45 : f32 to vector<8x128xf32>
    %199 = arith.addf %198, %197 : vector<8x128xf32>
    %200 = arith.divf %198, %199 : vector<8x128xf32>
    %201 = math.tanh %195 : vector<8x128xf32>
    %202 = vector.extract_strided_slice %200 {offsets = [0, 32], sizes = [8, 32], strides = [1, 1]} : vector<8x128xf32> to vector<8x32xf32>
    %203 = arith.mulf %202, %188 : vector<8x32xf32>
    %204 = vector.extract_strided_slice %200 {offsets = [0, 0], sizes = [8, 32], strides = [1, 1]} : vector<8x128xf32> to vector<8x32xf32>
    %205 = vector.extract_strided_slice %201 {offsets = [0, 64], sizes = [8, 32], strides = [1, 1]} : vector<8x128xf32> to vector<8x32xf32>
    %206 = arith.mulf %204, %205 : vector<8x32xf32>
    %207 = arith.addf %203, %206 : vector<8x32xf32>
    %208 = vector.extract_strided_slice %200 {offsets = [0, 96], sizes = [8, 32], strides = [1, 1]} : vector<8x128xf32> to vector<8x32xf32>
    %209 = math.tanh %207 : vector<8x32xf32>
    %210 = arith.mulf %208, %209 : vector<8x32xf32>
    %211 = tpu.concatenate %77, %96, %115, %134, %153, %172, %191, %210 in 0 : vector<8x32xf32>, vector<8x32xf32>, vector<8x32xf32>, vector<8x32xf32>, vector<8x32xf32>, vector<8x32xf32>, vector<8x32xf32>, vector<8x32xf32> -> vector<64x32xf32>
    %c0_46 = arith.constant 0 : index
    %c0_47 = arith.constant 0 : index
    %212 = vector.load %arg11[%c0_46, %c0_47] : memref<32x128xbf16, #tpu.memory_space<vmem>>, vector<32x128xbf16>
    %c0_48 = arith.constant 0 : index
    %c0_49 = arith.constant 0 : index
    %213 = vector.load %arg12[%c0_48, %c0_49] : memref<32x128xbf16, #tpu.memory_space<vmem>>, vector<32x128xbf16>
    %c0_50 = arith.constant 0 : index
    %c0_51 = arith.constant 0 : index
    %214 = vector.load %arg13[%c0_50, %c0_51] : memref<1x128xf32, #tpu.memory_space<vmem>>, vector<1x128xf32>
    %215 = arith.truncf %211 : vector<64x32xf32> to vector<64x32xbf16>
    %cst_52 = arith.constant dense<0.000000e+00> : vector<64x128xf32>
    %216 = tpu.matmul %215, %212, %cst_52 {dimension_numbers = #tpu.dot_dimension_numbers<[1], [0], [0], [1], [0, 0, 1, 1], [], []>} : vector<64x32xbf16>, vector<32x128xbf16>, vector<64x128xf32> -> vector<64x128xf32>
    %217 = vector.broadcast %214 : vector<1x128xf32> to vector<64x128xf32>
    %218 = arith.addf %216, %217 : vector<64x128xf32>
    %cst_53 = arith.constant 0.000000e+00 : f32
    %219 = vector.broadcast %cst_53 : f32 to vector<8x32xf32>
    %cst_54 = arith.constant 0.000000e+00 : f32
    %220 = vector.broadcast %cst_54 : f32 to vector<8x32xf32>
    %221 = vector.extract_strided_slice %218 {offsets = [0, 0], sizes = [8, 128], strides = [1, 1]} : vector<64x128xf32> to vector<8x128xf32>
    %222 = arith.truncf %219 : vector<8x32xf32> to vector<8x32xbf16>
    %cst_55 = arith.constant dense<0.000000e+00> : vector<8x128xf32>
    %223 = tpu.matmul %222, %213, %cst_55 {dimension_numbers = #tpu.dot_dimension_numbers<[1], [0], [0], [1], [0, 0, 1, 1], [], []>} : vector<8x32xbf16>, vector<32x128xbf16>, vector<8x128xf32> -> vector<8x128xf32>
    %224 = arith.addf %221, %223 : vector<8x128xf32>
    %225 = arith.negf %224 : vector<8x128xf32>
    %226 = math.exp %225 : vector<8x128xf32>
    %cst_56 = arith.constant 1.000000e+00 : f32
    %227 = vector.broadcast %cst_56 : f32 to vector<8x128xf32>
    %228 = arith.addf %227, %226 : vector<8x128xf32>
    %229 = arith.divf %227, %228 : vector<8x128xf32>
    %230 = math.tanh %224 : vector<8x128xf32>
    %231 = vector.extract_strided_slice %229 {offsets = [0, 32], sizes = [8, 32], strides = [1, 1]} : vector<8x128xf32> to vector<8x32xf32>
    %232 = arith.mulf %231, %220 : vector<8x32xf32>
    %233 = vector.extract_strided_slice %229 {offsets = [0, 0], sizes = [8, 32], strides = [1, 1]} : vector<8x128xf32> to vector<8x32xf32>
    %234 = vector.extract_strided_slice %230 {offsets = [0, 64], sizes = [8, 32], strides = [1, 1]} : vector<8x128xf32> to vector<8x32xf32>
    %235 = arith.mulf %233, %234 : vector<8x32xf32>
    %236 = arith.addf %232, %235 : vector<8x32xf32>
    %237 = vector.extract_strided_slice %229 {offsets = [0, 96], sizes = [8, 32], strides = [1, 1]} : vector<8x128xf32> to vector<8x32xf32>
    %238 = math.tanh %236 : vector<8x32xf32>
    %239 = arith.mulf %237, %238 : vector<8x32xf32>
    %240 = vector.extract_strided_slice %218 {offsets = [8, 0], sizes = [8, 128], strides = [1, 1]} : vector<64x128xf32> to vector<8x128xf32>
    %241 = arith.truncf %239 : vector<8x32xf32> to vector<8x32xbf16>
    %cst_57 = arith.constant dense<0.000000e+00> : vector<8x128xf32>
    %242 = tpu.matmul %241, %213, %cst_57 {dimension_numbers = #tpu.dot_dimension_numbers<[1], [0], [0], [1], [0, 0, 1, 1], [], []>} : vector<8x32xbf16>, vector<32x128xbf16>, vector<8x128xf32> -> vector<8x128xf32>
    %243 = arith.addf %240, %242 : vector<8x128xf32>
    %244 = arith.negf %243 : vector<8x128xf32>
    %245 = math.exp %244 : vector<8x128xf32>
    %cst_58 = arith.constant 1.000000e+00 : f32
    %246 = vector.broadcast %cst_58 : f32 to vector<8x128xf32>
    %247 = arith.addf %246, %245 : vector<8x128xf32>
    %248 = arith.divf %246, %247 : vector<8x128xf32>
    %249 = math.tanh %243 : vector<8x128xf32>
    %250 = vector.extract_strided_slice %248 {offsets = [0, 32], sizes = [8, 32], strides = [1, 1]} : vector<8x128xf32> to vector<8x32xf32>
    %251 = arith.mulf %250, %236 : vector<8x32xf32>
    %252 = vector.extract_strided_slice %248 {offsets = [0, 0], sizes = [8, 32], strides = [1, 1]} : vector<8x128xf32> to vector<8x32xf32>
    %253 = vector.extract_strided_slice %249 {offsets = [0, 64], sizes = [8, 32], strides = [1, 1]} : vector<8x128xf32> to vector<8x32xf32>
    %254 = arith.mulf %252, %253 : vector<8x32xf32>
    %255 = arith.addf %251, %254 : vector<8x32xf32>
    %256 = vector.extract_strided_slice %248 {offsets = [0, 96], sizes = [8, 32], strides = [1, 1]} : vector<8x128xf32> to vector<8x32xf32>
    %257 = math.tanh %255 : vector<8x32xf32>
    %258 = arith.mulf %256, %257 : vector<8x32xf32>
    %259 = vector.extract_strided_slice %218 {offsets = [16, 0], sizes = [8, 128], strides = [1, 1]} : vector<64x128xf32> to vector<8x128xf32>
    %260 = arith.truncf %258 : vector<8x32xf32> to vector<8x32xbf16>
    %cst_59 = arith.constant dense<0.000000e+00> : vector<8x128xf32>
    %261 = tpu.matmul %260, %213, %cst_59 {dimension_numbers = #tpu.dot_dimension_numbers<[1], [0], [0], [1], [0, 0, 1, 1], [], []>} : vector<8x32xbf16>, vector<32x128xbf16>, vector<8x128xf32> -> vector<8x128xf32>
    %262 = arith.addf %259, %261 : vector<8x128xf32>
    %263 = arith.negf %262 : vector<8x128xf32>
    %264 = math.exp %263 : vector<8x128xf32>
    %cst_60 = arith.constant 1.000000e+00 : f32
    %265 = vector.broadcast %cst_60 : f32 to vector<8x128xf32>
    %266 = arith.addf %265, %264 : vector<8x128xf32>
    %267 = arith.divf %265, %266 : vector<8x128xf32>
    %268 = math.tanh %262 : vector<8x128xf32>
    %269 = vector.extract_strided_slice %267 {offsets = [0, 32], sizes = [8, 32], strides = [1, 1]} : vector<8x128xf32> to vector<8x32xf32>
    %270 = arith.mulf %269, %255 : vector<8x32xf32>
    %271 = vector.extract_strided_slice %267 {offsets = [0, 0], sizes = [8, 32], strides = [1, 1]} : vector<8x128xf32> to vector<8x32xf32>
    %272 = vector.extract_strided_slice %268 {offsets = [0, 64], sizes = [8, 32], strides = [1, 1]} : vector<8x128xf32> to vector<8x32xf32>
    %273 = arith.mulf %271, %272 : vector<8x32xf32>
    %274 = arith.addf %270, %273 : vector<8x32xf32>
    %275 = vector.extract_strided_slice %267 {offsets = [0, 96], sizes = [8, 32], strides = [1, 1]} : vector<8x128xf32> to vector<8x32xf32>
    %276 = math.tanh %274 : vector<8x32xf32>
    %277 = arith.mulf %275, %276 : vector<8x32xf32>
    %278 = vector.extract_strided_slice %218 {offsets = [24, 0], sizes = [8, 128], strides = [1, 1]} : vector<64x128xf32> to vector<8x128xf32>
    %279 = arith.truncf %277 : vector<8x32xf32> to vector<8x32xbf16>
    %cst_61 = arith.constant dense<0.000000e+00> : vector<8x128xf32>
    %280 = tpu.matmul %279, %213, %cst_61 {dimension_numbers = #tpu.dot_dimension_numbers<[1], [0], [0], [1], [0, 0, 1, 1], [], []>} : vector<8x32xbf16>, vector<32x128xbf16>, vector<8x128xf32> -> vector<8x128xf32>
    %281 = arith.addf %278, %280 : vector<8x128xf32>
    %282 = arith.negf %281 : vector<8x128xf32>
    %283 = math.exp %282 : vector<8x128xf32>
    %cst_62 = arith.constant 1.000000e+00 : f32
    %284 = vector.broadcast %cst_62 : f32 to vector<8x128xf32>
    %285 = arith.addf %284, %283 : vector<8x128xf32>
    %286 = arith.divf %284, %285 : vector<8x128xf32>
    %287 = math.tanh %281 : vector<8x128xf32>
    %288 = vector.extract_strided_slice %286 {offsets = [0, 32], sizes = [8, 32], strides = [1, 1]} : vector<8x128xf32> to vector<8x32xf32>
    %289 = arith.mulf %288, %274 : vector<8x32xf32>
    %290 = vector.extract_strided_slice %286 {offsets = [0, 0], sizes = [8, 32], strides = [1, 1]} : vector<8x128xf32> to vector<8x32xf32>
    %291 = vector.extract_strided_slice %287 {offsets = [0, 64], sizes = [8, 32], strides = [1, 1]} : vector<8x128xf32> to vector<8x32xf32>
    %292 = arith.mulf %290, %291 : vector<8x32xf32>
    %293 = arith.addf %289, %292 : vector<8x32xf32>
    %294 = vector.extract_strided_slice %286 {offsets = [0, 96], sizes = [8, 32], strides = [1, 1]} : vector<8x128xf32> to vector<8x32xf32>
    %295 = math.tanh %293 : vector<8x32xf32>
    %296 = arith.mulf %294, %295 : vector<8x32xf32>
    %297 = vector.extract_strided_slice %218 {offsets = [32, 0], sizes = [8, 128], strides = [1, 1]} : vector<64x128xf32> to vector<8x128xf32>
    %298 = arith.truncf %296 : vector<8x32xf32> to vector<8x32xbf16>
    %cst_63 = arith.constant dense<0.000000e+00> : vector<8x128xf32>
    %299 = tpu.matmul %298, %213, %cst_63 {dimension_numbers = #tpu.dot_dimension_numbers<[1], [0], [0], [1], [0, 0, 1, 1], [], []>} : vector<8x32xbf16>, vector<32x128xbf16>, vector<8x128xf32> -> vector<8x128xf32>
    %300 = arith.addf %297, %299 : vector<8x128xf32>
    %301 = arith.negf %300 : vector<8x128xf32>
    %302 = math.exp %301 : vector<8x128xf32>
    %cst_64 = arith.constant 1.000000e+00 : f32
    %303 = vector.broadcast %cst_64 : f32 to vector<8x128xf32>
    %304 = arith.addf %303, %302 : vector<8x128xf32>
    %305 = arith.divf %303, %304 : vector<8x128xf32>
    %306 = math.tanh %300 : vector<8x128xf32>
    %307 = vector.extract_strided_slice %305 {offsets = [0, 32], sizes = [8, 32], strides = [1, 1]} : vector<8x128xf32> to vector<8x32xf32>
    %308 = arith.mulf %307, %293 : vector<8x32xf32>
    %309 = vector.extract_strided_slice %305 {offsets = [0, 0], sizes = [8, 32], strides = [1, 1]} : vector<8x128xf32> to vector<8x32xf32>
    %310 = vector.extract_strided_slice %306 {offsets = [0, 64], sizes = [8, 32], strides = [1, 1]} : vector<8x128xf32> to vector<8x32xf32>
    %311 = arith.mulf %309, %310 : vector<8x32xf32>
    %312 = arith.addf %308, %311 : vector<8x32xf32>
    %313 = vector.extract_strided_slice %305 {offsets = [0, 96], sizes = [8, 32], strides = [1, 1]} : vector<8x128xf32> to vector<8x32xf32>
    %314 = math.tanh %312 : vector<8x32xf32>
    %315 = arith.mulf %313, %314 : vector<8x32xf32>
    %316 = vector.extract_strided_slice %218 {offsets = [40, 0], sizes = [8, 128], strides = [1, 1]} : vector<64x128xf32> to vector<8x128xf32>
    %317 = arith.truncf %315 : vector<8x32xf32> to vector<8x32xbf16>
    %cst_65 = arith.constant dense<0.000000e+00> : vector<8x128xf32>
    %318 = tpu.matmul %317, %213, %cst_65 {dimension_numbers = #tpu.dot_dimension_numbers<[1], [0], [0], [1], [0, 0, 1, 1], [], []>} : vector<8x32xbf16>, vector<32x128xbf16>, vector<8x128xf32> -> vector<8x128xf32>
    %319 = arith.addf %316, %318 : vector<8x128xf32>
    %320 = arith.negf %319 : vector<8x128xf32>
    %321 = math.exp %320 : vector<8x128xf32>
    %cst_66 = arith.constant 1.000000e+00 : f32
    %322 = vector.broadcast %cst_66 : f32 to vector<8x128xf32>
    %323 = arith.addf %322, %321 : vector<8x128xf32>
    %324 = arith.divf %322, %323 : vector<8x128xf32>
    %325 = math.tanh %319 : vector<8x128xf32>
    %326 = vector.extract_strided_slice %324 {offsets = [0, 32], sizes = [8, 32], strides = [1, 1]} : vector<8x128xf32> to vector<8x32xf32>
    %327 = arith.mulf %326, %312 : vector<8x32xf32>
    %328 = vector.extract_strided_slice %324 {offsets = [0, 0], sizes = [8, 32], strides = [1, 1]} : vector<8x128xf32> to vector<8x32xf32>
    %329 = vector.extract_strided_slice %325 {offsets = [0, 64], sizes = [8, 32], strides = [1, 1]} : vector<8x128xf32> to vector<8x32xf32>
    %330 = arith.mulf %328, %329 : vector<8x32xf32>
    %331 = arith.addf %327, %330 : vector<8x32xf32>
    %332 = vector.extract_strided_slice %324 {offsets = [0, 96], sizes = [8, 32], strides = [1, 1]} : vector<8x128xf32> to vector<8x32xf32>
    %333 = math.tanh %331 : vector<8x32xf32>
    %334 = arith.mulf %332, %333 : vector<8x32xf32>
    %335 = vector.extract_strided_slice %218 {offsets = [48, 0], sizes = [8, 128], strides = [1, 1]} : vector<64x128xf32> to vector<8x128xf32>
    %336 = arith.truncf %334 : vector<8x32xf32> to vector<8x32xbf16>
    %cst_67 = arith.constant dense<0.000000e+00> : vector<8x128xf32>
    %337 = tpu.matmul %336, %213, %cst_67 {dimension_numbers = #tpu.dot_dimension_numbers<[1], [0], [0], [1], [0, 0, 1, 1], [], []>} : vector<8x32xbf16>, vector<32x128xbf16>, vector<8x128xf32> -> vector<8x128xf32>
    %338 = arith.addf %335, %337 : vector<8x128xf32>
    %339 = arith.negf %338 : vector<8x128xf32>
    %340 = math.exp %339 : vector<8x128xf32>
    %cst_68 = arith.constant 1.000000e+00 : f32
    %341 = vector.broadcast %cst_68 : f32 to vector<8x128xf32>
    %342 = arith.addf %341, %340 : vector<8x128xf32>
    %343 = arith.divf %341, %342 : vector<8x128xf32>
    %344 = math.tanh %338 : vector<8x128xf32>
    %345 = vector.extract_strided_slice %343 {offsets = [0, 32], sizes = [8, 32], strides = [1, 1]} : vector<8x128xf32> to vector<8x32xf32>
    %346 = arith.mulf %345, %331 : vector<8x32xf32>
    %347 = vector.extract_strided_slice %343 {offsets = [0, 0], sizes = [8, 32], strides = [1, 1]} : vector<8x128xf32> to vector<8x32xf32>
    %348 = vector.extract_strided_slice %344 {offsets = [0, 64], sizes = [8, 32], strides = [1, 1]} : vector<8x128xf32> to vector<8x32xf32>
    %349 = arith.mulf %347, %348 : vector<8x32xf32>
    %350 = arith.addf %346, %349 : vector<8x32xf32>
    %351 = vector.extract_strided_slice %343 {offsets = [0, 96], sizes = [8, 32], strides = [1, 1]} : vector<8x128xf32> to vector<8x32xf32>
    %352 = math.tanh %350 : vector<8x32xf32>
    %353 = arith.mulf %351, %352 : vector<8x32xf32>
    %354 = vector.extract_strided_slice %218 {offsets = [56, 0], sizes = [8, 128], strides = [1, 1]} : vector<64x128xf32> to vector<8x128xf32>
    %355 = arith.truncf %353 : vector<8x32xf32> to vector<8x32xbf16>
    %cst_69 = arith.constant dense<0.000000e+00> : vector<8x128xf32>
    %356 = tpu.matmul %355, %213, %cst_69 {dimension_numbers = #tpu.dot_dimension_numbers<[1], [0], [0], [1], [0, 0, 1, 1], [], []>} : vector<8x32xbf16>, vector<32x128xbf16>, vector<8x128xf32> -> vector<8x128xf32>
    %357 = arith.addf %354, %356 : vector<8x128xf32>
    %358 = arith.negf %357 : vector<8x128xf32>
    %359 = math.exp %358 : vector<8x128xf32>
    %cst_70 = arith.constant 1.000000e+00 : f32
    %360 = vector.broadcast %cst_70 : f32 to vector<8x128xf32>
    %361 = arith.addf %360, %359 : vector<8x128xf32>
    %362 = arith.divf %360, %361 : vector<8x128xf32>
    %363 = math.tanh %357 : vector<8x128xf32>
    %364 = vector.extract_strided_slice %362 {offsets = [0, 32], sizes = [8, 32], strides = [1, 1]} : vector<8x128xf32> to vector<8x32xf32>
    %365 = arith.mulf %364, %350 : vector<8x32xf32>
    %366 = vector.extract_strided_slice %362 {offsets = [0, 0], sizes = [8, 32], strides = [1, 1]} : vector<8x128xf32> to vector<8x32xf32>
    %367 = vector.extract_strided_slice %363 {offsets = [0, 64], sizes = [8, 32], strides = [1, 1]} : vector<8x128xf32> to vector<8x32xf32>
    %368 = arith.mulf %366, %367 : vector<8x32xf32>
    %369 = arith.addf %365, %368 : vector<8x32xf32>
    %370 = vector.extract_strided_slice %362 {offsets = [0, 96], sizes = [8, 32], strides = [1, 1]} : vector<8x128xf32> to vector<8x32xf32>
    %371 = math.tanh %369 : vector<8x32xf32>
    %372 = arith.mulf %370, %371 : vector<8x32xf32>
    %373 = arith.truncf %372 : vector<8x32xf32> to vector<8x32xbf16>
    %c0_71 = arith.constant 0 : index
    %c0_72 = arith.constant 0 : index
    %374 = vector.load %arg14[%c0_71, %c0_72] : memref<32x128xbf16, #tpu.memory_space<vmem>>, vector<32x128xbf16>
    %cst_73 = arith.constant dense<0.000000e+00> : vector<8x128xf32>
    %375 = tpu.matmul %373, %374, %cst_73 {dimension_numbers = #tpu.dot_dimension_numbers<[1], [0], [0], [1], [0, 0, 1, 1], [], []>} : vector<8x32xbf16>, vector<32x128xbf16>, vector<8x128xf32> -> vector<8x128xf32>
    %c0_74 = arith.constant 0 : index
    %c0_75 = arith.constant 0 : index
    %376 = vector.load %arg15[%c0_74, %c0_75] : memref<1x128xf32, #tpu.memory_space<vmem>>, vector<1x128xf32>
    %377 = vector.broadcast %376 : vector<1x128xf32> to vector<8x128xf32>
    %378 = arith.addf %375, %377 : vector<8x128xf32>
    %c0_76 = arith.constant 0 : index
    %c0_77 = arith.constant 0 : index
    %379 = vector.load %arg16[%c0_76, %c0_77] : memref<8x128xf32, #tpu.memory_space<vmem>>, vector<8x128xf32>
    tpu.vector_store %arg16[%c0_76, %c0_77], %378 {strides = array<i32>} : memref<8x128xf32, #tpu.memory_space<vmem>>, vector<8x128xf32>,
    return
  }
  func.func @transform_0(%arg0: i32) -> (i32, i32) {
    %c0_i32 = arith.constant 0 : i32
    %c0_i32_0 = arith.constant 0 : i32
    %c0_i32_1 = arith.constant 0 : i32
    return %c0_i32, %c0_i32_0 : i32, i32
  }
  func.func @transform_1(%arg0: i32) -> (i32, i32) {
    %c0_i32 = arith.constant 0 : i32
    %c0_i32_0 = arith.constant 0 : i32
    %c0_i32_1 = arith.constant 0 : i32
    return %c0_i32, %c0_i32_0 : i32, i32
  }
  func.func @transform_2(%arg0: i32) -> (i32, i32) {
    %c0_i32 = arith.constant 0 : i32
    %c0_i32_0 = arith.constant 0 : i32
    %c0_i32_1 = arith.constant 0 : i32
    return %c0_i32, %c0_i32_0 : i32, i32
  }
  func.func @transform_3(%arg0: i32) -> (i32, i32) {
    %c0_i32 = arith.constant 0 : i32
    %c0_i32_0 = arith.constant 0 : i32
    %c0_i32_1 = arith.constant 0 : i32
    return %c0_i32, %c0_i32_0 : i32, i32
  }
  func.func @transform_4(%arg0: i32) -> (i32, i32) {
    %c0_i32 = arith.constant 0 : i32
    %c0_i32_0 = arith.constant 0 : i32
    %c0_i32_1 = arith.constant 0 : i32
    return %c0_i32, %c0_i32_0 : i32, i32
  }
  func.func @transform_5(%arg0: i32) -> (i32, i32) {
    %c0_i32 = arith.constant 0 : i32
    %c0_i32_0 = arith.constant 0 : i32
    %c0_i32_1 = arith.constant 0 : i32
    return %c0_i32, %c0_i32_0 : i32, i32
  }
  func.func @transform_6(%arg0: i32) -> (i32, i32) {
    %c0_i32 = arith.constant 0 : i32
    %c0_i32_0 = arith.constant 0 : i32
    %c0_i32_1 = arith.constant 0 : i32
    return %c0_i32, %c0_i32_0 : i32, i32
  }
  func.func @transform_7(%arg0: i32) -> (i32, i32) {
    %c0_i32 = arith.constant 0 : i32
    %c0_i32_0 = arith.constant 0 : i32
    %c0_i32_1 = arith.constant 0 : i32
    return %c0_i32, %c0_i32_0 : i32, i32
  }
  func.func @transform_8(%arg0: i32) -> (i32, i32) {
    %c0_i32 = arith.constant 0 : i32
    %c0_i32_0 = arith.constant 0 : i32
    %c0_i32_1 = arith.constant 0 : i32
    return %c0_i32, %c0_i32_0 : i32, i32
  }
  func.func @transform_9(%arg0: i32) -> (i32, i32) {
    %c0_i32 = arith.constant 0 : i32
    %c0_i32_0 = arith.constant 0 : i32
    %c0_i32_1 = arith.constant 0 : i32
    return %c0_i32, %c0_i32_0 : i32, i32
  }
  func.func @transform_10(%arg0: i32) -> (i32, i32) {
    %c0_i32 = arith.constant 0 : i32
    %c0_i32_0 = arith.constant 0 : i32
    %c0_i32_1 = arith.constant 0 : i32
    return %c0_i32, %c0_i32_0 : i32, i32
  }
  func.func @transform_11(%arg0: i32) -> (i32, i32) {
    %c0_i32 = arith.constant 0 : i32
    %c0_i32_0 = arith.constant 0 : i32
    %c0_i32_1 = arith.constant 0 : i32
    return %c0_i32, %c0_i32_0 : i32, i32
  }
  func.func @transform_12(%arg0: i32) -> (i32, i32) {
    %c0_i32 = arith.constant 0 : i32
    %c0_i32_0 = arith.constant 0 : i32
    %c0_i32_1 = arith.constant 0 : i32
    return %c0_i32, %c0_i32_0 : i32, i32
  }
  func.func @transform_13(%arg0: i32) -> (i32, i32) {
    %c0_i32 = arith.constant 0 : i32
    %c0_i32_0 = arith.constant 0 : i32
    %c0_i32_1 = arith.constant 0 : i32
    return %c0_i32, %c0_i32_0 : i32, i32
  }
  func.func @transform_14(%arg0: i32) -> (i32, i32) {
    %c0_i32 = arith.constant 0 : i32
    %c0_i32_0 = arith.constant 0 : i32
    %c0_i32_1 = arith.constant 0 : i32
    return %c0_i32, %c0_i32_0 : i32, i32
  }
  func.func @transform_15(%arg0: i32) -> (i32, i32) {
    %c0_i32 = arith.constant 0 : i32
    %c0_i32_0 = arith.constant 0 : i32
    %c0_i32_1 = arith.constant 0 : i32
    return %c0_i32, %c0_i32_0 : i32, i32
  }
}

</mosaic_0001>

<bundles_post_ra>
// kernel: _lambda_.1
= control target key start
LH: loop header
LB: loop body
LE: loop exit
PB: predicated region body
PF: predicated region fallthrough
CT: control target
= control target key end

     0   :  { %20 = vsyncpa [#allocation3], 0  ;;  %s5076_s0 = inlined_call_operand.vmem [shape: f32[64,128], index: 0, kind: input, shape index: {}]   ;;  %s5077_s1 = inlined_call_operand.hbm [shape: bf16[384,512], index: 1, kind: input, shape index: {}]   ;;  %s5078_s2 = inlined_call_operand.vmem [shape: f32[1,256], index: 2, kind: input, shape index: {}]   ;;  %s5079_s3 = inlined_call_operand.hbm [shape: bf16[512,256], index: 3, kind: input, shape index: {}]   ;;  %s5080_s4 = inlined_call_operand.vmem [shape: f32[1,128], index: 4, kind: input, shape index: {}]   ;;  %s5081_s5 = inlined_call_operand.hbm [shape: bf16[256,256], index: 5, kind: input, shape index: {}]   ;;  %s5082_s6 = inlined_call_operand.vmem [shape: f32[1,128], index: 6, kind: input, shape index: {}]   ;;  %s5083_s7 = inlined_call_operand.vmem [shape: bf16[128,128], index: 7, kind: input, shape index: {}]   ;;  %s5084_s8 = inlined_call_operand.vmem [shape: bf16[32,128], index: 8, kind: input, shape index: {}]   ;;  %s5085_s9 = inlined_call_operand.vmem [shape: f32[1,128], index: 9, kind: input, shape index: {}]   ;;  %s5086_s10 = inlined_call_operand.vmem [shape: bf16[32,128], index: 10, kind: input, shape index: {}]   ;;  %s5087_s11 = inlined_call_operand.vmem [shape: bf16[32,128], index: 11, kind: input, shape index: {}]   ;;  %s5088_s12 = inlined_call_operand.vmem [shape: f32[1,128], index: 12, kind: input, shape index: {}]   ;;  %s5089_s13 = inlined_call_operand.vmem [shape: bf16[32,128], index: 13, kind: input, shape index: {}]   ;;  %s5090_s14 = inlined_call_operand.vmem [shape: f32[1,128], index: 14, kind: input, shape index: {}]   ;;  %s5091_s15 = inlined_call_operand.vmem [shape: f32[8,128], index: 15, kind: output, shape index: {}]  }
   0x1   :  { %21 = vsyncpa [#allocation5], 0  ;;  %s4422_s18 = smov [#allocation4]  }
   0x2   :  { %s43_s19 = sshll.u32 %s4422_s18, 4  ;;  %s44_s19 = int_to_ptr.vmem [resolvable:$true] %s43_s19 }
   0x3   :  { %s4366_s20 = scalar_lea.vmem %s44_s19, 8192  ;;  %p4371_p1 = scmp.lt.s32.totalorder %s44_s19, %s44_s19 }
   0x4   :  { %p4367_p0 = scmp.ne.s32.totalorder %s44_s19, %s4366_s20  ;;  %p4372_p2 = scmp.lt.s32.totalorder %s4366_s20, %s4366_s20 }
   0x6   :  { %p4373_p3 = por %p4372_p2, %p4371_p1 }
   0x8   :  { %p4374_p4 = pnand %p4373_p3, %p4367_p0 }
   0xa   :  { %4377 = shalt.err (!%p4374_p4)
}
   0xb   :  { %s4423_s21 = smov 128   ;;  %s4424_s22 = smov 8  }
   0xc   :  { %49 = dma.hbm_to_vmem [thread:$0]  %s5079_s3, 8192, %s44_s19, [#allocation5], %s4423_s21, %s4423_s21, %s4424_s22  }
   0xd   :  { %s4425_s25 = smov [#allocation2]  }
   0xe   :  { %s29_s26 = sshll.u32 %s4425_s25, 4  ;;  %s30_s26 = int_to_ptr.vmem [resolvable:$true] %s29_s26 }
   0xf   :  { %s4386_s27 = scalar_lea.vmem %s30_s26, 12288  ;;  %p4391_p6 = scmp.lt.s32.totalorder %s30_s26, %s30_s26 }
  0x10   :  { %p4387_p5 = scmp.ne.s32.totalorder %s30_s26, %s4386_s27  ;;  %p4392_p7 = scmp.lt.s32.totalorder %s4386_s27, %s4386_s27 }
  0x12   :  { %p4393_p8 = por %p4392_p7, %p4391_p6 }
  0x14   :  { %p4394_p9 = pnand %p4393_p8, %p4387_p5 }
  0x16   :  { %4397 = shalt.err (!%p4394_p9)
}
  0x17   :  { %s4426_s28 = smov 256   ;;  %s4427_s29 = smov 16  }
  0x18   :  { %35 = dma.hbm_to_vmem [thread:$0]  %s5077_s1, 12288, %s30_s26, [#allocation3], %s4426_s28, %s4426_s28, %s4427_s29  }
  0x19   :  { %s4428_s17 = smov [#allocation6]  }
  0x1a   :  { %s57_s18 = sshll.u32 %s4428_s17, 4  ;;  %s58_s18 = int_to_ptr.vmem [resolvable:$true] %s57_s18 }
  0x1b   :  { %s4406_s3 = scalar_lea.vmem %s58_s18, 4096  ;;  %p4411_p11 = scmp.lt.s32.totalorder %s58_s18, %s58_s18 }
  0x1c   :  { %p4407_p10 = scmp.ne.s32.totalorder %s58_s18, %s4406_s3  ;;  %p4412_p12 = scmp.lt.s32.totalorder %s4406_s3, %s4406_s3 }
  0x1e   :  { %p4413_p13 = por %p4412_p12, %p4411_p11 }
  0x20   :  { %p4414_p0 = pnand %p4413_p13, %p4407_p10 }
  0x22   :  { %4417 = shalt.err (!%p4414_p0)
}
  0x23   :  { %63 = dma.hbm_to_vmem [thread:$0]  %s5081_s5, 4096, %s58_s18, [#allocation5], %s4423_s21, %s4423_s21, %s4424_s22  }
  0x24   :  { %4418 = dma.done.wait [#allocation3], 12288  }
  0x25   :  { %4419 = vsyncadd [#allocation3], 4294955008 }
  0x26   :  { %4420 = dma.done.wait [#allocation5], 12288  }
  0x27   :  { %4421 = vsyncadd [#allocation5], 4294955008  ;;  %v4429_v0 = vmov 0   ;;  %v3926_v1 = vld [vmem:[#allocation2 + $0xe4] ss:$16 sps:$4 sm:$0xff]   ;;  %v4527_v33 = vld [vmem:[%s5076_s0 + $0x8] sm:$0xff] }
  0x28   :  { %790 = vmatprep.mubr.bf16.mxu1 %v4429_v0  ;;  %v3928_v2 = vld [vmem:[#allocation2 + $0x2e4] ss:$16 sps:$4 sm:$0xff]   ;;  %685 = vmatprep.subr.bf16.mxu0 %v3926_v1  ;;  %v3930_v3 = vld [vmem:[#allocation2 + $0xe0] ss:$16 sps:$4 sm:$0xff]   ;;  %v3978_v36 = vld [vmem:[#allocation2 + $0xec] ss:$16 sps:$4 sm:$0xff]  }
  0x29   :  { %v3931_v4 = vld [vmem:[#allocation2 + $0x2e0] ss:$16 sps:$4 sm:$0xff]   ;;  %758 = vmatprep.subr.bf16.mxu1 %v3928_v2  ;;  %v3932_v5 = vld [vmem:[#allocation2 + $0xc4] ss:$16 sps:$4 sm:$0xff]   ;;  %686 = vmatpush1.bf16.msra.mxu0 %v3930_v3  ;;  %v3976_v38 = vld [vmem:[#allocation2 + $0xe8] ss:$16 sps:$4 sm:$0xff]  }
  0x2a   :  { %759 = vmatpush1.bf16.msra.mxu1 %v3931_v4  ;;  %v3934_v6 = vld [vmem:[#allocation2 + $0x2c4] ss:$16 sps:$4 sm:$0xff]   ;;  %v3936_v7 = vld [vmem:[#allocation2 + $0xc0] ss:$16 sps:$4 sm:$0xff]   ;;  %687 = vmatprep.subr.bf16.mxu0 %v3932_v5  ;;  %v3984_v41 = vld [vmem:[#allocation2 + $0xcc] ss:$16 sps:$4 sm:$0xff]  }
  0x2b   :  { %v3937_v8 = vld [vmem:[#allocation2 + $0x2c0] ss:$16 sps:$4 sm:$0xff]   ;;  %760 = vmatprep.subr.bf16.mxu1 %v3934_v6  ;;  %v3938_v9 = vld [vmem:[#allocation2 + $0xa4] ss:$16 sps:$4 sm:$0xff]   ;;  %v3982_v42 = vld [vmem:[#allocation2 + $0xc8] ss:$16 sps:$4 sm:$0xff]  }
  0x2c   :  { %v3940_v10 = vld [vmem:[#allocation2 + $0x2a4] ss:$16 sps:$4 sm:$0xff]   ;;  %v3942_v11 = vld [vmem:[#allocation2 + $0xa0] ss:$16 sps:$4 sm:$0xff]   ;;  %v3990_v45 = vld [vmem:[#allocation2 + $0xac] ss:$16 sps:$4 sm:$0xff]  }
  0x2d   :  { %v3943_v12 = vld [vmem:[#allocation2 + $0x2a0] ss:$16 sps:$4 sm:$0xff]   ;;  %688 = vmatpush1.bf16.msra.mxu0 %v3936_v7  ;;  %v3944_v13 = vld [vmem:[#allocation2 + $0x84] ss:$16 sps:$4 sm:$0xff]   ;;  %v3988_v46 = vld [vmem:[#allocation2 + $0xa8] ss:$16 sps:$4 sm:$0xff]  }
  0x2e   :  { %761 = vmatpush1.bf16.msra.mxu1 %v3937_v8  ;;  %689 = vmatprep.subr.bf16.mxu0 %v3938_v9  ;;  %v3946_v14 = vld [vmem:[#allocation2 + $0x284] ss:$16 sps:$4 sm:$0xff]   ;;  %v3948_v15 = vld [vmem:[#allocation2 + $0x80] ss:$16 sps:$4 sm:$0xff]   ;;  %v3996_v49 = vld [vmem:[#allocation2 + $0x8c] ss:$16 sps:$4 sm:$0xff]  }
  0x2f   :  { %762 = vmatprep.subr.bf16.mxu1 %v3940_v10  ;;  %v3949_v16 = vld [vmem:[#allocation2 + $0x280] ss:$16 sps:$4 sm:$0xff]   ;;  %v3950_v17 = vld [vmem:[#allocation2 + $0x64] ss:$16 sps:$4 sm:$0xff]   ;;  %v3994_v50 = vld [vmem:[#allocation2 + $0x88] ss:$16 sps:$4 sm:$0xff]  }
  0x30   :  { %v3952_v18 = vld [vmem:[#allocation2 + $0x264] ss:$16 sps:$4 sm:$0xff]   ;;  %v3954_v19 = vld [vmem:[#allocation2 + $0x60] ss:$16 sps:$4 sm:$0xff]   ;;  %v4430_v54 = vmov 0.0   ;;  %v4550_v57 = vld [vmem:[%s5076_s0 + $0x18] sm:$0xff] }
  0x31   :  { %690 = vmatpush1.bf16.msra.mxu0 %v3942_v11  ;;  %v3955_v20 = vld [vmem:[#allocation2 + $0x260] ss:$16 sps:$4 sm:$0xff]   ;;  %v3956_v21 = vld [vmem:[#allocation2 + $0x44] ss:$16 sps:$4 sm:$0xff]   ;;  %v4002_v56 = vld [vmem:[#allocation2 + $0x6c] ss:$16 sps:$4 sm:$0xff]  }
  0x32   :  { %763 = vmatpush1.bf16.msra.mxu1 %v3943_v12  ;;  %691 = vmatprep.subr.bf16.mxu0 %v3944_v13  ;;  %v3958_v22 = vld [vmem:[#allocation2 + $0x244] ss:$16 sps:$4 sm:$0xff]   ;;  %v3960_v23 = vld [vmem:[#allocation2 + $0x40] ss:$16 sps:$4 sm:$0xff]   ;;  %v4000_v59 = vld [vmem:[#allocation2 + $0x68] ss:$16 sps:$4 sm:$0xff]  }
  0x33   :  { %764 = vmatprep.subr.bf16.mxu1 %v3946_v14  ;;  %v3961_v24 = vld [vmem:[#allocation2 + $0x240] ss:$16 sps:$4 sm:$0xff]   ;;  %v3962_v25 = vld [vmem:[#allocation2 + $0x24] ss:$16 sps:$4 sm:$0xff]   ;;  %v4008_v63 = vld [vmem:[#allocation2 + $0x4c] ss:$16 sps:$4 sm:$0xff]  }
  0x34   :  { %v3964_v26 = vld [vmem:[#allocation2 + $0x224] ss:$16 sps:$4 sm:$0xff]   ;;  %v3966_v27 = vld [vmem:[#allocation2 + $0x20] ss:$16 sps:$4 sm:$0xff]   ;;  %v4006_v1 = vld [vmem:[#allocation2 + $0x48] ss:$16 sps:$4 sm:$0xff]  }
  0x35   :  { %692 = vmatpush1.bf16.msra.mxu0 %v3948_v15  ;;  %v3967_v28 = vld [vmem:[#allocation2 + $0x220] ss:$16 sps:$4 sm:$0xff]   ;;  %v3968_v29 = vld [vmem:[#allocation2 + $0x4] ss:$16 sps:$4 sm:$0xff]   ;;  %v4566_v4 = vld [vmem:[%s5076_s0 + $0x28] sm:$0xff]  ;;  %vm4431_vm0 = vmmov 0  }
  0x36   :  { %765 = vmatpush1.bf16.msra.mxu1 %v3949_v16  ;;  %693 = vmatprep.subr.bf16.mxu0 %v3950_v17  ;;  %v3970_v30 = vld [vmem:[#allocation2 + $0x204] ss:$16 sps:$4 sm:$0xff]   ;;  %v3972_v31 = vld [vmem:[#allocation2] ss:$16 sps:$4 sm:$0xff]   ;;  %v4014_v6 = vld [vmem:[#allocation2 + $0x2c] ss:$16 sps:$4 sm:$0xff]  }
  0x37   :  { %766 = vmatprep.subr.bf16.mxu1 %v3952_v18  ;;  %v3973_v32 = vld [vmem:[#allocation2 + $0x200] ss:$16 sps:$4 sm:$0xff]   ;;  %v3974_v35 = vld [vmem:[#allocation2 + $0x1e4] ss:$16 sps:$4 sm:$0xff]   ;;  %v4012_v8 = vld [vmem:[#allocation2 + $0x28] ss:$16 sps:$4 sm:$0xff]  }
  0x38   :  { %v4532_v34 = vld [vmem:[%s5076_s0 + $0x10] sm:$0xff]  ;;  %v92_v51 = vld [vmem:[%s5076_s0] sm:$0xff]  ;;  %v4020_v11 = vld [vmem:[#allocation2 + $0xc] ss:$16 sps:$4 sm:$0xff]   ;;  %s4433_s1 = smov 32   ;;  %vm2074_vm1 = vcmask 261120  }
  0x39   :  { %694 = vmatpush1.bf16.msra.mxu0 %v3954_v19  ;;  %v4536_v37 = vpack.c.bf16 %v4532_v34, %v4527_v33  ;;  %v3979_v39 = vld [vmem:[#allocation2 + $0x1e0] ss:$16 sps:$4 sm:$0xff]   ;;  %v3980_v40 = vld [vmem:[#allocation2 + $0x1c4] ss:$16 sps:$4 sm:$0xff]   ;;  %v4544_v55 = vpack.c.bf16 %v92_v51, %v4430_v54  ;;  %v4018_v12 = vld [vmem:[#allocation2 + $0x8] ss:$16 sps:$4 sm:$0xff]   ;;  %v4589_v18 = vpack.c.bf16 %v4527_v33, %v92_v51 }
  0x3a   :  { %767 = vmatpush1.bf16.msra.mxu1 %v3955_v20  ;;  %695 = vmatprep.subr.bf16.mxu0 %v3956_v21  ;;  %v3985_v43 = vld [vmem:[#allocation2 + $0x1c0] ss:$16 sps:$4 sm:$0xff]   ;;  %v3986_v44 = vld [vmem:[#allocation2 + $0x1a4] ss:$16 sps:$4 sm:$0xff]   ;;  %v4582_v14 = vld [vmem:[%s5076_s0 + $0x38] sm:$0xff] }
  0x3b   :  { %768 = vmatprep.subr.bf16.mxu1 %v3958_v22  ;;  %v3991_v47 = vld [vmem:[#allocation2 + $0x1a0] ss:$16 sps:$4 sm:$0xff]   ;;  %v3992_v48 = vld [vmem:[#allocation2 + $0x184] ss:$16 sps:$4 sm:$0xff]   ;;  %717 = vmatprep.mubr.bf16.mxu0 %v4544_v55  ;;  %v4024_v15 = vld [vmem:[#allocation2 + $0x1ec] ss:$16 sps:$4 sm:$0xff]   ;;  %v4586_v17 = vpack.c.bf16 %v4430_v54, %v4582_v14 }
  0x3c   :  { %v3997_v52 = vld [vmem:[#allocation2 + $0x180] ss:$16 sps:$4 sm:$0xff]   ;;  %v3998_v53 = vld [vmem:[#allocation2 + $0x164] ss:$16 sps:$4 sm:$0xff]   ;;  %v4027_v16 = vld [vmem:[#allocation2 + $0x2ec] ss:$16 sps:$4 sm:$0xff]  }
  0x3d   :  { %696 = vmatpush1.bf16.msra.mxu0 %v3960_v23  ;;  %v4555_v58 = vld [vmem:[%s5076_s0 + $0x20] sm:$0xff]  ;;  %v4571_v5 = vld [vmem:[%s5076_s0 + $0x30] sm:$0xff]  ;;  %v4022_v19 = vld [vmem:[#allocation2 + $0x1e8] ss:$16 sps:$4 sm:$0xff]  }
  0x3e   :  { %769 = vmatpush1.bf16.msra.mxu1 %v3961_v24  ;;  %697 = vmatprep.subr.bf16.mxu0 %v3962_v25  ;;  %v4559_v60 = vpack.c.bf16 %v4555_v58, %v4550_v57  ;;  %v4003_v61 = vld [vmem:[#allocation2 + $0x160] ss:$16 sps:$4 sm:$0xff]   ;;  %v4004_v62 = vld [vmem:[#allocation2 + $0x144] ss:$16 sps:$4 sm:$0xff]   ;;  %v4575_v7 = vpack.c.bf16 %v4571_v5, %v4566_v4  ;;  %v4025_v20 = vld [vmem:[#allocation2 + $0x2e8] ss:$16 sps:$4 sm:$0xff]  }
  0x3f   :  { %770 = vmatprep.subr.bf16.mxu1 %v3964_v26  ;;  %v4009_v2 = vld [vmem:[#allocation2 + $0x140] ss:$16 sps:$4 sm:$0xff]   ;;  %v4010_v3 = vld [vmem:[#allocation2 + $0x124] ss:$16 sps:$4 sm:$0xff]   ;;  %v4030_v21 = vld [vmem:[#allocation2 + $0x1cc] ss:$16 sps:$4 sm:$0xff]  }
  0x40   :  { %v4015_v9 = vld [vmem:[#allocation2 + $0x120] ss:$16 sps:$4 sm:$0xff]   ;;  %v4016_v10 = vld [vmem:[#allocation2 + $0x104] ss:$16 sps:$4 sm:$0xff]   ;;  %v4033_v22 = vld [vmem:[#allocation2 + $0x2cc] ss:$16 sps:$4 sm:$0xff]  }
  0x41   :  { %698 = vmatpush1.bf16.msra.mxu0 %v3966_v27  ;;  %v4021_v13 = vld [vmem:[#allocation2 + $0x100] ss:$16 sps:$4 sm:$0xff]   ;;  %v4028_v23 = vld [vmem:[#allocation2 + $0x1c8] ss:$16 sps:$4 sm:$0xff]   ;;  %v4036_v25 = vld [vmem:[#allocation2 + $0x1ac] ss:$16 sps:$4 sm:$0xff]  }
  0x42   :  { %771 = vmatpush1.bf16.msra.mxu1 %v3967_v28  ;;  %699 = vmatprep.subr.bf16.mxu0 %v3968_v29  ;;  %v4031_v24 = vld [vmem:[#allocation2 + $0x2c8] ss:$16 sps:$4 sm:$0xff]   ;;  %v4039_v26 = vld [vmem:[#allocation2 + $0x2ac] ss:$16 sps:$4 sm:$0xff]   ;;  %v103_v29 = vpack.c.bf16 %v4550_v57, %v4532_v34  ;;  %v4600_v34 = vpack.c.bf16 %v4566_v4, %v4555_v58 }
  0x43   :  { %772 = vmatprep.subr.bf16.mxu1 %v3970_v30  ;;  %v4034_v27 = vld [vmem:[#allocation2 + $0x1a8] ss:$16 sps:$4 sm:$0xff]   ;;  %v4042_v30 = vld [vmem:[#allocation2 + $0x18c] ss:$16 sps:$4 sm:$0xff]  }
  0x44   :  { %v4037_v28 = vld [vmem:[#allocation2 + $0x2a8] ss:$16 sps:$4 sm:$0xff]   ;;  %v4075_v57 = vld [vmem:[#allocation4 + $0x174] ss:$8 sps:$4 sm:$0xff]   ;;  %v4078_v58 = vld [vmem:[#allocation4 + $0x64] ss:$8 sps:$4 sm:$0xff]  }
  0x45   :  { %700 = vmatpush1.bf16.msra.mxu0 %v3972_v31  ;;  %v4045_v31 = vld [vmem:[#allocation2 + $0x28c] ss:$16 sps:$4 sm:$0xff]   ;;  %v4043_v33 = vld [vmem:[#allocation2 + $0x288] ss:$16 sps:$4 sm:$0xff]  }
  0x46   :  { %773 = vmatpush1.bf16.msra.mxu1 %v3973_v32  ;;  %701 = vmatprep.subr.bf16.mxu0 %v3974_v35  ;;  %v4040_v32 = vld [vmem:[#allocation2 + $0x188] ss:$16 sps:$4 sm:$0xff]   ;;  %v4048_v35 = vld [vmem:[#allocation2 + $0x16c] ss:$16 sps:$4 sm:$0xff]  }
  0x47   :  { %831 = vmatprep.subr.bf16.mxu1 %v3978_v36  ;;  %v4051_v36 = vld [vmem:[#allocation2 + $0x26c] ss:$16 sps:$4 sm:$0xff]   ;;  %v4064_v51 = vld [vmem:[#allocation2 + $0x108] ss:$16 sps:$4 sm:$0xff]  }
  0x48   :  { %v4093_v4 = vld [vmem:[#allocation4 + $0x144] ss:$8 sps:$4 sm:$0xff]  }
  0x49   :  { %791 = vmatmul.mubr.bf16.vlgmr.msra.gmra.mxu1 %v4536_v37  ;;  %702 = vmatpush2.bf16.msra.mxu0 %v3979_v39  ;;  %v4049_v39 = vld [vmem:[#allocation2 + $0x268] ss:$16 sps:$4 sm:$0xff]  }
  0x4a   :  { %832 = vmatpush1.bf16.msra.mxu1 %v3976_v38  ;;  %703 = vmatprep.subr.bf16.mxu0 %v3980_v40  ;;  %v4046_v38 = vld [vmem:[#allocation2 + $0x168] ss:$16 sps:$4 sm:$0xff]   ;;  %v4054_v40 = vld [vmem:[#allocation2 + $0x14c] ss:$16 sps:$4 sm:$0xff]  }
  0x4b   :  { %833 = vmatprep.subr.bf16.mxu1 %v3984_v41  ;;  %800 = vmatprep.mubr.bf16.mxu1 %v4429_v0  ;;  %v4057_v41 = vld [vmem:[#allocation2 + $0x24c] ss:$16 sps:$4 sm:$0xff]  }
  0x4d   :  { %704 = vmatpush2.bf16.msra.mxu0 %v3985_v43  ;;  %v4055_v43 = vld [vmem:[#allocation2 + $0x248] ss:$16 sps:$4 sm:$0xff]  }
  0x4e   :  { %834 = vmatpush1.bf16.msra.mxu1 %v3982_v42  ;;  %705 = vmatprep.subr.bf16.mxu0 %v3986_v44  ;;  %v4052_v42 = vld [vmem:[#allocation2 + $0x148] ss:$16 sps:$4 sm:$0xff]   ;;  %v4060_v44 = vld [vmem:[#allocation2 + $0x12c] ss:$16 sps:$4 sm:$0xff]  }
  0x4f   :  { %835 = vmatprep.subr.bf16.mxu1 %v3990_v45  ;;  %v4063_v45 = vld [vmem:[#allocation2 + $0x22c] ss:$16 sps:$4 sm:$0xff]  }
  0x51   :  { %706 = vmatpush2.bf16.msra.mxu0 %v3991_v47  ;;  %801 = vmatmul.mubr.bf16.gmra.mxu1 %v4559_v60  ;;  %v4061_v47 = vld [vmem:[#allocation2 + $0x228] ss:$16 sps:$4 sm:$0xff]  }
  0x52   :  { %836 = vmatpush1.bf16.msra.mxu1 %v3988_v46  ;;  %707 = vmatprep.subr.bf16.mxu0 %v3992_v48  ;;  %v4058_v46 = vld [vmem:[#allocation2 + $0x128] ss:$16 sps:$4 sm:$0xff]   ;;  %v107_v48 = vpack.c.bf16 %v4582_v14, %v4571_v5  ;;  %v4108_v14 = vld [vmem:[#allocation4 + $0x14] ss:$8 sps:$4 sm:$0xff]  }
  0x53   :  { %837 = vmatprep.subr.bf16.mxu1 %v3996_v49  ;;  %810 = vmatprep.mubr.bf16.mxu1 %v4429_v0  ;;  %v4066_v49 = vld [vmem:[#allocation2 + $0x10c] ss:$16 sps:$4 sm:$0xff]   ;;  %v4091_v5 = vld [vmem:[#allocation4 + $0x140] ss:$8 sps:$4 sm:$0xff]  }
  0x55   :  { %708 = vmatpush2.bf16.msra.mxu0 %v3997_v52  ;;  %v4067_v52 = vld [vmem:[#allocation2 + $0x208] ss:$16 sps:$4 sm:$0xff]  }
  0x56   :  { %838 = vmatpush1.bf16.msra.mxu1 %v3994_v50  ;;  %709 = vmatprep.subr.bf16.mxu0 %v3998_v53  ;;  %v4069_v50 = vld [vmem:[#allocation2 + $0x20c] ss:$16 sps:$4 sm:$0xff]  }
  0x57   :  { %839 = vmatprep.subr.bf16.mxu1 %v4002_v56  ;;  %v4072_v53 = vld [vmem:[#allocation4 + $0x74] ss:$8 sps:$4 sm:$0xff]   ;;  %v4073_v56 = vld [vmem:[#allocation4 + $0x170] ss:$8 sps:$4 sm:$0xff]  }
  0x59   :  { %710 = vmatpush2.bf16.msra.mxu0 %v4003_v61  ;;  %811 = vmatmul.mubr.bf16.gmra.mxu1 %v4575_v7  ;;  %v4076_v61 = vld [vmem:[#allocation4 + $0x60] ss:$8 sps:$4 sm:$0xff]  }
  0x5a   :  { %840 = vmatpush1.bf16.msra.mxu1 %v4000_v59  ;;  %711 = vmatprep.subr.bf16.mxu0 %v4004_v62  ;;  %v4081_v59 = vld [vmem:[#allocation4 + $0x164] ss:$8 sps:$4 sm:$0xff]   ;;  %v4079_v62 = vld [vmem:[#allocation4 + $0x160] ss:$8 sps:$4 sm:$0xff]  }
  0x5b   :  { %841 = vmatprep.subr.bf16.mxu1 %v4008_v63  ;;  %820 = vmatprep.mubr.bf16.mxu1 %v4429_v0  ;;  %v4087_v63 = vld [vmem:[#allocation4 + $0x154] ss:$8 sps:$4 sm:$0xff]  }
  0x5d   :  { %712 = vmatpush2.bf16.msra.mxu0 %v4009_v2  ;;  %v4085_v2 = vld [vmem:[#allocation4 + $0x150] ss:$8 sps:$4 sm:$0xff]  }
  0x5e   :  { %842 = vmatpush1.bf16.msra.mxu1 %v4006_v1  ;;  %713 = vmatprep.subr.bf16.mxu0 %v4010_v3  ;;  %v4082_v1 = vld [vmem:[#allocation4 + $0x50] ss:$8 sps:$4 sm:$0xff]   ;;  %v4088_v3 = vld [vmem:[#allocation4 + $0x40] ss:$8 sps:$4 sm:$0xff]  }
  0x5f   :  { %843 = vmatprep.subr.bf16.mxu1 %v4014_v6  ;;  %v4096_v6 = vld [vmem:[#allocation4 + $0x34] ss:$8 sps:$4 sm:$0xff]  }
  0x61   :  { %714 = vmatpush2.bf16.msra.mxu0 %v4015_v9  ;;  %821 = vmatmul.mubr.bf16.gmra.mxu1 %v4586_v17  ;;  %v4097_v9 = vld [vmem:[#allocation4 + $0x130] ss:$8 sps:$4 sm:$0xff]  }
  0x62   :  { %844 = vmatpush1.bf16.msra.mxu1 %v4012_v8  ;;  %715 = vmatprep.subr.bf16.mxu0 %v4016_v10  ;;  %v4094_v8 = vld [vmem:[#allocation4 + $0x30] ss:$8 sps:$4 sm:$0xff]   ;;  %v4102_v10 = vld [vmem:[#allocation4 + $0x24] ss:$8 sps:$4 sm:$0xff]  }
  0x63   :  { %845 = vmatprep.subr.bf16.mxu1 %v4020_v11  ;;  %863 = vmatprep.mubr.bf16.mxu1 %v4544_v55  ;;  %v4070_v55 = vld [vmem:[#allocation4 + $0x70] ss:$8 sps:$4 sm:$0xff]   ;;  %v4100_v11 = vld [vmem:[#allocation4 + $0x20] ss:$8 sps:$4 sm:$0xff]  }
  0x65   :  { %716 = vmatpush2.bf16.msra.mxu0 %v4021_v13  ;;  %v4103_v13 = vld [vmem:[#allocation4 + $0x120] ss:$8 sps:$4 sm:$0xff]  }
  0x66   :  { %846 = vmatpush1.bf16.msra.mxu1 %v4018_v12  ;;  %904 = vmatprep.subr.bf16.mxu0 %v4027_v16  ;;  %v4105_v12 = vld [vmem:[#allocation4 + $0x124] ss:$8 sps:$4 sm:$0xff]   ;;  %v4111_v16 = vld [vmem:[#allocation4 + $0x114] ss:$8 sps:$4 sm:$0xff]  }
  0x67   :  { %847 = vmatprep.subr.bf16.mxu1 %v4024_v15  ;;  %v4106_v15 = vld [vmem:[#allocation4 + $0x10] ss:$8 sps:$4 sm:$0xff]  }
  0x68   :  { %718 = vmatmul.mubr.bf16.vlgmr.msra.gmra.mxu0 %v4589_v18 }
  0x69   :  { %905 = vmatpush1.bf16.msra.mxu0 %v4025_v20  ;;  %727 = vmatprep.mubr.bf16.mxu0 %v4536_v37  ;;  %v4117_v20 = vld [vmem:[#allocation4 + $0x104] ss:$8 sps:$4 sm:$0xff]  }
  0x6a   :  { %848 = vmatpush2.bf16.msra.mxu1 %v4022_v19  ;;  %906 = vmatprep.subr.bf16.mxu0 %v4033_v22  ;;  %v4112_v19 = vld [vmem:[#allocation4] ss:$8 sps:$4 sm:$0xff]   ;;  %v4120_v22 = vld [vmem:[#allocation4 + $0xf4] ss:$8 sps:$4 sm:$0xff]  }
  0x6b   :  { %849 = vmatprep.subr.bf16.mxu1 %v4030_v21  ;;  %v4115_v21 = vld [vmem:[#allocation4 + $0x100] ss:$8 sps:$4 sm:$0xff]  }
  0x6d   :  { %907 = vmatpush1.bf16.msra.mxu0 %v4031_v24  ;;  %v4123_v24 = vld [vmem:[#allocation4 + $0x1f4] ss:$8 sps:$4 sm:$0xff]  }
  0x6e   :  { %850 = vmatpush2.bf16.msra.mxu1 %v4028_v23  ;;  %908 = vmatprep.subr.bf16.mxu0 %v4039_v26  ;;  %v4118_v23 = vld [vmem:[#allocation4 + $0xf0] ss:$8 sps:$4 sm:$0xff]   ;;  %v4126_v26 = vld [vmem:[#allocation4 + $0xe4] ss:$8 sps:$4 sm:$0xff]  }
  0x6f   :  { %851 = vmatprep.subr.bf16.mxu1 %v4036_v25  ;;  %v4121_v25 = vld [vmem:[#allocation4 + $0x1f0] ss:$8 sps:$4 sm:$0xff]  }
  0x70   :  { %728 = vmatmul.mubr.bf16.gmra.mxu0 %v103_v29 }
  0x71   :  { %909 = vmatpush1.bf16.msra.mxu0 %v4037_v28  ;;  %737 = vmatprep.mubr.bf16.mxu0 %v4559_v60  ;;  %v4129_v28 = vld [vmem:[#allocation4 + $0x1e4] ss:$8 sps:$4 sm:$0xff]  }
  0x72   :  { %852 = vmatpush2.bf16.msra.mxu1 %v4034_v27  ;;  %910 = vmatprep.subr.bf16.mxu0 %v4045_v31  ;;  %v4124_v27 = vld [vmem:[#allocation4 + $0xe0] ss:$8 sps:$4 sm:$0xff]   ;;  %v4130_v31 = vld [vmem:[#allocation4 + $0xd0] ss:$8 sps:$4 sm:$0xff]  }
  0x73   :  { %853 = vmatprep.subr.bf16.mxu1 %v4042_v30  ;;  %v4132_v30 = vld [vmem:[#allocation4 + $0xd4] ss:$8 sps:$4 sm:$0xff]  }
  0x75   :  { %911 = vmatpush1.bf16.msra.mxu0 %v4043_v33  ;;  %v4133_v33 = vld [vmem:[#allocation4 + $0x1d0] ss:$8 sps:$4 sm:$0xff]  }
  0x76   :  { %854 = vmatpush2.bf16.msra.mxu1 %v4040_v32  ;;  %912 = vmatprep.subr.bf16.mxu0 %v4051_v36  ;;  %v4135_v32 = vld [vmem:[#allocation4 + $0x1d4] ss:$8 sps:$4 sm:$0xff]   ;;  %v4136_v36 = vld [vmem:[#allocation4 + $0xc0] ss:$8 sps:$4 sm:$0xff]  }
  0x77   :  { %855 = vmatprep.subr.bf16.mxu1 %v4048_v35  ;;  %v4138_v35 = vld [vmem:[#allocation4 + $0xc4] ss:$8 sps:$4 sm:$0xff]  }
  0x78   :  { %738 = vmatmul.mubr.bf16.gmra.mxu0 %v4600_v34 }
  0x79   :  { %913 = vmatpush1.bf16.msra.mxu0 %v4049_v39  ;;  %747 = vmatprep.mubr.bf16.mxu0 %v4575_v7  ;;  %v4139_v39 = vld [vmem:[#allocation4 + $0x1c0] ss:$8 sps:$4 sm:$0xff]  }
  0x7a   :  { %856 = vmatpush2.bf16.msra.mxu1 %v4046_v38  ;;  %914 = vmatprep.subr.bf16.mxu0 %v4057_v41  ;;  %v4141_v38 = vld [vmem:[#allocation4 + $0x1c4] ss:$8 sps:$4 sm:$0xff]   ;;  %v4147_v41 = vld [vmem:[#allocation4 + $0x1b4] ss:$8 sps:$4 sm:$0xff]  }
  0x7b   :  { %857 = vmatprep.subr.bf16.mxu1 %v4054_v40  ;;  %v4142_v40 = vld [vmem:[#allocation4 + $0xb0] ss:$8 sps:$4 sm:$0xff]  }
  0x7d   :  { %915 = vmatpush1.bf16.msra.mxu0 %v4055_v43  ;;  %v4150_v43 = vld [vmem:[#allocation4 + $0xa4] ss:$8 sps:$4 sm:$0xff]  }
  0x7e   :  { %858 = vmatpush2.bf16.msra.mxu1 %v4052_v42  ;;  %916 = vmatprep.subr.bf16.mxu0 %v4063_v45  ;;  %v4145_v42 = vld [vmem:[#allocation4 + $0x1b0] ss:$8 sps:$4 sm:$0xff]   ;;  %v4153_v45 = vld [vmem:[#allocation4 + $0x1a4] ss:$8 sps:$4 sm:$0xff]  }
  0x7f   :  { %859 = vmatprep.subr.bf16.mxu1 %v4060_v44  ;;  %v4148_v44 = vld [vmem:[#allocation4 + $0xa0] ss:$8 sps:$4 sm:$0xff]  }
  0x80   :  { %748 = vmatmul.mubr.bf16.gmra.mxu0 %v107_v48 }
  0x81   :  { %917 = vmatpush1.bf16.msra.mxu0 %v4061_v47  ;;  %936 = vmatprep.mubr.bf16.mxu0 %v4429_v0  ;;  %v4156_v47 = vld [vmem:[#allocation4 + $0x94] ss:$8 sps:$4 sm:$0xff]  }
  0x82   :  { %860 = vmatpush2.bf16.msra.mxu1 %v4058_v46  ;;  %918 = vmatprep.subr.bf16.mxu0 %v4069_v50  ;;  %v4151_v46 = vld [vmem:[#allocation4 + $0x1a0] ss:$8 sps:$4 sm:$0xff]   ;;  %v4157_v50 = vld [vmem:[#allocation4 + $0x190] ss:$8 sps:$4 sm:$0xff]  }
  0x83   :  { %861 = vmatprep.subr.bf16.mxu1 %v4066_v49  ;;  %v4159_v49 = vld [vmem:[#allocation4 + $0x194] ss:$8 sps:$4 sm:$0xff]  }
  0x85   :  { %919 = vmatpush1.bf16.msra.mxu0 %v4067_v52  ;;  %v4160_v52 = vld [vmem:[#allocation4 + $0x80] ss:$8 sps:$4 sm:$0xff]  }
  0x86   :  { %862 = vmatpush2.bf16.msra.mxu1 %v4064_v51  ;;  %1437 = vmatprep.subr.bf16.mxu0 %v4072_v53  ;;  %v4162_v51 = vld [vmem:[#allocation4 + $0x84] ss:$8 sps:$4 sm:$0xff]  }
  0x87   :  { %1510 = vmatprep.subr.bf16.mxu1 %v4075_v57  ;;  %v4165_v53 = vld [vmem:[#allocation4 + $0x184] ss:$8 sps:$4 sm:$0xff]  }
  0x88   :  { %937 = vmatmul.mubr.bf16.vlgmr.msra.gmra.mxu0 %v4536_v37 }
  0x89   :  { %864 = vmatmul.mubr.bf16.vlgmr.msra.gmra.mxu1 %v4589_v18  ;;  %946 = vmatprep.mubr.bf16.mxu0 %v4429_v0  ;;  %v4114_v18 = vld [vmem:[#allocation4 + $0x4] ss:$8 sps:$4 sm:$0xff]  }
  0x8a   :  { %873 = vmatprep.mubr.bf16.mxu1 %v4536_v37  ;;  %1438 = vmatpush1.bf16.msra.mxu0 %v4070_v55  ;;  %v4084_v37 = vld [vmem:[#allocation4 + $0x54] ss:$8 sps:$4 sm:$0xff]   ;;  %v4163_v55 = vld [vmem:[#allocation4 + $0x180] ss:$8 sps:$4 sm:$0xff]  }
  0x8b   :  { %1511 = vmatpush1.bf16.msra.mxu1 %v4073_v56  ;;  %1439 = vmatprep.subr.bf16.mxu0 %v4078_v58  ;;  %v4168_v56 = vld [vmem:[#allocation6 + $0x74] ss:$8 sps:$4 sm:$0xff]  }
  0x8c   :  { %1512 = vmatprep.subr.bf16.mxu1 %v4081_v59 }
  0x8e   :  { %1440 = vmatpush1.bf16.msra.mxu0 %v4076_v61 }
  0x8f   :  { %1513 = vmatpush1.bf16.msra.mxu1 %v4079_v62  ;;  %1441 = vmatprep.subr.bf16.mxu0 %v4084_v37 }
  0x90   :  { %947 = vmatmul.mubr.bf16.gmra.mxu0 %v4559_v60  ;;  %1514 = vmatprep.subr.bf16.mxu1 %v4087_v63 }
  0x91   :  { %874 = vmatmul.mubr.bf16.gmra.mxu1 %v103_v29  ;;  %956 = vmatprep.mubr.bf16.mxu0 %v4429_v0  ;;  %v4127_v29 = vld [vmem:[#allocation4 + $0x1e0] ss:$8 sps:$4 sm:$0xff]  }
  0x92   :  { %883 = vmatprep.mubr.bf16.mxu1 %v4559_v60  ;;  %v4090_v60 = vld [vmem:[#allocation4 + $0x44] ss:$8 sps:$4 sm:$0xff]   ;;  %1442 = vmatpush1.bf16.msra.mxu0 %v4082_v1 }
  0x93   :  { %1515 = vmatpush1.bf16.msra.mxu1 %v4085_v2  ;;  %1443 = vmatprep.subr.bf16.mxu0 %v4090_v60 }
  0x94   :  { %1516 = vmatprep.subr.bf16.mxu1 %v4093_v4 }
  0x96   :  { %1444 = vmatpush1.bf16.msra.mxu0 %v4088_v3 }
  0x97   :  { %1517 = vmatpush1.bf16.msra.mxu1 %v4091_v5  ;;  %1445 = vmatprep.subr.bf16.mxu0 %v4096_v6 }
  0x98   :  { %957 = vmatmul.mubr.bf16.gmra.mxu0 %v4575_v7 }
  0x99   :  { %884 = vmatmul.mubr.bf16.gmra.mxu1 %v4600_v34  ;;  %966 = vmatprep.mubr.bf16.mxu0 %v4429_v0  ;;  %v4144_v34 = vld [vmem:[#allocation4 + $0xb4] ss:$8 sps:$4 sm:$0xff]  }
  0x9a   :  { %893 = vmatprep.mubr.bf16.mxu1 %v4575_v7  ;;  %v4099_v7 = vld [vmem:[#allocation4 + $0x134] ss:$8 sps:$4 sm:$0xff]   ;;  %1446 = vmatpush1.bf16.msra.mxu0 %v4094_v8 }
  0x9b   :  { %1518 = vmatprep.subr.bf16.mxu1 %v4099_v7  ;;  %1447 = vmatprep.subr.bf16.mxu0 %v4102_v10 }
  0x9c   :  { %1519 = vmatpush1.bf16.msra.mxu1 %v4097_v9 }
  0x9d   :  { %1520 = vmatprep.subr.bf16.mxu1 %v4105_v12 }
  0x9e   :  { %1448 = vmatpush1.bf16.msra.mxu0 %v4100_v11 }
  0x9f   :  { %1449 = vmatprep.subr.bf16.mxu0 %v4108_v14 }
  0xa0   :  { %967 = vmatmul.mubr.bf16.gmra.mxu0 %v4586_v17  ;;  %1521 = vmatpush1.bf16.msra.mxu1 %v4103_v13  ;;  %v4109_v17 = vld [vmem:[#allocation4 + $0x110] ss:$8 sps:$4 sm:$0xff]  }
  0xa1   :  { %894 = vmatmul.mubr.bf16.gmra.mxu1 %v107_v48  ;;  %1522 = vmatprep.subr.bf16.mxu1 %v4111_v16  ;;  %v4154_v48 = vld [vmem:[#allocation4 + $0x90] ss:$8 sps:$4 sm:$0xff]  }
  0xa2   :  { %1450 = vmatpush1.bf16.msra.mxu0 %v4106_v15 }
  0xa3   :  { %1451 = vmatprep.subr.bf16.mxu0 %v4114_v18 }
  0xa4   :  { %1523 = vmatpush1.bf16.msra.mxu1 %v4109_v17 }
  0xa5   :  { %1524 = vmatprep.subr.bf16.mxu1 %v4117_v20 }
  0xa6   :  { %1452 = vmatpush1.bf16.msra.mxu0 %v4112_v19 }
  0xa7   :  { %1453 = vmatprep.subr.bf16.mxu0 %v4120_v22  ;;  %v995_v22 = vlaneseq }
  0xa8   :  { %1525 = vmatpush1.bf16.msra.mxu1 %v4115_v21 }
  0xa9   :  { %1526 = vmatprep.subr.bf16.mxu1 %v4123_v24 }
  0xaa   :  { %1454 = vmatpush2.bf16.msra.mxu0 %v4118_v23 }
  0xab   :  { %1455 = vmatprep.subr.bf16.mxu0 %v4126_v26  ;;  %v996_v26 = vshrl.u32 %v995_v22, 7 }
  0xac   :  { %1527 = vmatpush2.bf16.msra.mxu1 %v4121_v25 }
  0xad   :  { %1528 = vmatprep.subr.bf16.mxu1 %v4129_v28 }
  0xae   :  { %1456 = vmatpush2.bf16.msra.mxu0 %v4124_v27 }
  0xaf   :  { %1457 = vmatprep.subr.bf16.mxu0 %v4132_v30 }
  0xb0   :  { %1529 = vmatpush2.bf16.msra.mxu1 %v4127_v29  ;;  %v1001_v29 = vsub.s32 1, %v996_v26 }
  0xb1   :  { %1530 = vmatprep.subr.bf16.mxu1 %v4135_v32 }
  0xb2   :  { %1458 = vmatpush2.bf16.msra.mxu0 %v4130_v31  ;;  %v997_v31 = vsub.s32 0, %v996_v26 }
  0xb3   :  { %1459 = vmatprep.subr.bf16.mxu0 %v4138_v35 }
  0xb4   :  { %1531 = vmatpush2.bf16.msra.mxu1 %v4133_v33 }
  0xb5   :  { %1532 = vmatprep.subr.bf16.mxu1 %v4141_v38 }
  0xb6   :  { %1460 = vmatpush2.bf16.msra.mxu0 %v4136_v36  ;;  %v993_v36 = vld [vmem:[%s5078_s2] sm:$0x3] }
  0xb7   :  { %1461 = vmatprep.subr.bf16.mxu0 %v4144_v34 }
  0xb8   :  { %1533 = vmatpush2.bf16.msra.mxu1 %v4139_v39 }
  0xb9   :  { %1534 = vmatprep.subr.bf16.mxu1 %v4147_v41 }
  0xba   :  { %1462 = vmatpush2.bf16.msra.mxu0 %v4142_v40 }
  0xbb   :  { %1463 = vmatprep.subr.bf16.mxu0 %v4150_v43  ;;  %v4660_v43 = vrot.slane %v993_v36, %v1001_v29 }
  0xbc   :  { %1535 = vmatpush2.bf16.msra.mxu1 %v4145_v42 }
  0xbd   :  { %1536 = vmatprep.subr.bf16.mxu1 %v4153_v45 }
  0xbe   :  { %1464 = vmatpush2.bf16.msra.mxu0 %v4148_v44 }
  0xbf   :  { %1465 = vmatprep.subr.bf16.mxu0 %v4156_v47 }
  0xc0   :  { %1537 = vmatpush2.bf16.msra.mxu1 %v4151_v46  ;;  %v4662_v46 = vrot.slane %v993_v36, %v997_v31 }
  0xc1   :  { %1538 = vmatprep.subr.bf16.mxu1 %v4159_v49 }
  0xc2   :  { %1466 = vmatpush2.bf16.msra.mxu0 %v4154_v48 }
  0xc3   :  { %1467 = vmatprep.subr.bf16.mxu0 %v4162_v51 }
  0xc4   :  { %1539 = vmatpush2.bf16.msra.mxu1 %v4157_v50 }
  0xc5   :  { %1540 = vmatprep.subr.bf16.mxu1 %v4165_v53 }
  0xc6   :  { %1468 = vmatpush2.bf16.msra.mxu0 %v4160_v52 }
  0xc7   :  { %1814 = vmatprep.subr.bf16.mxu0 %v4168_v56 }
  0xc8   :  { %1541 = vmatpush2.bf16.msra.mxu1 %v4163_v55 }
 0x109   :  { %v792_v57 = vpop.f32.mrf.mxu1 }
 0x10b   :  { %v794_v58 = vpop.f32.mrf.mxu1 }
 0x10d   :  { %v796_v59 = vpop.f32.mrf.mxu1 }
 0x10f   :  { %v798_v61 = vpop.f32.mrf.mxu1 }
 0x111   :  { %v802_v62 = vpop.f32.mrf.mxu1 }
 0x113   :  { %v4619_v37 = vpop.f32.mrf.mxu1 }
 0x115   :  { %v4621_v63 = vpop.f32.mrf.mxu1 }
 0x117   :  { %v4623_v1 = vpop.f32.mrf.mxu1 }
 0x119   :  { %v4625_v3 = vpop.f32.mrf.mxu1 }
 0x11b   :  { %v4627_v6 = vpop.f32.mrf.mxu1 }
 0x11d   :  { %v4629_v9 = vpop.f32.mrf.mxu1 }
 0x11f   :  { %v4631_v12 = vpop.f32.mrf.mxu1 }
 0x121   :  { %v4637_v15 = vpop.f32.mrf.mxu1 }
 0x123   :  { %v4641_v17 = vpop.f32.mrf.mxu1 }
 0x125   :  { %v4647_v20 = vpop.f32.mrf.mxu1 }
 0x127   :  { %v4653_v24 = vpop.f32.mrf.mxu1 }
 0x128   :  { %v719_v2 = vpop.f32.mrf.mxu0 }
 0x129   :  { %v793_v39 = vadd.f32 %v792_v57, %v719_v2 }
 0x12a   :  { %v721_v60 = vpop.f32.mrf.mxu0 }
 0x12b   :  { %v795_v35 = vadd.f32 %v794_v58, %v721_v60 }
 0x12c   :  { %v723_v4 = vpop.f32.mrf.mxu0 }
 0x12d   :  { %v797_v41 = vadd.f32 %v796_v59, %v723_v4 }
 0x12e   :  { %v725_v5 = vpop.f32.mrf.mxu0 }
 0x12f   :  { %v799_v49 = vadd.f32 %v798_v61, %v725_v5 }
 0x130   :  { %v729_v8 = vpop.f32.mrf.mxu0 }
 0x131   :  { %v803_v52 = vadd.f32 %v802_v62, %v729_v8 }
 0x132   :  { %v731_v7 = vpop.f32.mrf.mxu0 }
 0x133   :  { %v805_v61 = vadd.f32 %v4619_v37, %v731_v7 }
 0x134   :  { %v733_v10 = vpop.f32.mrf.mxu0 }
 0x135   :  { %v807_v62 = vadd.f32 %v4621_v63, %v733_v10 }
 0x136   :  { %v735_v11 = vpop.f32.mrf.mxu0 }
 0x138   :  { %v4633_v13 = vpop.f32.mrf.mxu0 }
 0x13a   :  { %v4635_v14 = vpop.f32.mrf.mxu0 }
 0x13c   :  { %v4639_v16 = vpop.f32.mrf.mxu0 }
 0x13e   :  { %v4643_v18 = vpop.f32.mrf.mxu0 }
 0x140   :  { %v4645_v19 = vpop.f32.mrf.mxu0 }
 0x142   :  { %v4649_v21 = vpop.f32.mrf.mxu0 }
 0x144   :  { %v4651_v23 = vpop.f32.mrf.mxu0 }
 0x146   :  { %v4655_v25 = vpop.f32.mrf.mxu0 }
 0x148   :  { %v938_v28 = vpop.f32.mrf.mxu0 }
 0x149   :  { %v865_v27 = vpop.f32.mrf.mxu1 }
 0x14a   :  { %v939_v30 = vadd.f32 %v938_v28, %v865_v27  ;;  %v940_v33 = vpop.f32.mrf.mxu0 }
 0x14b   :  { %v867_v32 = vpop.f32.mrf.mxu1 }
 0x14c   :  { %v941_v38 = vadd.f32 %v940_v33, %v867_v32  ;;  %v942_v40 = vpop.f32.mrf.mxu0  ;;  %v977_v45 = vmax.f32 %v793_v39, %v939_v30  ;;  %v809_v33 = vadd.f32 %v4623_v1, %v735_v11 }
 0x14d   :  { %v869_v34 = vpop.f32.mrf.mxu1 }
 0x14e   :  { %v978_v42 = vmax.f32 %v795_v35, %v941_v38  ;;  %v943_v44 = vadd.f32 %v942_v40, %v869_v34  ;;  %v944_v48 = vpop.f32.mrf.mxu0  ;;  %v1005_v2 = vadd.f32 %v4662_v46, %v977_v45  ;;  %v4166_v34 = vld [vmem:[#allocation6 + $0x70] ss:$8 sps:$4 sm:$0xff]   ;;  %v813_v40 = vadd.f32 %v4625_v3, %v4633_v13  ;;  %v4171_v45 = vld [vmem:[#allocation6 + $0x64] ss:$8 sps:$4 sm:$0xff]  }
 0x14f   :  { %v871_v47 = vpop.f32.mrf.mxu1 }
 0x150   :  { %v979_v50 = vmax.f32 %v797_v41, %v943_v44  ;;  %v945_v51 = vadd.f32 %v944_v48, %v871_v47  ;;  %v948_v55 = vpop.f32.mrf.mxu0  ;;  %v1006_v56 = vadd.f32 %v4660_v43, %v978_v42  ;;  %v1021_v35 = vmax.f32 %v1005_v2, 0.0  ;;  %v4174_v2 = vld [vmem:[#allocation6 + $0x54] ss:$8 sps:$4 sm:$0xff]  }
 0x151   :  { %v875_v53 = vpop.f32.mrf.mxu1 }
 0x152   :  { %v1007_v57 = vadd.f32 %v4662_v46, %v979_v50  ;;  %v980_v58 = vmax.f32 %v799_v49, %v945_v51  ;;  %v949_v59 = vadd.f32 %v948_v55, %v875_v53  ;;  %v950_v4 = vpop.f32.mrf.mxu0  ;;  %v1022_v29 = vmax.f32 %v1006_v56, 0.0  ;;  %v4169_v55 = vld [vmem:[#allocation6 + $0x60] ss:$8 sps:$4 sm:$0xff]  }
 0x153   :  { %v877_v60 = vpop.f32.mrf.mxu1  ;;  %v815_v56 = vadd.f32 %v4627_v6, %v4635_v14  ;;  %v819_v6 = vadd.f32 %v4631_v12, %v4643_v18  ;;  %v4177_v12 = vld [vmem:[#allocation6 + $0x44] ss:$8 sps:$4 sm:$0xff]   ;;  %v825_v18 = vadd.f32 %v4641_v17, %v4649_v21 }
 0x154   :  { %v4668_v22 = vadd.f32 %v4660_v43, %v980_v58  ;;  %v981_v26 = vmax.f32 %v803_v52, %v949_v59  ;;  %v1023_v5 = vmax.f32 %v1007_v57, 0.0  ;;  %v951_v8 = vadd.f32 %v950_v4, %v877_v60  ;;  %v952_v28 = vpop.f32.mrf.mxu0 }
 0x155   :  { %v879_v27 = vpop.f32.mrf.mxu1  ;;  %v1039_v49 = vpack.c.bf16 %v1022_v29, %v4430_v54  ;;  %v817_v57 = vadd.f32 %v4629_v9, %v4639_v16 }
 0x156   :  { %v1024_v30 = vmax.f32 %v4668_v22, 0.0  ;;  %v4674_v31 = vadd.f32 %v4662_v46, %v981_v26  ;;  %v953_v32 = vadd.f32 %v952_v28, %v879_v27  ;;  %v982_v36 = vmax.f32 %v805_v61, %v951_v8  ;;  %v954_v39 = vpop.f32.mrf.mxu0 }
 0x157   :  { %v881_v38 = vpop.f32.mrf.mxu1  ;;  %v1037_v41 = vpack.c.bf16 %v1023_v5, %v1021_v35  ;;  %v823_v28 = vadd.f32 %v4637_v15, %v4645_v19 }
 0x158   :  { %v1025_v37 = vmax.f32 %v4674_v31, 0.0  ;;  %v983_v63 = vmax.f32 %v807_v62, %v953_v32  ;;  %v955_v7 = vadd.f32 %v954_v39, %v881_v38  ;;  %v1038_v10 = vpack.c.bf16 %v1024_v30, %v1022_v29  ;;  %v958_v44 = vpop.f32.mrf.mxu0 }
 0x159   :  { %v885_v42 = vpop.f32.mrf.mxu1  ;;  %v1010_v50 = vadd.f32 %v4660_v43, %v982_v36 }
 0x15a   :  { %v1011_v1 = vadd.f32 %v4662_v46, %v983_v63  ;;  %v984_v11 = vmax.f32 %v809_v33, %v955_v7  ;;  %v959_v47 = vadd.f32 %v958_v44, %v885_v42  ;;  %1469 = vmatprep.mubr.bf16.mxu0 %v1038_v10  ;;  %v1040_v48 = vpack.c.bf16 %v1025_v37, %v1023_v5  ;;  %v960_v52 = vpop.f32.mrf.mxu0  ;;  %v4172_v33 = vld [vmem:[#allocation6 + $0x50] ss:$8 sps:$4 sm:$0xff]   ;;  %v4175_v44 = vld [vmem:[#allocation6 + $0x40] ss:$8 sps:$4 sm:$0xff]  }
 0x15b   :  { %v887_v51 = vpop.f32.mrf.mxu1  ;;  %1470 = vmatmul.mubr.bf16.vlgmr.msra.gmra.mxu0 %v1037_v41  ;;  %v1026_v62 = vmax.f32 %v1010_v50, 0.0 }
 0x15c   :  { %v4686_v53 = vadd.f32 %v4660_v43, %v984_v11  ;;  %v985_v3 = vmax.f32 %v813_v40, %v959_v47  ;;  %v961_v13 = vadd.f32 %v960_v52, %v887_v51  ;;  %1542 = vmatprep.mubr.bf16.mxu1 %v1040_v48  ;;  %1815 = vmatpush1.bf16.msra.mxu0 %v4166_v34  ;;  %v962_v59 = vpop.f32.mrf.mxu0  ;;  %v1027_v60 = vmax.f32 %v1011_v1, 0.0  ;;  %v4180_v48 = vld [vmem:[#allocation6 + $0x34] ss:$8 sps:$4 sm:$0xff]  }
 0x15d   :  { %v889_v58 = vpop.f32.mrf.mxu1  ;;  %1543 = vmatmul.mubr.bf16.vlgmr.msra.gmra.mxu1 %v1039_v49  ;;  %1816 = vmatprep.subr.bf16.mxu0 %v4171_v45  ;;  %v1043_v41 = vpack.c.bf16 %v1026_v62, %v1024_v30 }
 0x15e   :  { %v1028_v4 = vmax.f32 %v4686_v53, 0.0  ;;  %v1013_v26 = vadd.f32 %v4662_v46, %v985_v3  ;;  %v963_v61 = vadd.f32 %v962_v59, %v889_v58  ;;  %v986_v5 = vmax.f32 %v815_v56, %v961_v13  ;;  %v964_v27 = vpop.f32.mrf.mxu0  ;;  %v4178_v13 = vld [vmem:[#allocation6 + $0x30] ss:$8 sps:$4 sm:$0xff]   ;;  %v4183_v59 = vld [vmem:[#allocation6 + $0x24] ss:$8 sps:$4 sm:$0xff]  }
 0x15f   :  { %v891_v8 = vpop.f32.mrf.mxu1  ;;  %v1041_v39 = vpack.c.bf16 %v1027_v60, %v1025_v37  ;;  %v827_v37 = vadd.f32 %v4647_v20, %v4651_v23  ;;  %v829_v20 = vadd.f32 %v4653_v24, %v4655_v25  ;;  %v4181_v25 = vld [vmem:[#allocation6 + $0x20] ss:$8 sps:$4 sm:$0xff]  }
 0x160   :  { %v1029_v14 = vmax.f32 %v1013_v26, 0.0  ;;  %v987_v9 = vmax.f32 %v817_v57, %v963_v61  ;;  %v965_v16 = vadd.f32 %v964_v27, %v891_v8  ;;  %1817 = vmatpush1.bf16.msra.mxu0 %v4169_v55  ;;  %v968_v31 = vpop.f32.mrf.mxu0  ;;  %v1042_v32 = vpack.c.bf16 %v1028_v4, %v1026_v62  ;;  %v4186_v62 = vld [vmem:[#allocation6 + $0x14] ss:$8 sps:$4 sm:$0xff]   ;;  %v4184_v8 = vld [vmem:[#allocation6 + $0x10] ss:$8 sps:$4 sm:$0xff]  }
 0x161   :  { %v895_v29 = vpop.f32.mrf.mxu1  ;;  %1818 = vmatprep.subr.bf16.mxu0 %v4174_v2  ;;  %v1014_v63 = vadd.f32 %v4660_v43, %v986_v5  ;;  %v4189_v27 = vld [vmem:[#allocation6 + $0x4] ss:$8 sps:$4 sm:$0xff]  }
 0x162   :  { %v1015_v35 = vadd.f32 %v4662_v46, %v987_v9  ;;  %v988_v36 = vmax.f32 %v819_v6, %v965_v16  ;;  %v969_v38 = vadd.f32 %v968_v31, %v895_v29  ;;  %1479 = vmatprep.mubr.bf16.mxu0 %v1042_v32  ;;  %v970_v19 = vpop.f32.mrf.mxu0  ;;  %v1044_v7 = vpack.c.bf16 %v1029_v14, %v1027_v60  ;;  %v4192_v6 = vld [vmem:[#allocation6 + $0xf4] ss:$8 sps:$4 sm:$0xff]   ;;  %v4195_v9 = vld [vmem:[#allocation6 + $0xe4] ss:$8 sps:$4 sm:$0xff]   ;;  %v4193_v16 = vld [vmem:[#allocation6 + $0xe0] ss:$8 sps:$4 sm:$0xff]  }
 0x163   :  { %v897_v15 = vpop.f32.mrf.mxu1  ;;  %1480 = vmatmul.mubr.bf16.gmra.mxu0 %v1041_v39  ;;  %v1030_v49 = vmax.f32 %v1014_v63, 0.0  ;;  %v4196_v29 = vld [vmem:[#allocation6 + $0xd0] ss:$8 sps:$4 sm:$0xff]   ;;  %v4201_v31 = vld [vmem:[#allocation6 + $0xc4] ss:$8 sps:$4 sm:$0xff]  }
 0x164   :  { %v1016_v10 = vadd.f32 %v4660_v43, %v988_v36  ;;  %v989_v34 = vmax.f32 %v823_v28, %v969_v38  ;;  %v971_v40 = vadd.f32 %v970_v19, %v897_v15  ;;  %v1031_v42 = vmax.f32 %v1015_v35, 0.0  ;;  %1552 = vmatprep.mubr.bf16.mxu1 %v1044_v7  ;;  %v972_v21 = vpop.f32.mrf.mxu0  ;;  %1819 = vmatpush1.bf16.msra.mxu0 %v4172_v33  ;;  %v4198_v28 = vld [vmem:[#allocation6 + $0xd4] ss:$8 sps:$4 sm:$0xff]   ;;  %v4199_v32 = vld [vmem:[#allocation6 + $0xc0] ss:$8 sps:$4 sm:$0xff]  }
 0x165   :  { %v899_v17 = vpop.f32.mrf.mxu1  ;;  %1553 = vmatmul.mubr.bf16.gmra.mxu1 %v1043_v41  ;;  %1820 = vmatprep.subr.bf16.mxu0 %v4177_v12  ;;  %v1047_v24 = vpack.c.bf16 %v1030_v49, %v1028_v4  ;;  %v4187_v4 = vld [vmem:[#allocation6] ss:$8 sps:$4 sm:$0xff]   ;;  %v4204_v33 = vld [vmem:[#allocation6 + $0xb4] ss:$8 sps:$4 sm:$0xff]   ;;  %v4202_v35 = vld [vmem:[#allocation6 + $0xb0] ss:$8 sps:$4 sm:$0xff]  }
 0x166   :  { %v1032_v45 = vmax.f32 %v1016_v10, 0.0  ;;  %v1017_v1 = vadd.f32 %v4662_v46, %v989_v34  ;;  %v990_v11 = vmax.f32 %v825_v18, %v971_v40  ;;  %v973_v47 = vadd.f32 %v972_v21, %v899_v17  ;;  %v974_v30 = vpop.f32.mrf.mxu0  ;;  %v4207_v36 = vld [vmem:[#allocation6 + $0xa4] ss:$8 sps:$4 sm:$0xff]   ;;  %v4205_v38 = vld [vmem:[#allocation6 + $0xa0] ss:$8 sps:$4 sm:$0xff]   ;;  %v4214_v15 = vld [vmem:[%s5083_s7 + $0x38] sm:$0xff]  }
 0x167   :  { %v901_v22 = vpop.f32.mrf.mxu1  ;;  %v1045_v3 = vpack.c.bf16 %v1031_v42, %v1029_v14  ;;  %v4190_v14 = vld [vmem:[#allocation6 + $0xf0] ss:$8 sps:$4 sm:$0xff]   ;;  %v4210_v39 = vld [vmem:[#allocation6 + $0x94] ss:$8 sps:$4 sm:$0xff]   ;;  %v4213_v18 = vld [vmem:[#allocation6 + $0x84] ss:$8 sps:$4 sm:$0xff]   ;;  %3742 = vmatprep.subr.bf16.mxu1 %v4214_v15 }
 0x168   :  { %v1033_v23 = vmax.f32 %v1017_v1, 0.0  ;;  %v991_v50 = vmax.f32 %v827_v37, %v973_v47  ;;  %v975_v51 = vadd.f32 %v974_v30, %v901_v22  ;;  %v1046_v52 = vpack.c.bf16 %v1032_v45, %v1030_v49  ;;  %1821 = vmatpush1.bf16.msra.mxu0 %v4175_v44  ;;  %v4208_v12 = vld [vmem:[#allocation6 + $0x90] ss:$8 sps:$4 sm:$0xff]   ;;  %v4211_v63 = vld [vmem:[#allocation6 + $0x80] ss:$8 sps:$4 sm:$0xff]   ;;  %3743 = vmatpush3.bf16.msra.mxu1 %v4214_v15 }
 0x169   :  { %v1018_v55 = vadd.f32 %v4660_v43, %v990_v11  ;;  %1822 = vmatprep.subr.bf16.mxu0 %v4180_v48  ;;  %v4215_v19 = vld [vmem:[%s5083_s7 + $0x30] sm:$0xff]   ;;  %v4216_v7 = vld [vmem:[%s5083_s7 + $0x28] sm:$0xff]   ;;  %v4731_v21 = vld [vmem:[%s5080_s4] ss:$0 sm:$0xff] }
 0x16a   :  { %v1019_v56 = vadd.f32 %v4662_v46, %v991_v50  ;;  %v992_v57 = vmax.f32 %v829_v20, %v975_v51  ;;  %v1048_v58 = vpack.c.bf16 %v1033_v23, %v1031_v42  ;;  %1489 = vmatprep.mubr.bf16.mxu0 %v1046_v52  ;;  %3744 = vmatprep.subr.bf16.mxu1 %v4215_v19 }
 0x16b   :  { %1490 = vmatmul.mubr.bf16.gmra.mxu0 %v1045_v3  ;;  %v1034_v26 = vmax.f32 %v1018_v55, 0.0 }
 0x16c   :  { %v1035_v2 = vmax.f32 %v1019_v56, 0.0  ;;  %v1020_v60 = vadd.f32 %v4660_v43, %v992_v57  ;;  %1562 = vmatprep.mubr.bf16.mxu1 %v1048_v58  ;;  %1823 = vmatpush1.bf16.msra.mxu0 %v4178_v13 }
 0x16d   :  { %1563 = vmatmul.mubr.bf16.gmra.mxu1 %v1047_v24  ;;  %1824 = vmatprep.subr.bf16.mxu0 %v4183_v59  ;;  %v1051_v53 = vpack.c.bf16 %v1034_v26, %v1032_v45 }
 0x16e   :  { %v1036_v61 = vmax.f32 %v1020_v60, 0.0  ;;  %v1052_v46 = vpack.c.bf16 %v4430_v54, %v1035_v2  ;;  %v1049_v43 = vpack.c.bf16 %v1035_v2, %v1033_v23  ;;  %3745 = vmatpush3.bf16.msra.mxu1 %v4215_v19 }
 0x16f   :  { %3746 = vmatprep.subr.bf16.mxu1 %v4216_v7 }
 0x170   :  { %1572 = vmatprep.mubr.bf16.mxu1 %v1052_v46  ;;  %v1050_v5 = vpack.c.bf16 %v1036_v61, %v1034_v26  ;;  %1825 = vmatpush1.bf16.msra.mxu0 %v4181_v25 }
 0x171   :  { %1826 = vmatprep.subr.bf16.mxu0 %v4186_v62 }
 0x172   :  { %1499 = vmatprep.mubr.bf16.mxu0 %v1050_v5  ;;  %3747 = vmatpush3.bf16.msra.mxu1 %v4216_v7 }
 0x173   :  { %1500 = vmatmul.mubr.bf16.gmra.mxu0 %v1049_v43 }
 0x174   :  { %1827 = vmatpush1.bf16.msra.mxu0 %v4184_v8 }
 0x175   :  { %1573 = vmatmul.mubr.bf16.gmra.mxu1 %v1051_v53  ;;  %1828 = vmatprep.subr.bf16.mxu0 %v4189_v27 }
 0x178   :  { %1829 = vmatpush1.bf16.msra.mxu0 %v4187_v4 }
 0x179   :  { %1830 = vmatprep.subr.bf16.mxu0 %v4192_v6 }
 0x17c   :  { %1831 = vmatpush2.bf16.msra.mxu0 %v4190_v14 }
 0x17d   :  { %1832 = vmatprep.subr.bf16.mxu0 %v4195_v9 }
 0x180   :  { %1833 = vmatpush2.bf16.msra.mxu0 %v4193_v16 }
 0x181   :  { %1834 = vmatprep.subr.bf16.mxu0 %v4198_v28 }
 0x184   :  { %1835 = vmatpush2.bf16.msra.mxu0 %v4196_v29 }
 0x185   :  { %1836 = vmatprep.subr.bf16.mxu0 %v4201_v31 }
 0x188   :  { %1837 = vmatpush2.bf16.msra.mxu0 %v4199_v32 }
 0x189   :  { %1838 = vmatprep.subr.bf16.mxu0 %v4204_v33 }
 0x18c   :  { %1839 = vmatpush2.bf16.msra.mxu0 %v4202_v35 }
 0x18d   :  { %1840 = vmatprep.subr.bf16.mxu0 %v4207_v36 }
 0x190   :  { %1841 = vmatpush2.bf16.msra.mxu0 %v4205_v38 }
 0x191   :  { %1842 = vmatprep.subr.bf16.mxu0 %v4210_v39 }
 0x194   :  { %1843 = vmatpush2.bf16.msra.mxu0 %v4208_v12 }
 0x195   :  { %1844 = vmatprep.subr.bf16.mxu0 %v4213_v18 }
 0x198   :  { %1845 = vmatpush2.bf16.msra.mxu0 %v4211_v63 }
 0x199   :  { %3814 = vmatprep.subr.bf16.mxu0 %v4430_v54 }
 0x21b   :  { %v1471_v10 = vpop.f32.mrf.mxu0 }
 0x21d   :  { %v1473_v34 = vpop.f32.mrf.mxu0  ;;  %v1544_v40 = vpop.f32.mrf.mxu1 }
 0x21e   :  { %v1545_v42 = vadd.f32 %v1544_v40, %v1471_v10 }
 0x21f   :  { %v1475_v41 = vpop.f32.mrf.mxu0  ;;  %v1546_v37 = vpop.f32.mrf.mxu1 }
 0x220   :  { %v1547_v17 = vadd.f32 %v1546_v37, %v1473_v34 }
 0x221   :  { %v1477_v44 = vpop.f32.mrf.mxu0  ;;  %v1548_v45 = vpop.f32.mrf.mxu1 }
 0x222   :  { %v1583_v1 = vmax.f32 %v1545_v42, %v1547_v17  ;;  %v1549_v48 = vadd.f32 %v1548_v45, %v1475_v41 }
 0x223   :  { %v1550_v11 = vpop.f32.mrf.mxu1  ;;  %v1481_v49 = vpop.f32.mrf.mxu0 }
 0x224   :  { %v1598_v47 = vadd.f32 %v4731_v21, %v1583_v1  ;;  %v1551_v22 = vadd.f32 %v1550_v11, %v1477_v44 }
 0x225   :  { %v1483_v23 = vpop.f32.mrf.mxu0  ;;  %v1554_v50 = vpop.f32.mrf.mxu1 }
 0x226   :  { %v1606_v30 = vmax.f32 %v1598_v47, 0.0  ;;  %v1584_v20 = vmax.f32 %v1549_v48, %v1551_v22  ;;  %v1555_v55 = vadd.f32 %v1554_v50, %v1481_v49 }
 0x227   :  { %v1485_v52 = vpop.f32.mrf.mxu0  ;;  %v1556_v3 = vpop.f32.mrf.mxu1 }
 0x228   :  { %v1599_v51 = vadd.f32 %v4731_v21, %v1584_v20  ;;  %v1615_v13 = vpack.c.bf16 %v1606_v30, %v4430_v54  ;;  %v1557_v56 = vadd.f32 %v1556_v3, %v1483_v23  ;;  %v4220_v3 = vld [vmem:[%s5083_s7 + $0x8] sm:$0xff]  }
 0x229   :  { %v1487_v58 = vpop.f32.mrf.mxu0  ;;  %v1558_v59 = vpop.f32.mrf.mxu1 }
 0x22a   :  { %v1607_v57 = vmax.f32 %v1599_v51, 0.0  ;;  %1846 = vmatprep.mubr.bf16.mxu0 %v1615_v13  ;;  %v1585_v2 = vmax.f32 %v1555_v55, %v1557_v56  ;;  %v1559_v61 = vadd.f32 %v1558_v59, %v1485_v52  ;;  %v4217_v51 = vld [vmem:[%s5083_s7 + $0x20] sm:$0xff]   ;;  %v4218_v52 = vld [vmem:[%s5083_s7 + $0x18] sm:$0xff]   ;;  %v4761_v55 = vld [vmem:[%s5084_s8 + $0x8] sm:$0xff]  }
 0x22b   :  { %v1491_v24 = vpop.f32.mrf.mxu0  ;;  %v1560_v25 = vpop.f32.mrf.mxu1  ;;  %3748 = vmatprep.subr.bf16.mxu1 %v4217_v51  ;;  %v4221_v13 = vld [vmem:[%s5083_s7] sm:$0xff]  }
 0x22c   :  { %v1614_v60 = vpack.c.bf16 %v1607_v57, %v1606_v30  ;;  %v1600_v26 = vadd.f32 %v4731_v21, %v1585_v2  ;;  %v1561_v46 = vadd.f32 %v1560_v25, %v1487_v58  ;;  %3749 = vmatpush3.bf16.msra.mxu1 %v4217_v51  ;;  %v4768_v56 = vld [vmem:[%s5084_s8] sm:$0xff]  }
 0x22d   :  { %v1493_v62 = vpop.f32.mrf.mxu0  ;;  %v1564_v5 = vpop.f32.mrf.mxu1  ;;  %3750 = vmatprep.subr.bf16.mxu1 %v4218_v52  ;;  %v3618_v2 = vld [vmem:[%s5082_s6] ss:$0 sm:$0xff] }
 0x22e   :  { %1847 = vmatmul.mubr.bf16.vlgmr.msra.gmra.mxu0 %v1614_v60  ;;  %v1608_v8 = vmax.f32 %v1600_v26, 0.0  ;;  %v1586_v43 = vmax.f32 %v1559_v61, %v1561_v46  ;;  %v1565_v6 = vadd.f32 %v1564_v5, %v1491_v24 }
 0x22f   :  { %v1495_v27 = vpop.f32.mrf.mxu0  ;;  %v1566_v53 = vpop.f32.mrf.mxu1  ;;  %3815 = vmatpush3.bf16.msra.mxu0 %v4761_v55 }
 0x230   :  { %v1601_v4 = vadd.f32 %v4731_v21, %v1586_v43  ;;  %v1567_v14 = vadd.f32 %v1566_v53, %v1493_v62  ;;  %v1617_v9 = vpack.c.bf16 %v1608_v8, %v1607_v57  ;;  %3751 = vmatpush3.bf16.msra.mxu1 %v4218_v52  ;;  %3816 = vmatprep.subr.bf16.mxu0 %v4430_v54 }
 0x231   :  { %v1497_v16 = vpop.f32.mrf.mxu0  ;;  %v1568_v28 = vpop.f32.mrf.mxu1 }
 0x232   :  { %v1609_v29 = vmax.f32 %v1601_v4, 0.0  ;;  %v1587_v31 = vmax.f32 %v1565_v6, %v1567_v14  ;;  %1856 = vmatprep.mubr.bf16.mxu0 %v1617_v9  ;;  %v1569_v36 = vadd.f32 %v1568_v28, %v1495_v27 }
 0x233   :  { %v1501_v32 = vpop.f32.mrf.mxu0  ;;  %v1570_v33 = vpop.f32.mrf.mxu1  ;;  %3817 = vmatpush3.bf16.msra.mxu0 %v4768_v56 }
 0x234   :  { %v1602_v35 = vadd.f32 %v4731_v21, %v1587_v31  ;;  %v1571_v38 = vadd.f32 %v1570_v33, %v1497_v16  ;;  %v1616_v39 = vpack.c.bf16 %v1609_v29, %v1608_v8 }
 0x235   :  { %v1503_v12 = vpop.f32.mrf.mxu0  ;;  %v1574_v18 = vpop.f32.mrf.mxu1 }
 0x236   :  { %v1610_v63 = vmax.f32 %v1602_v35, 0.0  ;;  %v1588_v15 = vmax.f32 %v1569_v36, %v1571_v38  ;;  %1857 = vmatmul.mubr.bf16.gmra.mxu0 %v1616_v39  ;;  %v1575_v34 = vadd.f32 %v1574_v18, %v1501_v32 }
 0x237   :  { %v1505_v19 = vpop.f32.mrf.mxu0  ;;  %v1576_v7 = vpop.f32.mrf.mxu1 }
 0x238   :  { %v1603_v10 = vadd.f32 %v4731_v21, %v1588_v15  ;;  %v1577_v40 = vadd.f32 %v1576_v7, %v1503_v12  ;;  %v1619_v41 = vpack.c.bf16 %v1610_v63, %v1609_v29 }
 0x239   :  { %v1578_v37 = vpop.f32.mrf.mxu1  ;;  %v1507_v44 = vpop.f32.mrf.mxu0 }
 0x23a   :  { %v1611_v42 = vmax.f32 %v1603_v10, 0.0  ;;  %v1589_v17 = vmax.f32 %v1575_v34, %v1577_v40  ;;  %1866 = vmatprep.mubr.bf16.mxu0 %v1619_v41  ;;  %v1579_v11 = vadd.f32 %v1578_v37, %v1505_v19 }
 0x23b   :  { %v1580_v45 = vpop.f32.mrf.mxu1 }
 0x23c   :  { %v1604_v1 = vadd.f32 %v4731_v21, %v1589_v17  ;;  %v1581_v47 = vadd.f32 %v1580_v45, %v1507_v44  ;;  %v1618_v48 = vpack.c.bf16 %v1611_v42, %v1610_v63 }
 0x23e   :  { %v1612_v49 = vmax.f32 %v1604_v1, 0.0  ;;  %v1590_v22 = vmax.f32 %v1579_v11, %v1581_v47  ;;  %1867 = vmatmul.mubr.bf16.gmra.mxu0 %v1618_v48  ;;  %v3619_v1 = vld [vmem:[%s5085_s9] ss:$0 sm:$0xff]  ;;  %s4432_s9 = smov 64  }
 0x240   :  { %v1605_v30 = vadd.f32 %v4731_v21, %v1590_v22  ;;  %v1621_v20 = vpack.c.bf16 %v1612_v49, %v1611_v42  ;;  %v4219_v21 = vld [vmem:[%s5083_s7 + $0x10] sm:$0xff]  }
 0x241   :  { %3752 = vmatprep.subr.bf16.mxu1 %v4219_v21 }
 0x242   :  { %v1613_v23 = vmax.f32 %v1605_v30, 0.0  ;;  %1876 = vmatprep.mubr.bf16.mxu0 %v1621_v20  ;;  %3753 = vmatpush3.bf16.msra.mxu1 %v4219_v21 }
 0x243   :  { %3754 = vmatprep.subr.bf16.mxu1 %v4220_v3 }
 0x244   :  { %v1620_v50 = vpack.c.bf16 %v1613_v23, %v1612_v49 }
 0x246   :  { %1877 = vmatmul.mubr.bf16.gmra.mxu0 %v1620_v50  ;;  %3755 = vmatpush3.bf16.msra.mxu1 %v4220_v3 }
 0x247   :  { %3756 = vmatprep.subr.bf16.mxu1 %v4221_v13  ;;  %3818 = vmatprep.mubr.msk.bf16.mxu0 %vm4431_vm0, %v4430_v54 }
 0x24a   :  { %3757 = vmatpush3.bf16.msra.mxu1 %v4221_v13 }
 0x24b   :  { %3766 = vmatprep.subr.bf16.mxu1 %v4430_v54 }
 0x2ee   :  { %v1848_v57 = vpop.f32.mrf.mxu0 }
 0x2f0   :  { %v1850_v58 = vpop.f32.mrf.mxu0 }
 0x2f1   :  { %v1887_v59 = vmax.f32 %v1848_v57, %v1850_v58 }
 0x2f2   :  { %v1852_v60 = vpop.f32.mrf.mxu0 }
 0x2f3   :  { %v1902_v25 = vadd.f32 %v3618_v2, %v1887_v59 }
 0x2f4   :  { %v1854_v24 = vpop.f32.mrf.mxu0 }
 0x2f5   :  { %v1888_v26 = vmax.f32 %v1852_v60, %v1854_v24  ;;  %v1910_v62 = vmax.f32 %v1902_v25, 0.0 }
 0x2f6   :  { %v1858_v46 = vpop.f32.mrf.mxu0 }
 0x2f7   :  { %v1903_v61 = vadd.f32 %v3618_v2, %v1888_v26 }
 0x2f8   :  { %v1860_v8 = vpop.f32.mrf.mxu0 }
 0x2f9   :  { %v1911_v5 = vmax.f32 %v1903_v61, 0.0  ;;  %v1889_v43 = vmax.f32 %v1858_v46, %v1860_v8 }
 0x2fa   :  { %v1862_v27 = vpop.f32.mrf.mxu0 }
 0x2fb   :  { %v1939_v53 = vpack.c.bf16 %v1911_v5, %v1910_v62  ;;  %v1904_v6 = vadd.f32 %v3618_v2, %v1889_v43 }
 0x2fc   :  { %v1864_v4 = vpop.f32.mrf.mxu0 }
 0x2fd   :  { %3758 = vmatprep.mubr.bf16.mxu1 %v1939_v53  ;;  %v1890_v14 = vmax.f32 %v1862_v27, %v1864_v4  ;;  %v1912_v29 = vmax.f32 %v1904_v6, 0.0 }
 0x2fe   :  { %v1868_v9 = vpop.f32.mrf.mxu0 }
 0x2ff   :  { %v1905_v16 = vadd.f32 %v3618_v2, %v1890_v14 }
 0x300   :  { %v1870_v28 = vpop.f32.mrf.mxu0 }
 0x301   :  { %v1913_v31 = vmax.f32 %v1905_v16, 0.0  ;;  %v1891_v32 = vmax.f32 %v1868_v9, %v1870_v28 }
 0x302   :  { %v1872_v33 = vpop.f32.mrf.mxu0 }
 0x303   :  { %v1940_v35 = vpack.c.bf16 %v1913_v31, %v1912_v29  ;;  %v1906_v38 = vadd.f32 %v3618_v2, %v1891_v32 }
 0x304   :  { %v1874_v36 = vpop.f32.mrf.mxu0 }
 0x305   :  { %v1892_v39 = vmax.f32 %v1872_v33, %v1874_v36  ;;  %3759 = vmatmul.mubr.bf16.vlgmr.msra.gmra.mxu1 %v1940_v35  ;;  %v1914_v15 = vmax.f32 %v1906_v38, 0.0 }
 0x306   :  { %v1878_v12 = vpop.f32.mrf.mxu0  ;;  %3767 = vmatpush3.bf16.msra.mxu1 %v4761_v55 }
 0x307   :  { %v1907_v18 = vadd.f32 %v3618_v2, %v1892_v39  ;;  %3768 = vmatprep.subr.bf16.mxu1 %v4430_v54 }
 0x308   :  { %v1880_v63 = vpop.f32.mrf.mxu0 }
 0x309   :  { %v1915_v19 = vmax.f32 %v1907_v18, 0.0  ;;  %v1893_v7 = vmax.f32 %v1878_v12, %v1880_v63 }
 0x30a   :  { %v1882_v10 = vpop.f32.mrf.mxu0  ;;  %3769 = vmatpush3.bf16.msra.mxu1 %v4768_v56 }
 0x30b   :  { %v1941_v34 = vpack.c.bf16 %v1915_v19, %v1914_v15  ;;  %3774 = vmatprep.subr.bf16.mxu1 %v4430_v54  ;;  %v1908_v41 = vadd.f32 %v3618_v2, %v1893_v7 }
 0x30c   :  { %v1884_v40 = vpop.f32.mrf.mxu0 }
 0x30d   :  { %v1894_v37 = vmax.f32 %v1882_v10, %v1884_v40  ;;  %3762 = vmatprep.mubr.bf16.mxu1 %v1941_v34  ;;  %v1916_v17 = vmax.f32 %v1908_v41, 0.0 }
 0x30f   :  { %v1909_v42 = vadd.f32 %v3618_v2, %v1894_v37 }
 0x311   :  { %v1917_v44 = vmax.f32 %v1909_v42, 0.0 }
 0x313   :  { %v1942_v45 = vpack.c.bf16 %v1917_v44, %v1916_v17 }
 0x315   :  { %3763 = vmatmul.mubr.bf16.gmra.mxu1 %v1942_v45 }
 0x316   :  { %3770 = vmatprep.mubr.msk.bf16.mxu1 %vm4431_vm0, %v4430_v54 }
 0x31d   :  { %3771 = vmatmul.mubr.bf16.vlgmr.msra.gmra.mxu1 %v4429_v0 }
 0x31e   :  { %3775 = vmatpush3.bf16.msra.mxu1 %v4761_v55  ;;  %3778 = vmatprep.mubr.msk.bf16.mxu1 %vm4431_vm0, %v4430_v54 }
 0x31f   :  { %3776 = vmatprep.subr.bf16.mxu1 %v4430_v54 }
 0x322   :  { %3777 = vmatpush3.bf16.msra.mxu1 %v4768_v56 }
 0x323   :  { %3782 = vmatprep.subr.bf16.mxu1 %v4430_v54 }
 0x3c5   :  { %v3760_v11 = vpop.f32.mrf.mxu1 }
 0x3c6   :  { %v4792_v47 = vadd.f32 %v3760_v11, %v3619_v1 }
 0x3c7   :  { %v2031_v48 = vpop.f32.mrf.mxu1 }
 0x3c8   :  { %v2032_v57 = vadd.f32 %v3619_v1, %v2031_v48 }
 0x3c9   :  { %v3761_v49 = vpop.f32.mrf.mxu1 }
 0x3ca   :  { %v4794_v22 = vadd.f32 %v3761_v49, %v3619_v1 }
 0x3cb   :  { %v2034_v30 = vpop.f32.mrf.mxu1 }
 0x3cc   :  { %v2035_v20 = vadd.f32 %v3619_v1, %v2034_v30 }
 0x3d5   :  { %v3764_v23 = vpop.f32.mrf.mxu1 }
 0x3d6   :  { %v4796_v50 = vadd.f32 %v3764_v23, %v3619_v1 }
 0x3d7   :  { %v2047_v51 = vpop.f32.mrf.mxu1 }
 0x3d8   :  { %v4798_v52 = vadd.f32 %v3619_v1, %v2047_v51 }
 0x3d9   :  { %v3765_v21 = vpop.f32.mrf.mxu1 }
 0x3da   :  { %v4800_v3 = vadd.f32 %v3765_v21, %v3619_v1 }
 0x3db   :  { %v2050_v13 = vpop.f32.mrf.mxu1 }
 0x3dc   :  { %v4802_v58 = vadd.f32 %v3619_v1, %v2050_v13 }
 0x3dd   :  { %v2112_v59 = vpop.f32.mrf.mxu1 }
 0x3de   :  { %v2118_v2 = vadd.f32 %v2112_v59, %v2032_v57 }
 0x3df   :  { %v3772_v60 = vpop.f32.mrf.mxu1 }
 0x3e0   :  { %4230 = vtanh.f32 %v2118_v2  ;;  %v3630_v61 = vmul.f32 -1.442695, %v2118_v2 }
 0x3e1   :  { %v2115_v24 = vpop.f32.mrf.mxu1 }
 0x3e2   :  { %4232 = vpow2.f32 %v3630_v61 }
 0x3e3   :  { %v3773_v25 = vpop.f32.mrf.mxu1 }
 0x3ed   :  { %v4231_v26 = vpop.eup %4230 }
 0x3ee   :  { %2128 = vrot.lane.b32.xlu0 %v4231_v26, %s4432_s9 }
 0x3ef   :  { %v4233_v46 = vpop.eup %4232 }
 0x3f0   :  { %v2122_v62 = vadd.f32 1.0, %v4233_v46 }
 0x3f2   :  { %4234 = vrcp.f32 %v2122_v62 }
 0x3ff   :  { %v4235_v5 = vpop.eup %4234 }
 0x400   :  { %v2126_v27 = vmul.f32 0.0, %v4235_v5 }
 0x460   :  { %v2129_v8 = vpop.permute.xlu0 %2128 }
 0x461   :  { %v2131_v43 = vmul.f32 %v4235_v5, %v2129_v8 }
 0x463   :  { %2133 = vrot.lane.b32.xlu0 %v2131_v43, %s4433_s1 }
 0x4d5   :  { %v2134_v53 = vpop.permute.xlu0 %2133 }
 0x4d6   :  { %v2136_v4 = vadd.f32 %v2134_v53, %v2126_v27 }
 0x4d8   :  { %4236 = vtanh.f32 %v2136_v4 }
 0x4e5   :  { %v4237_v6 = vpop.eup %4236 }
 0x4e6   :  { %2139 = vrot.lane.b32.xlu1 %v4237_v6, %s4432_s9 }
 0x558   :  { %v2140_v14 = vpop.permute.xlu1 %2139 }
 0x559   :  { %v4807_v9 = vmul.f32 %v4235_v5, %v2140_v14 }
 0x55b   :  { %v2143_v16 = vpack.c.bf16 %v4807_v9, %v4807_v9 }
 0x55d   :  { %2145 = vrot.lane.b32.xlu1 %v2143_v16, %s4433_s1 }
 0x5cf   :  { %v2146_v28 = vpop.permute.xlu1 %2145 }
 0x5d0   :  { %3779 = vmatmul.mubr.msk.bf16.vlgmr.msra.gmra.mxu1 %vm2074_vm1, %v2146_v28 }
 0x5d1   :  { %3783 = vmatpush3.bf16.msra.mxu1 %v4761_v55  ;;  %3786 = vmatprep.mubr.msk.bf16.mxu1 %vm4431_vm0, %v4430_v54 }
 0x5d2   :  { %3784 = vmatprep.subr.bf16.mxu1 %v4430_v54 }
 0x5d5   :  { %3785 = vmatpush3.bf16.msra.mxu1 %v4768_v56 }
 0x5d6   :  { %3790 = vmatprep.subr.bf16.mxu1 %v4430_v54 }
 0x690   :  { %v2184_v29 = vpop.f32.mrf.mxu1 }
 0x691   :  { %v2190_v31 = vadd.f32 %v2184_v29, %v2035_v20 }
 0x692   :  { %v3780_v32 = vpop.f32.mrf.mxu1 }
 0x693   :  { %4238 = vtanh.f32 %v2190_v31  ;;  %v3632_v38 = vmul.f32 -1.442695, %v2190_v31 }
 0x694   :  { %v2187_v33 = vpop.f32.mrf.mxu1 }
 0x695   :  { %4240 = vpow2.f32 %v3632_v38 }
 0x696   :  { %v3781_v35 = vpop.f32.mrf.mxu1 }
 0x6a0   :  { %v4239_v36 = vpop.eup %4238 }
 0x6a1   :  { %2200 = vrot.lane.b32.xlu0 %v4239_v36, %s4432_s9 }
 0x6a2   :  { %v4241_v39 = vpop.eup %4240 }
 0x6a3   :  { %v2194_v12 = vadd.f32 1.0, %v4241_v39 }
 0x6a5   :  { %4242 = vrcp.f32 %v2194_v12 }
 0x6b2   :  { %v4243_v18 = vpop.eup %4242 }
 0x6b3   :  { %v2198_v19 = vmul.f32 %v4243_v18, %v2136_v4 }
 0x713   :  { %v2201_v63 = vpop.permute.xlu0 %2200 }
 0x714   :  { %v2203_v15 = vmul.f32 %v4243_v18, %v2201_v63 }
 0x716   :  { %2205 = vrot.lane.b32.xlu1 %v2203_v15, %s4433_s1 }
 0x788   :  { %v2206_v7 = vpop.permute.xlu1 %2205 }
 0x789   :  { %v2208_v10 = vadd.f32 %v2206_v7, %v2198_v19 }
 0x78b   :  { %4244 = vtanh.f32 %v2208_v10 }
 0x798   :  { %v4245_v34 = vpop.eup %4244 }
 0x799   :  { %2211 = vrot.lane.b32.xlu0 %v4245_v34, %s4432_s9 }
 0x80b   :  { %v2212_v40 = vpop.permute.xlu0 %2211 }
 0x80c   :  { %v4822_v41 = vmul.f32 %v4243_v18, %v2212_v40 }
 0x80e   :  { %v2215_v37 = vpack.c.bf16 %v4822_v41, %v4822_v41 }
 0x810   :  { %2217 = vrot.lane.b32.xlu1 %v2215_v37, %s4433_s1 }
 0x882   :  { %v2218_v42 = vpop.permute.xlu1 %2217 }
 0x883   :  { %3787 = vmatmul.mubr.msk.bf16.vlgmr.msra.gmra.mxu1 %vm2074_vm1, %v2218_v42 }
 0x884   :  { %3791 = vmatpush3.bf16.msra.mxu1 %v4761_v55  ;;  %3794 = vmatprep.mubr.msk.bf16.mxu1 %vm4431_vm0, %v4430_v54 }
 0x885   :  { %3792 = vmatprep.subr.bf16.mxu1 %v4430_v54 }
 0x888   :  { %3793 = vmatpush3.bf16.msra.mxu1 %v4768_v56 }
 0x889   :  { %3798 = vmatprep.subr.bf16.mxu1 %v4430_v54 }
 0x943   :  { %v2256_v17 = vpop.f32.mrf.mxu1 }
 0x944   :  { %v2262_v44 = vadd.f32 %v2256_v17, %v4792_v47 }
 0x945   :  { %v3788_v45 = vpop.f32.mrf.mxu1 }
 0x946   :  { %4246 = vtanh.f32 %v2262_v44  ;;  %v3634_v49 = vmul.f32 -1.442695, %v2262_v44 }
 0x947   :  { %v2259_v1 = vpop.f32.mrf.mxu1 }
 0x948   :  { %4248 = vpow2.f32 %v3634_v49 }
 0x949   :  { %v3789_v11 = vpop.f32.mrf.mxu1 }
 0x953   :  { %v4247_v48 = vpop.eup %4246 }
 0x954   :  { %2272 = vrot.lane.b32.xlu0 %v4247_v48, %s4432_s9 }
 0x955   :  { %v4249_v30 = vpop.eup %4248 }
 0x956   :  { %v2266_v20 = vadd.f32 1.0, %v4249_v30 }
 0x958   :  { %4250 = vrcp.f32 %v2266_v20 }
 0x965   :  { %v4251_v23 = vpop.eup %4250 }
 0x966   :  { %v2270_v13 = vmul.f32 %v4251_v23, %v2208_v10 }
 0x9c6   :  { %v2273_v51 = vpop.permute.xlu0 %2272 }
 0x9c7   :  { %v2275_v21 = vmul.f32 %v4251_v23, %v2273_v51 }
 0x9c9   :  { %2277 = vrot.lane.b32.xlu1 %v2275_v21, %s4433_s1 }
 0xa3b   :  { %v2278_v57 = vpop.permute.xlu1 %2277 }
 0xa3c   :  { %v2280_v47 = vadd.f32 %v2278_v57, %v2270_v13 }
 0xa3e   :  { %4252 = vtanh.f32 %v2280_v47 }
 0xa4b   :  { %v4253_v59 = vpop.eup %4252 }
 0xa4c   :  { %2283 = vrot.lane.b32.xlu0 %v4253_v59, %s4432_s9 }
 0xabe   :  { %v2284_v2 = vpop.permute.xlu0 %2283 }
 0xabf   :  { %v4838_v60 = vmul.f32 %v4251_v23, %v2284_v2 }
 0xac1   :  { %v2287_v24 = vpack.c.bf16 %v4838_v60, %v4838_v60 }
 0xac3   :  { %2289 = vrot.lane.b32.xlu1 %v2287_v24, %s4433_s1 }
 0xb35   :  { %v2290_v25 = vpop.permute.xlu1 %2289 }
 0xb36   :  { %3795 = vmatmul.mubr.msk.bf16.vlgmr.msra.gmra.mxu1 %vm2074_vm1, %v2290_v25 }
 0xb37   :  { %3799 = vmatpush3.bf16.msra.mxu1 %v4761_v55  ;;  %3802 = vmatprep.mubr.msk.bf16.mxu1 %vm4431_vm0, %v4430_v54 }
 0xb38   :  { %3800 = vmatprep.subr.bf16.mxu1 %v4430_v54 }
 0xb3b   :  { %3801 = vmatpush3.bf16.msra.mxu1 %v4768_v56 }
 0xb3c   :  { %3806 = vmatprep.subr.bf16.mxu1 %v4430_v54 }
 0xbf6   :  { %v2328_v26 = vpop.f32.mrf.mxu1 }
 0xbf7   :  { %v2334_v61 = vadd.f32 %v2328_v26, %v4794_v22 }
 0xbf8   :  { %v3796_v46 = vpop.f32.mrf.mxu1 }
 0xbf9   :  { %4254 = vtanh.f32 %v2334_v61  ;;  %v3636_v43 = vmul.f32 -1.442695, %v2334_v61 }
 0xbfa   :  { %v2331_v62 = vpop.f32.mrf.mxu1 }
 0xbfb   :  { %4256 = vpow2.f32 %v3636_v43 }
 0xbfc   :  { %v3797_v5 = vpop.f32.mrf.mxu1 }
 0xc06   :  { %v4255_v8 = vpop.eup %4254 }
 0xc07   :  { %2344 = vrot.lane.b32.xlu0 %v4255_v8, %s4432_s9 }
 0xc08   :  { %v4257_v27 = vpop.eup %4256 }
 0xc09   :  { %v2338_v53 = vadd.f32 1.0, %v4257_v27 }
 0xc0b   :  { %4258 = vrcp.f32 %v2338_v53 }
 0xc18   :  { %v4259_v4 = vpop.eup %4258 }
 0xc19   :  { %v2342_v16 = vmul.f32 %v4259_v4, %v2280_v47 }
 0xc79   :  { %v2345_v6 = vpop.permute.xlu0 %2344 }
 0xc7a   :  { %v2347_v14 = vmul.f32 %v4259_v4, %v2345_v6 }
 0xc7c   :  { %2349 = vrot.lane.b32.xlu1 %v2347_v14, %s4433_s1 }
 0xcee   :  { %v2350_v28 = vpop.permute.xlu1 %2349 }
 0xcef   :  { %v2352_v22 = vadd.f32 %v2350_v28, %v2342_v16 }
 0xcf1   :  { %4260 = vtanh.f32 %v2352_v22 }
 0xcfe   :  { %v4261_v29 = vpop.eup %4260 }
 0xcff   :  { %2355 = vrot.lane.b32.xlu0 %v4261_v29, %s4432_s9 }
 0xd71   :  { %v2356_v31 = vpop.permute.xlu0 %2355 }
 0xd72   :  { %v4854_v32 = vmul.f32 %v4259_v4, %v2356_v31 }
 0xd74   :  { %v2359_v33 = vpack.c.bf16 %v4854_v32, %v4854_v32 }
 0xd76   :  { %2361 = vrot.lane.b32.xlu1 %v2359_v33, %s4433_s1  ;;  %v4224_v33 = vld [vmem:[%s5086_s10 + $0x8] sm:$0xff]  }
 0xd77   :  { %3830 = vmatprep.subr.bf16.mxu0 %v4224_v33 }
 0xde8   :  { %v2362_v35 = vpop.permute.xlu1 %2361 }
 0xde9   :  { %3803 = vmatmul.mubr.msk.bf16.vlgmr.msra.gmra.mxu1 %vm2074_vm1, %v2362_v35 }
 0xdea   :  { %3807 = vmatpush3.bf16.msra.mxu1 %v4761_v55  ;;  %3810 = vmatprep.mubr.msk.bf16.mxu1 %vm4431_vm0, %v4430_v54 }
 0xdeb   :  { %3808 = vmatprep.subr.bf16.mxu1 %v4430_v54 }
 0xdee   :  { %3809 = vmatpush3.bf16.msra.mxu1 %v4768_v56 }
 0xdef   :  { %3822 = vmatprep.subr.bf16.mxu1 %v4430_v54 }
 0xea9   :  { %v2400_v36 = vpop.f32.mrf.mxu1 }
 0xeaa   :  { %v2406_v38 = vadd.f32 %v2400_v36, %v4798_v52  ;;  %v2656_v36 = vpack.c.bf16 %v4822_v41, %v4807_v9  ;;  %v2657_v9 = vpack.c.bf16 %v4854_v32, %v4838_v60  ;;  %v4921_v41 = vld [vmem:[%s5087_s11 + $0x8] sm:$0xff]  }
 0xeab   :  { %v3804_v39 = vpop.f32.mrf.mxu1 }
 0xeac   :  { %4262 = vtanh.f32 %v2406_v38  ;;  %v3638_v15 = vmul.f32 -1.442695, %v2406_v38  ;;  %v4225_v38 = vld [vmem:[%s5086_s10] sm:$0xff]  }
 0xead   :  { %v2403_v12 = vpop.f32.mrf.mxu1 }
 0xeae   :  { %4264 = vpow2.f32 %v3638_v15 }
 0xeaf   :  { %v3805_v18 = vpop.f32.mrf.mxu1 }
 0xeb9   :  { %v4263_v63 = vpop.eup %4262 }
 0xeba   :  { %2416 = vrot.lane.b32.xlu0 %v4263_v63, %s4432_s9 }
 0xebb   :  { %v4265_v19 = vpop.eup %4264 }
 0xebc   :  { %v2410_v7 = vadd.f32 1.0, %v4265_v19  ;;  %v4928_v19 = vld [vmem:[%s5087_s11] sm:$0xff]  }
 0xebe   :  { %4266 = vrcp.f32 %v2410_v7 }
 0xecb   :  { %v4267_v10 = vpop.eup %4266 }
 0xecc   :  { %v2414_v37 = vmul.f32 %v4267_v10, %v2352_v22 }
 0xf2c   :  { %v2417_v34 = vpop.permute.xlu0 %2416 }
 0xf2d   :  { %v2419_v40 = vmul.f32 %v4267_v10, %v2417_v34 }
 0xf2f   :  { %2421 = vrot.lane.b32.xlu1 %v2419_v40, %s4433_s1  ;;  %v4953_v40 = vld [vmem:[%s5088_s12] ss:$0 sm:$0xff] }
 0xfa1   :  { %v2422_v42 = vpop.permute.xlu1 %2421 }
 0xfa2   :  { %v2424_v52 = vadd.f32 %v2422_v42, %v2414_v37 }
 0xfa4   :  { %4268 = vtanh.f32 %v2424_v52 }
 0xfb1   :  { %v4269_v17 = vpop.eup %4268 }
 0xfb2   :  { %2427 = vrot.lane.b32.xlu0 %v4269_v17, %s4432_s9 }
0x1024   :  { %v2428_v44 = vpop.permute.xlu0 %2427 }
0x1025   :  { %v4870_v45 = vmul.f32 %v4267_v10, %v2428_v44 }
0x1027   :  { %v2431_v1 = vpack.c.bf16 %v4870_v45, %v4870_v45 }
0x1029   :  { %2433 = vrot.lane.b32.xlu1 %v2431_v1, %s4433_s1 }
0x109b   :  { %v2434_v11 = vpop.permute.xlu1 %2433 }
0x109c   :  { %3811 = vmatmul.mubr.msk.bf16.vlgmr.msra.gmra.mxu1 %vm2074_vm1, %v2434_v11 }
0x109d   :  { %3823 = vmatpush3.bf16.msra.mxu1 %v4761_v55  ;;  %3826 = vmatprep.mubr.msk.bf16.mxu1 %vm4431_vm0, %v4430_v54 }
0x109e   :  { %3824 = vmatprep.subr.bf16.mxu1 %v4430_v54 }
0x10a1   :  { %3825 = vmatpush3.bf16.msra.mxu1 %v4768_v56 }
0x10a2   :  { %3842 = vmatprep.subr.bf16.mxu1 %v4430_v54 }
0x115c   :  { %v2472_v48 = vpop.f32.mrf.mxu1 }
0x115d   :  { %v2478_v49 = vadd.f32 %v2472_v48, %v4802_v58 }
0x115e   :  { %v3812_v30 = vpop.f32.mrf.mxu1 }
0x115f   :  { %4270 = vtanh.f32 %v2478_v49  ;;  %v3640_v55 = vmul.f32 -1.442695, %v2478_v49 }
0x1160   :  { %v2475_v20 = vpop.f32.mrf.mxu1 }
0x1161   :  { %4272 = vpow2.f32 %v3640_v55 }
0x1162   :  { %v3813_v23 = vpop.f32.mrf.mxu1 }
0x116c   :  { %v4271_v51 = vpop.eup %4270 }
0x116d   :  { %2488 = vrot.lane.b32.xlu0 %v4271_v51, %s4432_s9 }
0x116e   :  { %v4273_v21 = vpop.eup %4272 }
0x116f   :  { %v2482_v13 = vadd.f32 1.0, %v4273_v21 }
0x1171   :  { %4274 = vrcp.f32 %v2482_v13 }
0x117e   :  { %v4275_v57 = vpop.eup %4274 }
0x117f   :  { %v2486_v59 = vmul.f32 %v4275_v57, %v2424_v52 }
0x11df   :  { %v2489_v47 = vpop.permute.xlu0 %2488 }
0x11e0   :  { %v2491_v56 = vmul.f32 %v4275_v57, %v2489_v47 }
0x11e2   :  { %2493 = vrot.lane.b32.xlu1 %v2491_v56, %s4433_s1 }
0x1254   :  { %v2494_v2 = vpop.permute.xlu1 %2493 }
0x1255   :  { %v2496_v58 = vadd.f32 %v2494_v2, %v2486_v59 }
0x1257   :  { %4276 = vtanh.f32 %v2496_v58 }
0x1264   :  { %v4277_v24 = vpop.eup %4276 }
0x1265   :  { %2499 = vrot.lane.b32.xlu0 %v4277_v24, %s4432_s9 }
0x12d7   :  { %v2500_v25 = vpop.permute.xlu0 %2499 }
0x12d8   :  { %v4886_v26 = vmul.f32 %v4275_v57, %v2500_v25 }
0x12da   :  { %v2503_v61 = vpack.c.bf16 %v4886_v26, %v4886_v26 }
0x12dc   :  { %2505 = vrot.lane.b32.xlu1 %v2503_v61, %s4433_s1 }
0x134e   :  { %v2506_v46 = vpop.permute.xlu1 %2505 }
0x134f   :  { %3819 = vmatmul.mubr.msk.bf16.vlgmr.msra.gmra.mxu0 %vm2074_vm1, %v2506_v46 }
0x1350   :  { %3831 = vmatpush3.bf16.msra.mxu0 %v4224_v33 }
0x1351   :  { %3832 = vmatprep.subr.bf16.mxu0 %v4225_v38 }
0x1354   :  { %3833 = vmatpush3.bf16.msra.mxu0 %v4225_v38 }
0x1355   :  { %3858 = vmatprep.subr.bf16.mxu0 %v4430_v54 }
0x140f   :  { %v2544_v62 = vpop.f32.mrf.mxu0 }
0x1410   :  { %v2550_v5 = vadd.f32 %v2544_v62, %v4796_v50 }
0x1411   :  { %v3820_v8 = vpop.f32.mrf.mxu0 }
0x1412   :  { %4278 = vtanh.f32 %v2550_v5  ;;  %v3642_v4 = vmul.f32 -1.442695, %v2550_v5 }
0x1413   :  { %v2547_v43 = vpop.f32.mrf.mxu0 }
0x1414   :  { %4280 = vpow2.f32 %v3642_v4 }
0x1415   :  { %v3821_v27 = vpop.f32.mrf.mxu0 }
0x141f   :  { %v4279_v53 = vpop.eup %4278 }
0x1420   :  { %2560 = vrot.lane.b32.xlu0 %v4279_v53, %s4432_s9 }
0x1421   :  { %v4281_v6 = vpop.eup %4280 }
0x1422   :  { %v2554_v14 = vadd.f32 1.0, %v4281_v6  ;;  %v2658_v6 = vpack.c.bf16 %v4886_v26, %v4870_v45 }
0x1424   :  { %4282 = vrcp.f32 %v2554_v14 }
0x1431   :  { %v4283_v16 = vpop.eup %4282 }
0x1432   :  { %v2558_v29 = vmul.f32 %v4283_v16, %v2496_v58 }
0x1492   :  { %v2561_v28 = vpop.permute.xlu0 %2560 }
0x1493   :  { %v2563_v22 = vmul.f32 %v4283_v16, %v2561_v28 }
0x1495   :  { %2565 = vrot.lane.b32.xlu1 %v2563_v22, %s4433_s1 }
0x1507   :  { %v2566_v31 = vpop.permute.xlu1 %2565 }
0x1508   :  { %v4895_v50 = vadd.f32 %v2566_v31, %v2558_v29 }
0x150a   :  { %4284 = vtanh.f32 %v4895_v50 }
0x1517   :  { %v4285_v35 = vpop.eup %4284 }
0x1518   :  { %2571 = vrot.lane.b32.xlu0 %v4285_v35, %s4432_s9 }
0x151c   :  { %2670 = vrot.lane.b32.xlu0 %v2656_v36, %s4433_s1 }
0x158a   :  { %v2572_v39 = vpop.permute.xlu0 %2571 }
0x158b   :  { %v4909_v12 = vmul.f32 %v4283_v16, %v2572_v39 }
0x158d   :  { %v2575_v18 = vpack.c.bf16 %v4909_v12, %v4909_v12 }
0x158e   :  { %v2671_v63 = vpop.permute.xlu0 %2670 }
0x158f   :  { %2577 = vrot.lane.b32.xlu1 %v2575_v18, %s4433_s1  ;;  %3834 = vmatprep.mubr.msk.bf16.mxu0 %vm2074_vm1, %v2671_v63 }
0x1593   :  { %2672 = vrot.lane.b32.xlu1 %v2657_v9, %s4433_s1 }
0x1601   :  { %v2578_v15 = vpop.permute.xlu1 %2577 }
0x1602   :  { %3827 = vmatmul.mubr.msk.bf16.vlgmr.msra.gmra.mxu1 %vm2074_vm1, %v2578_v15 }
0x1603   :  { %3843 = vmatpush3.bf16.msra.mxu1 %v4921_v41  ;;  %3846 = vmatprep.mubr.msk.bf16.mxu1 %vm4431_vm0, %v4430_v54 }
0x1604   :  { %3844 = vmatprep.subr.bf16.mxu1 %v4430_v54 }
0x1605   :  { %v2673_v60 = vpop.permute.xlu1 %2672 }
0x1606   :  { %3835 = vmatmul.mubr.msk.bf16.vlgmr.msra.gmra.mxu0 %vm2074_vm1, %v2673_v60 }
0x1607   :  { %3845 = vmatpush3.bf16.msra.mxu1 %v4928_v19  ;;  %3859 = vmatpush3.bf16.msra.mxu0 %v4921_v41 }
0x1608   :  { %3850 = vmatprep.subr.bf16.mxu1 %v4430_v54  ;;  %3860 = vmatprep.subr.bf16.mxu0 %v4430_v54 }
0x160a   :  { %3847 = vmatmul.mubr.bf16.vlgmr.msra.gmra.mxu1 %v4429_v0 }
0x160b   :  { %3851 = vmatpush3.bf16.msra.mxu1 %v4921_v41  ;;  %3854 = vmatprep.mubr.msk.bf16.mxu1 %vm4431_vm0, %v4430_v54 }
0x160c   :  { %3852 = vmatprep.subr.bf16.mxu1 %v4430_v54  ;;  %3861 = vmatpush3.bf16.msra.mxu0 %v4928_v19 }
0x160d   :  { %3874 = vmatprep.subr.bf16.mxu0 %v4430_v54 }
0x160f   :  { %3853 = vmatpush3.bf16.msra.mxu1 %v4928_v19 }
0x1610   :  { %3866 = vmatprep.subr.bf16.mxu1 %v4430_v54 }
0x16c2   :  { %v2616_v32 = vpop.f32.mrf.mxu1 }
0x16c3   :  { %v2622_v7 = vadd.f32 %v2616_v32, %v4800_v3 }
0x16c4   :  { %v3828_v10 = vpop.f32.mrf.mxu1 }
0x16c5   :  { %v3644_v59 = vmul.f32 -1.442695, %v2622_v7 }
0x16c6   :  { %v2619_v0 = vpop.f32.mrf.mxu1  ;;  %v4948_v34 = vpop.f32.mrf.mxu0 }
0x16c8   :  { %v3829_v37 = vpop.f32.mrf.mxu1  ;;  %v2736_v42 = vpop.f32.mrf.mxu0 }
0x16c9   :  { %v2737_v52 = vadd.f32 %v4953_v40, %v2736_v42 }
0x16ca   :  { %v2813_v17 = vpop.f32.mrf.mxu1  ;;  %v4975_v28 = vpop.f32.mrf.mxu0 }
0x16cb   :  { %v2819_v44 = vadd.f32 %v2813_v17, %v2737_v52 }
0x16cc   :  { %v3848_v1 = vpop.f32.mrf.mxu1  ;;  %v2739_v22 = vpop.f32.mrf.mxu0 }
0x16cd   :  { %4286 = vtanh.f32 %v2819_v44  ;;  %v3654_v49 = vmul.f32 -1.442695, %v2819_v44  ;;  %v2740_v29 = vadd.f32 %v4953_v40, %v2739_v22 }
0x16ce   :  { %v2816_v11 = vpop.f32.mrf.mxu1 }
0x16cf   :  { %4288 = vpow2.f32 %v3654_v49 }
0x16d0   :  { %v3849_v48 = vpop.f32.mrf.mxu1 }
0x16da   :  { %v4287_v3 = vpop.eup %4286 }
0x16db   :  { %2829 = vrot.lane.b32.xlu0 %v4287_v3, %s4432_s9  ;;  %v2745_v3 = vadd.f32 %v4948_v34, %v4953_v40 }
0x16dc   :  { %v4289_v30 = vpop.eup %4288 }
0x16dd   :  { %v2823_v20 = vadd.f32 1.0, %v4289_v30 }
0x16df   :  { %4290 = vrcp.f32 %v2823_v20 }
0x16ec   :  { %v4291_v23 = vpop.eup %4290 }
0x16ed   :  { %v2827_v21 = vmul.f32 0.0, %v4291_v23 }
0x174d   :  { %v2830_v51 = vpop.permute.xlu0 %2829 }
0x174e   :  { %v2832_v55 = vmul.f32 %v4291_v23, %v2830_v51 }
0x1750   :  { %2834 = vrot.lane.b32.xlu1 %v2832_v55, %s4433_s1 }
0x17c2   :  { %v2835_v13 = vpop.permute.xlu1 %2834 }
0x17c3   :  { %v2837_v57 = vadd.f32 %v2835_v13, %v2827_v21 }
0x17c5   :  { %4292 = vtanh.f32 %v2837_v57 }
0x17c6   :  { %4294 = vtanh.f32 %v2622_v7 }
0x17c7   :  { %4296 = vpow2.f32 %v3644_v59 }
0x17d2   :  { %v4293_v47 = vpop.eup %4292 }
0x17d3   :  { %2840 = vrot.lane.b32.xlu0 %v4293_v47, %s4432_s9  ;;  %v4295_v56 = vpop.eup %4294 }
0x17d4   :  { %v4297_v2 = vpop.eup %4296 }
0x17d5   :  { %v2626_v58 = vadd.f32 1.0, %v4297_v2 }
0x17d7   :  { %2632 = vrot.lane.b32.xlu0 %v4295_v56, %s4432_s9  ;;  %4298 = vrcp.f32 %v2626_v58 }
0x17e4   :  { %v4299_v46 = vpop.eup %4298 }
0x17e5   :  { %v2630_v43 = vmul.f32 %v4299_v46, %v4895_v50 }
0x1845   :  { %v2841_v24 = vpop.permute.xlu0 %2840 }
0x1846   :  { %v2843_v25 = vmul.f32 %v4291_v23, %v2841_v24 }
0x1848   :  { %v2844_v61 = vpack.c.bf16 %v2843_v25, %v2843_v25 }
0x1849   :  { %v2633_v62 = vpop.permute.xlu0 %2632 }
0x184a   :  { %v2635_v5 = vmul.f32 %v4299_v46, %v2633_v62  ;;  %2846 = vrot.lane.b32.xlu1 %v2844_v61, %s4433_s1 }
0x184c   :  { %2637 = vrot.lane.b32.xlu0 %v2635_v5, %s4433_s1  ;;  %v2748_v5 = vadd.f32 %v4975_v28, %v4953_v40 }
0x18bc   :  { %v2847_v8 = vpop.permute.xlu1 %2846 }
0x18bd   :  { %3855 = vmatmul.mubr.msk.bf16.vlgmr.msra.gmra.mxu1 %vm2074_vm1, %v2847_v8 }
0x18be   :  { %v2638_v27 = vpop.permute.xlu0 %2637  ;;  %3867 = vmatpush3.bf16.msra.mxu1 %v4921_v41  ;;  %3870 = vmatprep.mubr.msk.bf16.mxu1 %vm4431_vm0, %v4430_v54 }
0x18bf   :  { %v2640_v53 = vadd.f32 %v2638_v27, %v2630_v43  ;;  %3868 = vmatprep.subr.bf16.mxu1 %v4430_v54 }
0x18c1   :  { %4300 = vtanh.f32 %v2640_v53 }
0x18c2   :  { %3869 = vmatpush3.bf16.msra.mxu1 %v4928_v19 }
0x18c3   :  { %3882 = vmatprep.subr.bf16.mxu1 %v4430_v54 }
0x18ce   :  { %v4301_v4 = vpop.eup %4300 }
0x18cf   :  { %2643 = vrot.lane.b32.xlu0 %v4301_v4, %s4432_s9 }
0x18d3   :  { %2674 = vrot.lane.b32.xlu0 %v2658_v6, %s4433_s1 }
0x1941   :  { %v2644_v14 = vpop.permute.xlu0 %2643 }
0x1942   :  { %v2646_v7 = vmul.f32 %v4299_v46, %v2644_v14 }
0x1944   :  { %v2659_v0 = vpack.c.bf16 %v2646_v7, %v4909_v12 }
0x1945   :  { %v2675_v16 = vpop.permute.xlu0 %2674 }
0x1946   :  { %3838 = vmatprep.mubr.msk.bf16.mxu0 %vm2074_vm1, %v2675_v16 }
0x197d   :  { %v2885_v31 = vpop.f32.mrf.mxu1 }
0x197e   :  { %v2891_v50 = vadd.f32 %v2885_v31, %v2740_v29 }
0x197f   :  { %v3856_v33 = vpop.f32.mrf.mxu1 }
0x1980   :  { %4302 = vtanh.f32 %v2891_v50  ;;  %v3656_v45 = vmul.f32 -1.442695, %v2891_v50 }
0x1981   :  { %v2888_v35 = vpop.f32.mrf.mxu1 }
0x1982   :  { %4304 = vpow2.f32 %v3656_v45 }
0x1983   :  { %v3857_v36 = vpop.f32.mrf.mxu1 }
0x198d   :  { %v4303_v38 = vpop.eup %4302 }
0x198e   :  { %2901 = vrot.lane.b32.xlu1 %v4303_v38, %s4432_s9 }
0x198f   :  { %v4305_v26 = vpop.eup %4304 }
0x1990   :  { %v2895_v39 = vadd.f32 1.0, %v4305_v26 }
0x1992   :  { %4306 = vrcp.f32 %v2895_v39 }
0x199f   :  { %v4307_v18 = vpop.eup %4306 }
0x19a0   :  { %v2899_v15 = vmul.f32 %v4307_v18, %v2837_v57 }
0x1a00   :  { %v2902_v63 = vpop.permute.xlu1 %2901 }
0x1a01   :  { %v2904_v9 = vmul.f32 %v4307_v18, %v2902_v63 }
0x1a03   :  { %2906 = vrot.lane.b32.xlu1 %v2904_v9, %s4433_s1 }
0x1a75   :  { %v2907_v60 = vpop.permute.xlu1 %2906 }
0x1a76   :  { %v2909_v32 = vadd.f32 %v2907_v60, %v2899_v15 }
0x1a78   :  { %4308 = vtanh.f32 %v2909_v32 }
0x1a85   :  { %v4309_v10 = vpop.eup %4308 }
0x1a86   :  { %2912 = vrot.lane.b32.xlu1 %v4309_v10, %s4432_s9 }
0x1a8a   :  { %2676 = vrot.lane.b32.xlu1 %v2659_v0, %s4433_s1 }
0x1af8   :  { %v2913_v37 = vpop.permute.xlu1 %2912 }
0x1af9   :  { %v2915_v42 = vmul.f32 %v4307_v18, %v2913_v37 }
0x1afb   :  { %v2916_v52 = vpack.c.bf16 %v2915_v42, %v2915_v42 }
0x1afc   :  { %v2677_v17 = vpop.permute.xlu1 %2676 }
0x1afd   :  { %2918 = vrot.lane.b32.xlu0 %v2916_v52, %s4433_s1  ;;  %3839 = vmatmul.mubr.msk.bf16.gmra.mxu0 %vm2074_vm1, %v2677_v17 }
0x1afe   :  { %3862 = vmatprep.mubr.msk.bf16.mxu0 %vm4431_vm0, %v4430_v54 }
0x1b6f   :  { %v2919_v44 = vpop.permute.xlu0 %2918 }
0x1b70   :  { %3863 = vmatmul.mubr.msk.bf16.vlgmr.msra.gmra.mxu0 %vm2074_vm1, %v2919_v44 }
0x1b71   :  { %3875 = vmatpush3.bf16.msra.mxu0 %v4921_v41  ;;  %3878 = vmatprep.mubr.msk.bf16.mxu0 %vm4431_vm0, %v4430_v54 }
0x1b72   :  { %3876 = vmatprep.subr.bf16.mxu0 %v4430_v54 }
0x1b75   :  { %3877 = vmatpush3.bf16.msra.mxu0 %v4928_v19 }
0x1b76   :  { %3890 = vmatprep.subr.bf16.mxu0 %v4430_v54 }
0x1bbd   :  { %v4994_v12 = vpop.f32.mrf.mxu0 }
0x1bbf   :  { %v4996_v1 = vpop.f32.mrf.mxu0 }
0x1bc0   :  { %v2753_v18 = vadd.f32 %v4953_v40, %v4996_v1 }
0x1bc1   :  { %v4998_v11 = vpop.f32.mrf.mxu0 }
0x1bc3   :  { %v5000_v48 = vpop.f32.mrf.mxu0 }
0x1c30   :  { %v2957_v49 = vpop.f32.mrf.mxu0 }
0x1c31   :  { %v2963_v30 = vadd.f32 %v2957_v49, %v2745_v3 }
0x1c32   :  { %v3864_v20 = vpop.f32.mrf.mxu0 }
0x1c33   :  { %4310 = vtanh.f32 %v2963_v30  ;;  %v3658_v21 = vmul.f32 -1.442695, %v2963_v30 }
0x1c34   :  { %v2960_v23 = vpop.f32.mrf.mxu0 }
0x1c35   :  { %4312 = vpow2.f32 %v3658_v21 }
0x1c36   :  { %v3865_v51 = vpop.f32.mrf.mxu0 }
0x1c40   :  { %v4311_v55 = vpop.eup %4310 }
0x1c41   :  { %2973 = vrot.lane.b32.xlu1 %v4311_v55, %s4432_s9  ;;  %v2756_v55 = vadd.f32 %v4953_v40, %v5000_v48 }
0x1c42   :  { %v4313_v13 = vpop.eup %4312 }
0x1c43   :  { %v2967_v57 = vadd.f32 1.0, %v4313_v13 }
0x1c45   :  { %4314 = vrcp.f32 %v2967_v57 }
0x1c52   :  { %v4315_v47 = vpop.eup %4314 }
0x1c53   :  { %v2971_v34 = vmul.f32 %v4315_v47, %v2909_v32 }
0x1cb3   :  { %v2974_v56 = vpop.permute.xlu1 %2973 }
0x1cb4   :  { %v2976_v59 = vmul.f32 %v4315_v47, %v2974_v56 }
0x1cb6   :  { %2978 = vrot.lane.b32.xlu0 %v2976_v59, %s4433_s1 }
0x1d28   :  { %v2979_v2 = vpop.permute.xlu0 %2978 }
0x1d29   :  { %v2981_v58 = vadd.f32 %v2979_v2, %v2971_v34 }
0x1d2b   :  { %4316 = vtanh.f32 %v2981_v58 }
0x1d38   :  { %v4317_v24 = vpop.eup %4316 }
0x1d39   :  { %2984 = vrot.lane.b32.xlu1 %v4317_v24, %s4432_s9 }
0x1dab   :  { %v2985_v25 = vpop.permute.xlu1 %2984 }
0x1dac   :  { %v2987_v61 = vmul.f32 %v4315_v47, %v2985_v25 }
0x1dae   :  { %v2988_v46 = vpack.c.bf16 %v2987_v61, %v2987_v61 }
0x1db0   :  { %2990 = vrot.lane.b32.xlu0 %v2988_v46, %s4433_s1 }
0x1e22   :  { %v2991_v62 = vpop.permute.xlu0 %2990 }
0x1e23   :  { %3871 = vmatmul.mubr.msk.bf16.vlgmr.msra.gmra.mxu1 %vm2074_vm1, %v2991_v62 }
0x1e24   :  { %3883 = vmatpush3.bf16.msra.mxu1 %v4921_v41  ;;  %3886 = vmatprep.mubr.msk.bf16.mxu1 %vm4431_vm0, %v4430_v54 }
0x1e25   :  { %3884 = vmatprep.subr.bf16.mxu1 %v4430_v54 }
0x1e28   :  { %3885 = vmatpush3.bf16.msra.mxu1 %v4928_v19 }
0x1e29   :  { %3898 = vmatprep.subr.bf16.mxu1 %v4430_v54 }
0x1ee3   :  { %v3029_v8 = vpop.f32.mrf.mxu1 }
0x1ee4   :  { %v3035_v43 = vadd.f32 %v3029_v8, %v2748_v5 }
0x1ee5   :  { %v3872_v27 = vpop.f32.mrf.mxu1 }
0x1ee6   :  { %4318 = vtanh.f32 %v3035_v43  ;;  %v3660_v14 = vmul.f32 -1.442695, %v3035_v43  ;;  %v2761_v27 = vadd.f32 %v4994_v12, %v4953_v40 }
0x1ee7   :  { %v3032_v53 = vpop.f32.mrf.mxu1 }
0x1ee8   :  { %4320 = vpow2.f32 %v3660_v14 }
0x1ee9   :  { %v3873_v4 = vpop.f32.mrf.mxu1 }
0x1ef3   :  { %v4319_v6 = vpop.eup %4318 }
0x1ef4   :  { %3045 = vrot.lane.b32.xlu1 %v4319_v6, %s4432_s9 }
0x1ef5   :  { %v4321_v16 = vpop.eup %4320 }
0x1ef6   :  { %v3039_v22 = vadd.f32 1.0, %v4321_v16 }
0x1ef8   :  { %4322 = vrcp.f32 %v3039_v22 }
0x1f05   :  { %v4323_v29 = vpop.eup %4322 }
0x1f06   :  { %v3043_v28 = vmul.f32 %v4323_v29, %v2981_v58 }
0x1f66   :  { %v3046_v31 = vpop.permute.xlu1 %3045 }
0x1f67   :  { %v3048_v50 = vmul.f32 %v4323_v29, %v3046_v31 }
0x1f69   :  { %3050 = vrot.lane.b32.xlu0 %v3048_v50, %s4433_s1 }
0x1fdb   :  { %v3051_v33 = vpop.permute.xlu0 %3050 }
0x1fdc   :  { %v3053_v35 = vadd.f32 %v3051_v33, %v3043_v28 }
0x1fde   :  { %4324 = vtanh.f32 %v3053_v35 }
0x1feb   :  { %v4325_v36 = vpop.eup %4324 }
0x1fec   :  { %3056 = vrot.lane.b32.xlu1 %v4325_v36, %s4432_s9 }
0x205e   :  { %v3057_v38 = vpop.permute.xlu1 %3056 }
0x205f   :  { %v3059_v45 = vmul.f32 %v4323_v29, %v3057_v38 }
0x2061   :  { %v3060_v26 = vpack.c.bf16 %v3059_v45, %v3059_v45 }
0x2063   :  { %3062 = vrot.lane.b32.xlu0 %v3060_v26, %s4433_s1 }
0x20d5   :  { %v3063_v39 = vpop.permute.xlu0 %3062 }
0x20d6   :  { %3879 = vmatmul.mubr.msk.bf16.vlgmr.msra.gmra.mxu0 %vm2074_vm1, %v3063_v39 }
0x20d7   :  { %3891 = vmatpush3.bf16.msra.mxu0 %v4921_v41  ;;  %3894 = vmatprep.mubr.msk.bf16.mxu0 %vm4431_vm0, %v4430_v54 }
0x20d8   :  { %3892 = vmatprep.subr.bf16.mxu0 %v4430_v54 }
0x20db   :  { %3893 = vmatpush3.bf16.msra.mxu0 %v4928_v19 }
0x20dc   :  { %3906 = vmatprep.subr.bf16.mxu0 %v4430_v54 }
0x2196   :  { %v3101_v63 = vpop.f32.mrf.mxu0 }
0x2197   :  { %v3107_v9 = vadd.f32 %v3101_v63, %v2753_v18 }
0x2198   :  { %v3880_v15 = vpop.f32.mrf.mxu0 }
0x2199   :  { %4326 = vtanh.f32 %v3107_v9  ;;  %v3662_v10 = vmul.f32 -1.442695, %v3107_v9  ;;  %v2764_v9 = vadd.f32 %v4998_v11, %v4953_v40 }
0x219a   :  { %v3104_v60 = vpop.f32.mrf.mxu0 }
0x219b   :  { %4328 = vpow2.f32 %v3662_v10 }
0x219c   :  { %v3881_v32 = vpop.f32.mrf.mxu0 }
0x21a6   :  { %v4327_v7 = vpop.eup %4326 }
0x21a7   :  { %3117 = vrot.lane.b32.xlu1 %v4327_v7, %s4432_s9 }
0x21a8   :  { %v4329_v0 = vpop.eup %4328 }
0x21a9   :  { %v3111_v37 = vadd.f32 1.0, %v4329_v0 }
0x21ab   :  { %4330 = vrcp.f32 %v3111_v37 }
0x21b8   :  { %v4331_v42 = vpop.eup %4330 }
0x21b9   :  { %v3115_v44 = vmul.f32 %v4331_v42, %v3053_v35 }
0x2219   :  { %v3118_v52 = vpop.permute.xlu1 %3117 }
0x221a   :  { %v3120_v17 = vmul.f32 %v4331_v42, %v3118_v52 }
0x221c   :  { %3122 = vrot.lane.b32.xlu0 %v3120_v17, %s4433_s1 }
0x228e   :  { %v3123_v1 = vpop.permute.xlu0 %3122 }
0x228f   :  { %v3125_v3 = vadd.f32 %v3123_v1, %v3115_v44 }
0x2291   :  { %4332 = vtanh.f32 %v3125_v3 }
0x229e   :  { %v4333_v49 = vpop.eup %4332 }
0x229f   :  { %3128 = vrot.lane.b32.xlu1 %v4333_v49, %s4432_s9  ;;  %v4228_v49 = vld [vmem:[%s5089_s13 + $0x8] sm:$0xff]  }
0x2311   :  { %v3129_v30 = vpop.permute.xlu1 %3128 }
0x2312   :  { %v3131_v20 = vmul.f32 %v4331_v42, %v3129_v30  ;;  %v4229_v30 = vld [vmem:[%s5089_s13] sm:$0xff]  }
0x2314   :  { %v3132_v23 = vpack.c.bf16 %v3131_v20, %v3131_v20 }
0x2316   :  { %3134 = vrot.lane.b32.xlu0 %v3132_v23, %s4433_s1 }
0x2388   :  { %v3135_v51 = vpop.permute.xlu0 %3134 }
0x2389   :  { %3887 = vmatmul.mubr.msk.bf16.vlgmr.msra.gmra.mxu1 %vm2074_vm1, %v3135_v51 }
0x238a   :  { %3899 = vmatpush3.bf16.msra.mxu1 %v4921_v41  ;;  %3902 = vmatprep.mubr.msk.bf16.mxu1 %vm4431_vm0, %v4430_v54 }
0x238b   :  { %3900 = vmatprep.subr.bf16.mxu1 %v4430_v54 }
0x238e   :  { %3901 = vmatpush3.bf16.msra.mxu1 %v4928_v19 }
0x2449   :  { %v3173_v21 = vpop.f32.mrf.mxu1 }
0x244a   :  { %v3179_v13 = vadd.f32 %v3173_v21, %v2756_v55 }
0x244b   :  { %v3888_v57 = vpop.f32.mrf.mxu1 }
0x244c   :  { %4334 = vtanh.f32 %v3179_v13  ;;  %v3664_v41 = vmul.f32 -1.442695, %v3179_v13  ;;  %v3669_v13 = vld [vmem:[%s5090_s14] ss:$0 sm:$0xff] }
0x244d   :  { %v3176_v47 = vpop.f32.mrf.mxu1 }
0x244e   :  { %4336 = vpow2.f32 %v3664_v41 }
0x244f   :  { %v3889_v56 = vpop.f32.mrf.mxu1 }
0x2459   :  { %v4335_v59 = vpop.eup %4334 }
0x245a   :  { %3189 = vrot.lane.b32.xlu1 %v4335_v59, %s4432_s9 }
0x245b   :  { %v4337_v34 = vpop.eup %4336 }
0x245c   :  { %v3183_v2 = vadd.f32 1.0, %v4337_v34 }
0x245e   :  { %4338 = vrcp.f32 %v3183_v2 }
0x246b   :  { %v4339_v58 = vpop.eup %4338 }
0x246c   :  { %v3187_v48 = vmul.f32 %v4339_v58, %v3125_v3 }
0x24cc   :  { %v3190_v24 = vpop.permute.xlu1 %3189 }
0x24cd   :  { %v3192_v19 = vmul.f32 %v4339_v58, %v3190_v24 }
0x24cf   :  { %3194 = vrot.lane.b32.xlu0 %v3192_v19, %s4433_s1 }
0x2541   :  { %v3195_v25 = vpop.permute.xlu0 %3194 }
0x2542   :  { %v3197_v61 = vadd.f32 %v3195_v25, %v3187_v48 }
0x2544   :  { %4340 = vtanh.f32 %v3197_v61 }
0x2551   :  { %v4341_v46 = vpop.eup %4340 }
0x2552   :  { %3200 = vrot.lane.b32.xlu1 %v4341_v46, %s4432_s9 }
0x25c4   :  { %v3201_v62 = vpop.permute.xlu1 %3200 }
0x25c5   :  { %v3203_v5 = vmul.f32 %v4339_v58, %v3201_v62 }
0x25c7   :  { %v3204_v8 = vpack.c.bf16 %v3203_v5, %v3203_v5 }
0x25c9   :  { %3206 = vrot.lane.b32.xlu0 %v3204_v8, %s4433_s1 }
0x263b   :  { %v3207_v43 = vpop.permute.xlu0 %3206 }
0x263c   :  { %3895 = vmatmul.mubr.msk.bf16.vlgmr.msra.gmra.mxu0 %vm2074_vm1, %v3207_v43 }
0x263d   :  { %3910 = vmatprep.mubr.msk.bf16.mxu0 %vm4431_vm0, %v4430_v54  ;;  %3907 = vmatpush3.bf16.msra.mxu0 %v4228_v49 }
0x263e   :  { %3908 = vmatprep.subr.bf16.mxu0 %v4430_v54 }
0x2641   :  { %3909 = vmatpush3.bf16.msra.mxu0 %v4229_v30 }
0x26fc   :  { %v3245_v53 = vpop.f32.mrf.mxu0 }
0x26fd   :  { %v3251_v4 = vadd.f32 %v3245_v53, %v2761_v27 }
0x26fe   :  { %v3896_v6 = vpop.f32.mrf.mxu0 }
0x26ff   :  { %4342 = vtanh.f32 %v3251_v4  ;;  %v3666_v29 = vmul.f32 -1.442695, %v3251_v4 }
0x2700   :  { %v3248_v14 = vpop.f32.mrf.mxu0 }
0x2701   :  { %4344 = vpow2.f32 %v3666_v29 }
0x2702   :  { %v3897_v16 = vpop.f32.mrf.mxu0 }
0x270c   :  { %v4343_v22 = vpop.eup %4342 }
0x270d   :  { %3261 = vrot.lane.b32.xlu1 %v4343_v22, %s4432_s9 }
0x270e   :  { %v4345_v31 = vpop.eup %4344 }
0x270f   :  { %v3255_v50 = vadd.f32 1.0, %v4345_v31 }
0x2711   :  { %4346 = vrcp.f32 %v3255_v50 }
0x271e   :  { %v4347_v28 = vpop.eup %4346 }
0x271f   :  { %v3259_v12 = vmul.f32 %v4347_v28, %v3197_v61 }
0x277f   :  { %v3262_v33 = vpop.permute.xlu1 %3261 }
0x2780   :  { %v3264_v35 = vmul.f32 %v4347_v28, %v3262_v33 }
0x2782   :  { %3266 = vrot.lane.b32.xlu0 %v3264_v35, %s4433_s1 }
0x27f4   :  { %v3267_v36 = vpop.permute.xlu0 %3266 }
0x27f5   :  { %v3269_v38 = vadd.f32 %v3267_v36, %v3259_v12 }
0x27f7   :  { %4348 = vtanh.f32 %v3269_v38 }
0x2804   :  { %v4349_v45 = vpop.eup %4348 }
0x2805   :  { %3272 = vrot.lane.b32.xlu1 %v4349_v45, %s4432_s9 }
0x2877   :  { %v3273_v26 = vpop.permute.xlu1 %3272 }
0x2878   :  { %v3275_v39 = vmul.f32 %v4347_v28, %v3273_v26 }
0x287a   :  { %v3276_v18 = vpack.c.bf16 %v3275_v39, %v3275_v39 }
0x287c   :  { %3278 = vrot.lane.b32.xlu0 %v3276_v18, %s4433_s1 }
0x28ee   :  { %v3279_v63 = vpop.permute.xlu0 %3278 }
0x28ef   :  { %3903 = vmatmul.mubr.msk.bf16.vlgmr.msra.gmra.mxu1 %vm2074_vm1, %v3279_v63 }
0x29af   :  { %v3317_v15 = vpop.f32.mrf.mxu1 }
0x29b0   :  { %v3323_v60 = vadd.f32 %v3317_v15, %v2764_v9 }
0x29b1   :  { %v3904_v32 = vpop.f32.mrf.mxu1 }
0x29b2   :  { %4350 = vtanh.f32 %v3323_v60  ;;  %v3668_v37 = vmul.f32 -1.442695, %v3323_v60 }
0x29b3   :  { %v3320_v7 = vpop.f32.mrf.mxu1 }
0x29b4   :  { %4352 = vpow2.f32 %v3668_v37 }
0x29b5   :  { %v3905_v10 = vpop.f32.mrf.mxu1 }
0x29bf   :  { %v4351_v0 = vpop.eup %4350 }
0x29c0   :  { %3333 = vrot.lane.b32.xlu1 %v4351_v0, %s4432_s9 }
0x29c1   :  { %v4353_v42 = vpop.eup %4352 }
0x29c2   :  { %v3327_v52 = vadd.f32 1.0, %v4353_v42 }
0x29c4   :  { %4354 = vrcp.f32 %v3327_v52 }
0x29d1   :  { %v4355_v17 = vpop.eup %4354 }
0x29d2   :  { %v3331_v40 = vmul.f32 %v4355_v17, %v3269_v38 }
0x2a32   :  { %v3334_v44 = vpop.permute.xlu1 %3333 }
0x2a33   :  { %v3336_v1 = vmul.f32 %v4355_v17, %v3334_v44 }
0x2a35   :  { %3338 = vrot.lane.b32.xlu0 %v3336_v1, %s4433_s1 }
0x2aa7   :  { %v3339_v11 = vpop.permute.xlu0 %3338 }
0x2aa8   :  { %v3341_v3 = vadd.f32 %v3339_v11, %v3331_v40 }
0x2aaa   :  { %4356 = vtanh.f32 %v3341_v3 }
0x2ab7   :  { %v4357_v20 = vpop.eup %4356 }
0x2ab8   :  { %3344 = vrot.lane.b32.xlu1 %v4357_v20, %s4432_s9 }
0x2b2a   :  { %v3345_v23 = vpop.permute.xlu1 %3344 }
0x2b2b   :  { %v3347_v51 = vmul.f32 %v4355_v17, %v3345_v23 }
0x2b2d   :  { %v3348_v55 = vpack.c.bf16 %v3347_v51, %v3347_v51 }
0x2b2f   :  { %3361 = vrot.lane.b32.xlu0 %v3348_v55, %s4433_s1 }
0x2ba1   :  { %v3362_v21 = vpop.permute.xlu0 %3361 }
0x2ba2   :  { %3911 = vmatmul.mubr.msk.bf16.vlgmr.msra.gmra.mxu0 %vm2074_vm1, %v3362_v21 }
0x2c62   :  { %v3412_v57 = vpop.f32.mrf.mxu0 }
0x2c63   :  { %v3413_v47 = vadd.f32 %v3669_v13, %v3412_v57 }
0x2c64   :  { %v3912_v56 = vpop.f32.mrf.mxu0 }
0x2c65   :  { %3418 = vst [vmem:[%s5091_s15] sm:$0xff] %v3413_v47 }
0x2c66   :  { %v3415_v54 = vpop.f32.mrf.mxu0 }
0x2c68   :  { %v3913_v59 = vpop.f32.mrf.mxu0 }
0x2c69   :  { %3423 = vsyncpa [#allocation3], 1 }
0x2c6a   :  { %3424 = vsyncpa [#allocation5], 1 }

</bundles_post_ra>
